<compile_context>
chip_gen: v7x
topology: tpu7x:2x2x1
jax: 0.10.0
libtpu: 0.0.40
codegen_flags: <defaults>
</compile_context>

<pallas_src>
import math
import functools

import jax
import jax.numpy as jnp
import numpy as np
from jax.experimental import pallas as pl
from jax.experimental.pallas import tpu as pltpu

_EPS = 1e-5                      # nn.InstanceNorm2d default eps
_SLOPE = 0.2                     # LeakyReLU(0.2)
_MATMUL_DTYPE = jnp.bfloat16     # MXU input dtype for the conv matmuls (f32 accumulate)
_INV_SQRT2 = 1.0 / math.sqrt(2.0)


def _round_up(x, m):
    return ((x + m - 1) // m) * m


def _lrelu(x):
    return jnp.where(x >= 0, x, _SLOPE * x)


def _adain_resblk_kernel(
    x_ref, g1_ref, bt1_ref, g2_ref, bt2_ref,
    w1_ref, cb1_ref, w2_ref, cb2_ref, *rest,
    H, W, PAD, learned_sc,
):
    if learned_sc:
        scw_ref, out_ref, pad1_ref, pad2_ref = rest
    else:
        out_ref, pad1_ref, pad2_ref = rest
        scw_ref = None

    S = H * W
    Cout = w1_ref.shape[-1]
    Cout_p = out_ref.shape[-1]

    x = x_ref[0].astype(jnp.float32)             # (S, Cin)  -- NHWC flattened

    # (S, 1) column-validity masks for the +-1 horizontal taps, hoisted.
    col_id = jax.lax.broadcasted_iota(jnp.int32, (S, 1), 0) % W
    left_ok = col_id >= 1            # position has a valid left neighbour  (dx = -1)
    right_ok = col_id <= W - 2       # position has a valid right neighbour (dx = +1)

    def adain_lrelu(v, gamma, beta):
        # v: (S, C) f32.  InstanceNorm (biased var, single fused stats pass) +
        # style affine + LeakyReLU(0.2).  All in f32.
        mean = jnp.mean(v, axis=0, keepdims=True)
        mean_sq = jnp.mean(v * v, axis=0, keepdims=True)
        var = jnp.maximum(mean_sq - mean * mean, 0.0)
        vn = (v - mean) * jax.lax.rsqrt(var + _EPS)
        return _lrelu((1.0 + gamma) * vn + beta)

    def conv3x3(v, pad_ref, w_ref, bias):
        # 3x3 / stride-1 / pad-1 conv as 9 accumulated per-tap K=C matmuls.
        # Row shifts come from dense 1-D windows of a flat zero-bordered scratch
        # (interior store sublane aligned); column wraparound is removed with the
        # (S, 1) masks above.  No (S, 9*C) im2col matrix is ever materialized.
        C = v.shape[-1]
        border = jnp.zeros((PAD, C), jnp.float32)
        pad_ref[0:PAD, :] = border                    # only the small borders
        pad_ref[PAD + S:2 * PAD + S, :] = border
        pad_ref[PAD:PAD + S, :] = v                   # aligned interior store
        acc = None
        for t in range(9):
            dy, dx = t // 3 - 1, t % 3 - 1
            start = PAD + dy * W + dx                 # static slice start
            tap = pad_ref[start:start + S, :]
            if dx == -1:
                tap = jnp.where(left_ok, tap, 0.0)
            elif dx == 1:
                tap = jnp.where(right_ok, tap, 0.0)
            part = jnp.dot(tap.astype(_MATMUL_DTYPE), w_ref[t],
                           preferred_element_type=jnp.float32)
            acc = part if acc is None else acc + part
        return acc + bias

    # ---- residual branch ----
    h = adain_lrelu(x, g1_ref[0], bt1_ref[0])
    h = conv3x3(h, pad1_ref, w1_ref, cb1_ref[...])            # (S, Cout)
    h = adain_lrelu(h, g2_ref[0], bt2_ref[0])
    res = conv3x3(h, pad2_ref, w2_ref, cb2_ref[...])          # (S, Cout_p)

    # ---- shortcut + output ----
    if learned_sc:
        # learned 1x1 shortcut folded in as one extra K=Cin matmul
        res = res + jnp.dot(x.astype(_MATMUL_DTYPE), scw_ref[...],
                            preferred_element_type=jnp.float32)
    else:
        # identity shortcut: exact f32 residual add (matches the reference exactly)
        sc = x
        if Cout_p > Cout:
            sc = jnp.concatenate(
                [sc, jnp.zeros((S, Cout_p - Cout), jnp.float32)], axis=1)
        res = res + sc

    out_ref[0] = (res * _INV_SQRT2).astype(out_ref.dtype)


def init_params(key, dim_in, dim_out, style_dim):
    ks = jax.random.split(key, 9)
    n = lambda k, shape: 0.1 * jax.random.normal(k, shape, jnp.float32)
    p = {
        'conv1_w': n(ks[0], (dim_out, dim_in, 3, 3)),
        'conv1_b': n(ks[1], (dim_out,)),
        'conv2_w': n(ks[2], (dim_out, dim_out, 3, 3)),
        'conv2_b': n(ks[3], (dim_out,)),
        'fc1_w': n(ks[4], (2 * dim_in, style_dim)),
        'fc1_b': n(ks[5], (2 * dim_in,)),
        'fc2_w': n(ks[6], (2 * dim_out, style_dim)),
        'fc2_b': n(ks[7], (2 * dim_out,)),
    }
    if dim_in != dim_out:                      # learned 1x1 shortcut, bias=False
        p['sc_w'] = n(ks[8], (dim_out, dim_in, 1, 1))
    return p


def _vmem_bytes(shape, itemsize):
    """(8,128)-tile-padded VMEM footprint of one buffer holding `shape`."""
    shape = tuple(int(d) for d in shape)
    if len(shape) < 2:
        shape = (1,) * (2 - len(shape)) + shape
    lead = int(np.prod(shape[:-2], dtype=np.int64)) if len(shape) > 2 else 1
    return int(lead * _round_up(shape[-2], 8) * _round_up(shape[-1], 128) * itemsize)


def adain_resblk_forward(x_nchw, s, params):
    B, Cin, H, W = x_nchw.shape
    Cout = params['conv1_w'].shape[0]
    learned_sc = 'sc_w' in params
    S = H * W
    PAD = _round_up(W + 1, 8)            # flat zero border (>= one image row + 1)
    Cout_p = _round_up(Cout, 128)        # lane-dense output store

    hp = jax.lax.Precision.HIGHEST

    # ---- glue: layouts, hoisted style FCs, parameter repack (plain JAX) ----
    x_f = jnp.transpose(x_nchw, (0, 2, 3, 1)).reshape(B, S, Cin)

    # style FCs hoisted out of the kernel: one XLA matmul for the whole batch
    h1 = jnp.dot(s, params['fc1_w'].T, precision=hp) + params['fc1_b']
    h2 = jnp.dot(s, params['fc2_w'].T, precision=hp) + params['fc2_b']
    gamma1 = h1[:, :Cin].reshape(B, 1, Cin)
    beta1 = h1[:, Cin:].reshape(B, 1, Cin)
    gamma2 = h2[:, :Cout].reshape(B, 1, Cout)
    beta2 = h2[:, Cout:].reshape(B, 1, Cout)

    # torch conv weight (O, I, 3, 3) -> tap-major (9, I, O) bf16
    w1 = jnp.transpose(params['conv1_w'], (2, 3, 1, 0)).reshape(9, Cin, Cout)
    w2 = jnp.transpose(params['conv2_w'], (2, 3, 1, 0)).reshape(9, Cout, Cout)
    w2 = jnp.pad(w2, ((0, 0), (0, 0), (0, Cout_p - Cout)))     # lane-dense N
    cb1 = params['conv1_b'].reshape(1, Cout)
    cb2 = jnp.pad(params['conv2_b'], (0, Cout_p - Cout)).reshape(1, Cout_p)
    w1 = w1.astype(_MATMUL_DTYPE)
    w2 = w2.astype(_MATMUL_DTYPE)

    inputs = [x_f, gamma1, beta1, gamma2, beta2, w1, cb1, w2, cb2]
    if learned_sc:
        scw = params['sc_w'].reshape(Cout, Cin).T              # (Cin, Cout)
        scw = jnp.pad(scw, ((0, 0), (0, Cout_p - Cout))).astype(_MATMUL_DTYPE)
        inputs.append(scw)

    def batch_spec(a):
        nd = a.ndim
        return pl.BlockSpec((1,) + a.shape[1:],
                            lambda b, nd=nd: (b,) + (0,) * (nd - 1))

    def full_spec(a):
        nd = a.ndim
        return pl.BlockSpec(a.shape, lambda b, nd=nd: (0,) * nd)

    in_specs = [batch_spec(a) for a in inputs[:5]] + [full_spec(a) for a in inputs[5:]]

    # ---- VMEM budget (tile-padded), clamped to the device's actual capacity ----
    try:
        device_vmem = int(pltpu.get_tpu_info().vmem_capacity_bytes)
    except Exception:
        device_vmem = 64 * 1024 * 1024     # conservative (v7x per-TC VMEM)

    io_bytes = sum(_vmem_bytes((1,) + a.shape[1:], a.dtype.itemsize)
                   for a in inputs[:5])
    io_bytes += _vmem_bytes((1, S, Cout_p), 4)                       # output block
    param_bytes = sum(_vmem_bytes(a.shape, a.dtype.itemsize) for a in inputs[5:])
    scratch_bytes = (_vmem_bytes((2 * PAD + S, Cin), 4)
                     + _vmem_bytes((2 * PAD + S, Cout), 4))
    Cmax = max(Cin, Cout)
    temp_bytes = (6 * _vmem_bytes((S, Cmax), 4)        # f32 activation temporaries
                  + 2 * _vmem_bytes((S, Cout_p), 4)    # conv2 accumulator + residual
                  + 2 * _vmem_bytes((S, Cmax), 2))     # bf16 taps in flight
    # grid-invariant weights still get 2 buffers by default (see TODO at top)
    est = 2 * io_bytes + 2 * param_bytes + scratch_bytes + temp_bytes
    vmem_limit = int(min(device_vmem, max(est, 32 * 1024 * 1024)))

    flops = B * (2 * S * 9 * Cin * Cout                 # conv1
                 + 2 * S * 9 * Cout * Cout              # conv2
                 + (2 * S * Cin * Cout if learned_sc else 0)   # 1x1 shortcut
                 + 14 * S * (Cin + Cout))               # norms / activations
    bytes_accessed = int(x_f.size * 4 + B * S * Cout_p * 4
                         + sum(int(a.size) * a.dtype.itemsize for a in inputs[1:]))

    out = pl.pallas_call(
        functools.partial(_adain_resblk_kernel, H=H, W=W, PAD=PAD,
                          learned_sc=learned_sc),
        out_shape=jax.ShapeDtypeStruct((B, S, Cout_p), jnp.float32),
        grid=(B,),
        in_specs=in_specs,
        out_specs=pl.BlockSpec((1, S, Cout_p), lambda b: (b, 0, 0)),
        scratch_shapes=[
            pltpu.VMEM((2 * PAD + S, Cin), jnp.float32),
            pltpu.VMEM((2 * PAD + S, Cout), jnp.float32),
        ],
        compiler_params=pltpu.CompilerParams(
            dimension_semantics=("parallel",),    # batch is independent
            vmem_limit_bytes=vmem_limit,
        ),
        cost_estimate=pl.CostEstimate(
            flops=int(flops),
            transcendentals=int(B * (Cin + Cout)),
            bytes_accessed=bytes_accessed,
        ),
    )(*inputs)

    out = out[:, :, :Cout]                                 # drop the lane padding
    return jnp.transpose(out.reshape(B, H, W, Cout), (0, 3, 1, 2))


def reference_forward(x, s, p):
    """Pure-JAX (XLA) reference matching the PyTorch module semantics (NCHW)."""
    hp = jax.lax.Precision.HIGHEST

    def adain(v, fc_w, fc_b):
        C = v.shape[1]
        h = jnp.dot(s, fc_w.T, precision=hp) + fc_b          # (B, 2C)
        gamma = h[:, :C][:, :, None, None]
        beta = h[:, C:][:, :, None, None]
        mean = v.mean(axis=(2, 3), keepdims=True)
        var = ((v - mean) ** 2).mean(axis=(2, 3), keepdims=True)
        vn = (v - mean) / jnp.sqrt(var + _EPS)
        return (1.0 + gamma) * vn + beta

    def conv(v, w, b=None):
        y = jax.lax.conv_general_dilated(
            v, w, window_strides=(1, 1), padding='SAME',
            dimension_numbers=('NCHW', 'OIHW', 'NCHW'), precision=hp)
        return y if b is None else y + b[None, :, None, None]

    h = _lrelu(adain(x, p['fc1_w'], p['fc1_b']))
    h = conv(h, p['conv1_w'], p['conv1_b'])
    h = _lrelu(adain(h, p['fc2_w'], p['fc2_b']))
    h = conv(h, p['conv2_w'], p['conv2_b'])
    sc = conv(x, p['sc_w']) if 'sc_w' in p else x            # learned 1x1 or identity
    return (h + sc) / math.sqrt(2.0)


if __name__ == "__main__":
    key = jax.random.PRNGKey(0)
    kx, kst, kp, kx2, kp2 = jax.random.split(key, 5)

    # Case 1: learned 1x1 shortcut (dim_in != dim_out)
    B, Cin, Cout, H, W, style_dim = 2, 4, 8, 16, 16, 64
    x = jax.random.normal(kx, (B, Cin, H, W), jnp.float32)
    s = jax.random.normal(kst, (B, style_dim), jnp.float32)
    params = init_params(kp, Cin, Cout, style_dim)
    out = jax.block_until_ready(adain_resblk_forward(x, s, params))
    ref = reference_forward(x, s, params)
    # bf16 MXU inputs (f32 accumulation, f32 InstanceNorm stats) -> relaxed tolerance.
    np.testing.assert_allclose(np.asarray(out), np.asarray(ref), atol=5e-2, rtol=5e-2)

    # Case 2: identity shortcut (dim_in == dim_out); residual add is exact f32.
    Cin2 = Cout2 = 8
    x2 = jax.random.normal(kx2, (B, Cin2, H, W), jnp.float32)
    params2 = init_params(kp2, Cin2, Cout2, style_dim)
    out2 = jax.block_until_ready(adain_resblk_forward(x2, s, params2))
    ref2 = reference_forward(x2, s, params2)
    np.testing.assert_allclose(np.asarray(out2), np.asarray(ref2), atol=5e-2, rtol=5e-2)

    print("KERNEL_OK")
</pallas_src>

<mosaic_0001>
module attributes {stable_mosaic.version = 11 : i64} {
  func.func @_adain_resblk_kernel(%arg0: i32, %arg1: memref<1x256x4xf32, #tpu.memory_space<vmem>>, %arg2: memref<1x1x4xf32, #tpu.memory_space<vmem>>, %arg3: memref<1x1x4xf32, #tpu.memory_space<vmem>>, %arg4: memref<1x1x8xf32, #tpu.memory_space<vmem>>, %arg5: memref<1x1x8xf32, #tpu.memory_space<vmem>>, %arg6: memref<9x4x8xbf16, #tpu.memory_space<vmem>>, %arg7: memref<1x8xf32, #tpu.memory_space<vmem>>, %arg8: memref<9x8x128xbf16, #tpu.memory_space<vmem>>, %arg9: memref<1x128xf32, #tpu.memory_space<vmem>>, %arg10: memref<4x128xbf16, #tpu.memory_space<vmem>>, %arg11: memref<1x256x128xf32, #tpu.memory_space<vmem>>, %arg12: memref<304x4xf32, #tpu.memory_space<vmem>>, %arg13: memref<304x8xf32, #tpu.memory_space<vmem>>) attributes {dimension_semantics = [#tpu.dimension_semantics<parallel>], iteration_bounds = array<i64: 2>, scalar_prefetch = 0 : i64, scratch_operands = 2 : i64, tpu.core_type = #tpu.core_type<tc>, window_params = [{transform_indices = @transform_0, window_bounds = array<i64: 1, 256, 4>}, {transform_indices = @transform_1, window_bounds = array<i64: 1, 1, 4>}, {transform_indices = @transform_2, window_bounds = array<i64: 1, 1, 4>}, {transform_indices = @transform_3, window_bounds = array<i64: 1, 1, 8>}, {transform_indices = @transform_4, window_bounds = array<i64: 1, 1, 8>}, {pipeline_mode = #tpu.pipeline_mode<synchronous>, transform_indices = @transform_5, window_bounds = array<i64: 9, 4, 8>}, {pipeline_mode = #tpu.pipeline_mode<synchronous>, transform_indices = @transform_6, window_bounds = array<i64: 1, 8>}, {pipeline_mode = #tpu.pipeline_mode<synchronous>, transform_indices = @transform_7, window_bounds = array<i64: 9, 8, 128>}, {pipeline_mode = #tpu.pipeline_mode<synchronous>, transform_indices = @transform_8, window_bounds = array<i64: 1, 128>}, {pipeline_mode = #tpu.pipeline_mode<synchronous>, transform_indices = @transform_9, window_bounds = array<i64: 4, 128>}, {transform_indices = @transform_10, window_bounds = array<i64: 1, 256, 128>}]} {
    %c0 = arith.constant 0 : index
    %c0_0 = arith.constant 0 : index
    %c0_1 = arith.constant 0 : index
    %0 = vector.load %arg1[%c0, %c0_0, %c0_1] : memref<1x256x4xf32, #tpu.memory_space<vmem>>, vector<1x256x4xf32>
    %1 = vector.shape_cast %0 : vector<1x256x4xf32> to vector<256x4xf32>
    %2 = tpu.iota {dimensions = array<i32: 0>} : vector<256x1xi32>
    %c16_i32 = arith.constant 16 : i32
    %c0_i32 = arith.constant 0 : i32
    %3 = arith.cmpi eq, %c16_i32, %c0_i32 : i32
    %c1_i32 = arith.constant 1 : i32
    %4 = arith.select %3, %c1_i32, %c16_i32 : i32
    %5 = vector.broadcast %4 : i32 to vector<256x1xi32>
    %6 = arith.remsi %2, %5 : vector<256x1xi32>
    %c0_i32_2 = arith.constant 0 : i32
    %7 = vector.broadcast %c0_i32_2 : i32 to vector<256x1xi32>
    %8 = arith.cmpi ne, %6, %7 : vector<256x1xi32>
    %c0_i32_3 = arith.constant 0 : i32
    %9 = vector.broadcast %c0_i32_3 : i32 to vector<256x1xi32>
    %10 = arith.cmpi slt, %6, %9 : vector<256x1xi32>
    %c0_i32_4 = arith.constant 0 : i32
    %11 = arith.cmpi slt, %4, %c0_i32_4 : i32
    %12 = vector.broadcast %11 : i1 to vector<256x1xi1>
    %13 = vector.broadcast %12 : vector<256x1xi1> to vector<256x1xi1>
    %14 = arith.xori %10, %13 : vector<256x1xi1>
    %15 = arith.andi %14, %8 : vector<256x1xi1>
    %16 = vector.broadcast %4 : i32 to vector<256x1xi32>
    %17 = arith.addi %6, %16 : vector<256x1xi32>
    %18 = arith.select %15, %17, %6 : vector<256x1xi1>, vector<256x1xi32>
    %c1_i32_5 = arith.constant 1 : i32
    %19 = vector.broadcast %c1_i32_5 : i32 to vector<256x1xi32>
    %20 = arith.cmpi sge, %18, %19 : vector<256x1xi32>
    %c14_i32 = arith.constant 14 : i32
    %21 = vector.broadcast %c14_i32 : i32 to vector<256x1xi32>
    %22 = arith.cmpi sle, %18, %21 : vector<256x1xi32>
    %c0_6 = arith.constant 0 : index
    %c0_7 = arith.constant 0 : index
    %c0_8 = arith.constant 0 : index
    %23 = vector.load %arg2[%c0_6, %c0_7, %c0_8] : memref<1x1x4xf32, #tpu.memory_space<vmem>>, vector<1x1x4xf32>
    %24 = vector.shape_cast %23 : vector<1x1x4xf32> to vector<1x4xf32>
    %c0_9 = arith.constant 0 : index
    %c0_10 = arith.constant 0 : index
    %c0_11 = arith.constant 0 : index
    %25 = vector.load %arg3[%c0_9, %c0_10, %c0_11] : memref<1x1x4xf32, #tpu.memory_space<vmem>>, vector<1x1x4xf32>
    %26 = vector.shape_cast %25 : vector<1x1x4xf32> to vector<1x4xf32>
    %cst = arith.constant dense<0.000000e+00> : vector<4xf32>
    %27 = vector.multi_reduction <add>, %1, %cst [0] : vector<256x4xf32> to vector<4xf32>
    %28 = vector.shape_cast %27 : vector<4xf32> to vector<1x4xf32>
    %cst_12 = arith.constant 2.560000e+02 : f32
    %29 = vector.broadcast %cst_12 : f32 to vector<1x4xf32>
    %30 = arith.divf %28, %29 : vector<1x4xf32>
    %31 = arith.mulf %1, %1 : vector<256x4xf32>
    %cst_13 = arith.constant dense<0.000000e+00> : vector<4xf32>
    %32 = vector.multi_reduction <add>, %31, %cst_13 [0] : vector<256x4xf32> to vector<4xf32>
    %33 = vector.shape_cast %32 : vector<4xf32> to vector<1x4xf32>
    %cst_14 = arith.constant 2.560000e+02 : f32
    %34 = vector.broadcast %cst_14 : f32 to vector<1x4xf32>
    %35 = arith.divf %33, %34 : vector<1x4xf32>
    %36 = arith.mulf %30, %30 : vector<1x4xf32>
    %37 = arith.subf %35, %36 : vector<1x4xf32>
    %cst_15 = arith.constant 0.000000e+00 : f32
    %38 = vector.broadcast %cst_15 : f32 to vector<1x4xf32>
    %39 = arith.maximumf %37, %38 : vector<1x4xf32>
    %40 = vector.broadcast %30 : vector<1x4xf32> to vector<256x4xf32>
    %41 = arith.subf %1, %40 : vector<256x4xf32>
    %cst_16 = arith.constant 9.99999974E-6 : f32
    %42 = vector.broadcast %cst_16 : f32 to vector<1x4xf32>
    %43 = arith.addf %39, %42 : vector<1x4xf32>
    %44 = math.rsqrt %43 : vector<1x4xf32>
    %45 = vector.broadcast %44 : vector<1x4xf32> to vector<256x4xf32>
    %46 = arith.mulf %41, %45 : vector<256x4xf32>
    %cst_17 = arith.constant 1.000000e+00 : f32
    %47 = vector.broadcast %cst_17 : f32 to vector<1x4xf32>
    %48 = arith.addf %47, %24 : vector<1x4xf32>
    %49 = vector.broadcast %48 : vector<1x4xf32> to vector<256x4xf32>
    %50 = arith.mulf %49, %46 : vector<256x4xf32>
    %51 = vector.broadcast %26 : vector<1x4xf32> to vector<256x4xf32>
    %52 = arith.addf %50, %51 : vector<256x4xf32>
    %cst_18 = arith.constant 0.000000e+00 : f32
    %53 = vector.broadcast %cst_18 : f32 to vector<256x4xf32>
    %54 = arith.cmpf oge, %52, %53 : vector<256x4xf32>
    %cst_19 = arith.constant 2.000000e-01 : f32
    %55 = vector.broadcast %cst_19 : f32 to vector<256x4xf32>
    %56 = arith.mulf %55, %52 : vector<256x4xf32>
    %57 = arith.select %54, %52, %56 : vector<256x4xi1>, vector<256x4xf32>
    %c0_20 = arith.constant 0 : index
    %c0_21 = arith.constant 0 : index
    %58 = vector.load %arg7[%c0_20, %c0_21] : memref<1x8xf32, #tpu.memory_space<vmem>>, vector<1x8xf32>
    %cst_22 = arith.constant 0.000000e+00 : f32
    %59 = vector.broadcast %cst_22 : f32 to vector<24x4xf32>
    %c0_23 = arith.constant 0 : index
    %c0_24 = arith.constant 0 : index
    %60 = vector.load %arg12[%c0_23, %c0_24] : memref<304x4xf32, #tpu.memory_space<vmem>>, vector<24x4xf32>
    tpu.vector_store %arg12[%c0_23, %c0_24], %59 {strides = array<i32>} : memref<304x4xf32, #tpu.memory_space<vmem>>, vector<24x4xf32>,
    %c280 = arith.constant 280 : index
    %c0_25 = arith.constant 0 : index
    %61 = vector.load %arg12[%c280, %c0_25] : memref<304x4xf32, #tpu.memory_space<vmem>>, vector<24x4xf32>
    tpu.vector_store %arg12[%c280, %c0_25], %59 {strides = array<i32>} : memref<304x4xf32, #tpu.memory_space<vmem>>, vector<24x4xf32>,
    %c24 = arith.constant 24 : index
    %c0_26 = arith.constant 0 : index
    %62 = vector.load %arg12[%c24, %c0_26] : memref<304x4xf32, #tpu.memory_space<vmem>>, vector<256x4xf32>
    tpu.vector_store %arg12[%c24, %c0_26], %57 {strides = array<i32>} : memref<304x4xf32, #tpu.memory_space<vmem>>, vector<256x4xf32>,
    %c7 = arith.constant 7 : index
    %c0_27 = arith.constant 0 : index
    %63 = vector.load %arg12[%c7, %c0_27] : memref<304x4xf32, #tpu.memory_space<vmem>>, vector<256x4xf32>
    %cst_28 = arith.constant 0.000000e+00 : f32
    %64 = vector.shape_cast %20 : vector<256x1xi1> to vector<256x1xi1>
    %65 = vector.broadcast %64 : vector<256x1xi1> to vector<256x4xi1>
    %66 = vector.broadcast %cst_28 : f32 to vector<256x4xf32>
    %67 = arith.select %65, %63, %66 : vector<256x4xi1>, vector<256x4xf32>
    %68 = arith.truncf %67 : vector<256x4xf32> to vector<256x4xbf16>
    %c0_29 = arith.constant 0 : index
    %c0_30 = arith.constant 0 : index
    %c0_31 = arith.constant 0 : index
    %69 = vector.load %arg6[%c0_29, %c0_30, %c0_31] : memref<9x4x8xbf16, #tpu.memory_space<vmem>>, vector<1x4x8xbf16>
    %70 = vector.shape_cast %69 : vector<1x4x8xbf16> to vector<4x8xbf16>
    %cst_32 = arith.constant dense<0.000000e+00> : vector<256x8xf32>
    %71 = tpu.matmul %68, %70, %cst_32 {dimension_numbers = #tpu.dot_dimension_numbers<[1], [0], [0], [1], [0, 0, 1, 1], [], []>} : vector<256x4xbf16>, vector<4x8xbf16>, vector<256x8xf32> -> vector<256x8xf32>
    %c8 = arith.constant 8 : index
    %c0_33 = arith.constant 0 : index
    %72 = vector.load %arg12[%c8, %c0_33] : memref<304x4xf32, #tpu.memory_space<vmem>>, vector<256x4xf32>
    %73 = arith.truncf %72 : vector<256x4xf32> to vector<256x4xbf16>
    %c1 = arith.constant 1 : index
    %c0_34 = arith.constant 0 : index
    %c0_35 = arith.constant 0 : index
    %74 = vector.load %arg6[%c1, %c0_34, %c0_35] : memref<9x4x8xbf16, #tpu.memory_space<vmem>>, vector<1x4x8xbf16>
    %75 = vector.shape_cast %74 : vector<1x4x8xbf16> to vector<4x8xbf16>
    %cst_36 = arith.constant dense<0.000000e+00> : vector<256x8xf32>
    %76 = tpu.matmul %73, %75, %cst_36 {dimension_numbers = #tpu.dot_dimension_numbers<[1], [0], [0], [1], [0, 0, 1, 1], [], []>} : vector<256x4xbf16>, vector<4x8xbf16>, vector<256x8xf32> -> vector<256x8xf32>
    %77 = arith.addf %71, %76 : vector<256x8xf32>
    %c9 = arith.constant 9 : index
    %c0_37 = arith.constant 0 : index
    %78 = vector.load %arg12[%c9, %c0_37] : memref<304x4xf32, #tpu.memory_space<vmem>>, vector<256x4xf32>
    %cst_38 = arith.constant 0.000000e+00 : f32
    %79 = vector.shape_cast %22 : vector<256x1xi1> to vector<256x1xi1>
    %80 = vector.broadcast %79 : vector<256x1xi1> to vector<256x4xi1>
    %81 = vector.broadcast %cst_38 : f32 to vector<256x4xf32>
    %82 = arith.select %80, %78, %81 : vector<256x4xi1>, vector<256x4xf32>
    %83 = arith.truncf %82 : vector<256x4xf32> to vector<256x4xbf16>
    %c2 = arith.constant 2 : index
    %c0_39 = arith.constant 0 : index
    %c0_40 = arith.constant 0 : index
    %84 = vector.load %arg6[%c2, %c0_39, %c0_40] : memref<9x4x8xbf16, #tpu.memory_space<vmem>>, vector<1x4x8xbf16>
    %85 = vector.shape_cast %84 : vector<1x4x8xbf16> to vector<4x8xbf16>
    %cst_41 = arith.constant dense<0.000000e+00> : vector<256x8xf32>
    %86 = tpu.matmul %83, %85, %cst_41 {dimension_numbers = #tpu.dot_dimension_numbers<[1], [0], [0], [1], [0, 0, 1, 1], [], []>} : vector<256x4xbf16>, vector<4x8xbf16>, vector<256x8xf32> -> vector<256x8xf32>
    %87 = arith.addf %77, %86 : vector<256x8xf32>
    %c23 = arith.constant 23 : index
    %c0_42 = arith.constant 0 : index
    %88 = vector.load %arg12[%c23, %c0_42] : memref<304x4xf32, #tpu.memory_space<vmem>>, vector<256x4xf32>
    %cst_43 = arith.constant 0.000000e+00 : f32
    %89 = vector.shape_cast %20 : vector<256x1xi1> to vector<256x1xi1>
    %90 = vector.broadcast %89 : vector<256x1xi1> to vector<256x4xi1>
    %91 = vector.broadcast %cst_43 : f32 to vector<256x4xf32>
    %92 = arith.select %90, %88, %91 : vector<256x4xi1>, vector<256x4xf32>
    %93 = arith.truncf %92 : vector<256x4xf32> to vector<256x4xbf16>
    %c3 = arith.constant 3 : index
    %c0_44 = arith.constant 0 : index
    %c0_45 = arith.constant 0 : index
    %94 = vector.load %arg6[%c3, %c0_44, %c0_45] : memref<9x4x8xbf16, #tpu.memory_space<vmem>>, vector<1x4x8xbf16>
    %95 = vector.shape_cast %94 : vector<1x4x8xbf16> to vector<4x8xbf16>
    %cst_46 = arith.constant dense<0.000000e+00> : vector<256x8xf32>
    %96 = tpu.matmul %93, %95, %cst_46 {dimension_numbers = #tpu.dot_dimension_numbers<[1], [0], [0], [1], [0, 0, 1, 1], [], []>} : vector<256x4xbf16>, vector<4x8xbf16>, vector<256x8xf32> -> vector<256x8xf32>
    %97 = arith.addf %87, %96 : vector<256x8xf32>
    %c24_47 = arith.constant 24 : index
    %c0_48 = arith.constant 0 : index
    %98 = vector.load %arg12[%c24_47, %c0_48] : memref<304x4xf32, #tpu.memory_space<vmem>>, vector<256x4xf32>
    %99 = arith.truncf %98 : vector<256x4xf32> to vector<256x4xbf16>
    %c4 = arith.constant 4 : index
    %c0_49 = arith.constant 0 : index
    %c0_50 = arith.constant 0 : index
    %100 = vector.load %arg6[%c4, %c0_49, %c0_50] : memref<9x4x8xbf16, #tpu.memory_space<vmem>>, vector<1x4x8xbf16>
    %101 = vector.shape_cast %100 : vector<1x4x8xbf16> to vector<4x8xbf16>
    %cst_51 = arith.constant dense<0.000000e+00> : vector<256x8xf32>
    %102 = tpu.matmul %99, %101, %cst_51 {dimension_numbers = #tpu.dot_dimension_numbers<[1], [0], [0], [1], [0, 0, 1, 1], [], []>} : vector<256x4xbf16>, vector<4x8xbf16>, vector<256x8xf32> -> vector<256x8xf32>
    %103 = arith.addf %97, %102 : vector<256x8xf32>
    %c25 = arith.constant 25 : index
    %c0_52 = arith.constant 0 : index
    %104 = vector.load %arg12[%c25, %c0_52] : memref<304x4xf32, #tpu.memory_space<vmem>>, vector<256x4xf32>
    %cst_53 = arith.constant 0.000000e+00 : f32
    %105 = vector.shape_cast %22 : vector<256x1xi1> to vector<256x1xi1>
    %106 = vector.broadcast %105 : vector<256x1xi1> to vector<256x4xi1>
    %107 = vector.broadcast %cst_53 : f32 to vector<256x4xf32>
    %108 = arith.select %106, %104, %107 : vector<256x4xi1>, vector<256x4xf32>
    %109 = arith.truncf %108 : vector<256x4xf32> to vector<256x4xbf16>
    %c5 = arith.constant 5 : index
    %c0_54 = arith.constant 0 : index
    %c0_55 = arith.constant 0 : index
    %110 = vector.load %arg6[%c5, %c0_54, %c0_55] : memref<9x4x8xbf16, #tpu.memory_space<vmem>>, vector<1x4x8xbf16>
    %111 = vector.shape_cast %110 : vector<1x4x8xbf16> to vector<4x8xbf16>
    %cst_56 = arith.constant dense<0.000000e+00> : vector<256x8xf32>
    %112 = tpu.matmul %109, %111, %cst_56 {dimension_numbers = #tpu.dot_dimension_numbers<[1], [0], [0], [1], [0, 0, 1, 1], [], []>} : vector<256x4xbf16>, vector<4x8xbf16>, vector<256x8xf32> -> vector<256x8xf32>
    %113 = arith.addf %103, %112 : vector<256x8xf32>
    %c39 = arith.constant 39 : index
    %c0_57 = arith.constant 0 : index
    %114 = vector.load %arg12[%c39, %c0_57] : memref<304x4xf32, #tpu.memory_space<vmem>>, vector<256x4xf32>
    %cst_58 = arith.constant 0.000000e+00 : f32
    %115 = vector.shape_cast %20 : vector<256x1xi1> to vector<256x1xi1>
    %116 = vector.broadcast %115 : vector<256x1xi1> to vector<256x4xi1>
    %117 = vector.broadcast %cst_58 : f32 to vector<256x4xf32>
    %118 = arith.select %116, %114, %117 : vector<256x4xi1>, vector<256x4xf32>
    %119 = arith.truncf %118 : vector<256x4xf32> to vector<256x4xbf16>
    %c6 = arith.constant 6 : index
    %c0_59 = arith.constant 0 : index
    %c0_60 = arith.constant 0 : index
    %120 = vector.load %arg6[%c6, %c0_59, %c0_60] : memref<9x4x8xbf16, #tpu.memory_space<vmem>>, vector<1x4x8xbf16>
    %121 = vector.shape_cast %120 : vector<1x4x8xbf16> to vector<4x8xbf16>
    %cst_61 = arith.constant dense<0.000000e+00> : vector<256x8xf32>
    %122 = tpu.matmul %119, %121, %cst_61 {dimension_numbers = #tpu.dot_dimension_numbers<[1], [0], [0], [1], [0, 0, 1, 1], [], []>} : vector<256x4xbf16>, vector<4x8xbf16>, vector<256x8xf32> -> vector<256x8xf32>
    %123 = arith.addf %113, %122 : vector<256x8xf32>
    %c40 = arith.constant 40 : index
    %c0_62 = arith.constant 0 : index
    %124 = vector.load %arg12[%c40, %c0_62] : memref<304x4xf32, #tpu.memory_space<vmem>>, vector<256x4xf32>
    %125 = arith.truncf %124 : vector<256x4xf32> to vector<256x4xbf16>
    %c7_63 = arith.constant 7 : index
    %c0_64 = arith.constant 0 : index
    %c0_65 = arith.constant 0 : index
    %126 = vector.load %arg6[%c7_63, %c0_64, %c0_65] : memref<9x4x8xbf16, #tpu.memory_space<vmem>>, vector<1x4x8xbf16>
    %127 = vector.shape_cast %126 : vector<1x4x8xbf16> to vector<4x8xbf16>
    %cst_66 = arith.constant dense<0.000000e+00> : vector<256x8xf32>
    %128 = tpu.matmul %125, %127, %cst_66 {dimension_numbers = #tpu.dot_dimension_numbers<[1], [0], [0], [1], [0, 0, 1, 1], [], []>} : vector<256x4xbf16>, vector<4x8xbf16>, vector<256x8xf32> -> vector<256x8xf32>
    %129 = arith.addf %123, %128 : vector<256x8xf32>
    %c41 = arith.constant 41 : index
    %c0_67 = arith.constant 0 : index
    %130 = vector.load %arg12[%c41, %c0_67] : memref<304x4xf32, #tpu.memory_space<vmem>>, vector<256x4xf32>
    %cst_68 = arith.constant 0.000000e+00 : f32
    %131 = vector.shape_cast %22 : vector<256x1xi1> to vector<256x1xi1>
    %132 = vector.broadcast %131 : vector<256x1xi1> to vector<256x4xi1>
    %133 = vector.broadcast %cst_68 : f32 to vector<256x4xf32>
    %134 = arith.select %132, %130, %133 : vector<256x4xi1>, vector<256x4xf32>
    %135 = arith.truncf %134 : vector<256x4xf32> to vector<256x4xbf16>
    %c8_69 = arith.constant 8 : index
    %c0_70 = arith.constant 0 : index
    %c0_71 = arith.constant 0 : index
    %136 = vector.load %arg6[%c8_69, %c0_70, %c0_71] : memref<9x4x8xbf16, #tpu.memory_space<vmem>>, vector<1x4x8xbf16>
    %137 = vector.shape_cast %136 : vector<1x4x8xbf16> to vector<4x8xbf16>
    %cst_72 = arith.constant dense<0.000000e+00> : vector<256x8xf32>
    %138 = tpu.matmul %135, %137, %cst_72 {dimension_numbers = #tpu.dot_dimension_numbers<[1], [0], [0], [1], [0, 0, 1, 1], [], []>} : vector<256x4xbf16>, vector<4x8xbf16>, vector<256x8xf32> -> vector<256x8xf32>
    %139 = arith.addf %129, %138 : vector<256x8xf32>
    %140 = vector.broadcast %58 : vector<1x8xf32> to vector<256x8xf32>
    %141 = arith.addf %139, %140 : vector<256x8xf32>
    %c0_73 = arith.constant 0 : index
    %c0_74 = arith.constant 0 : index
    %c0_75 = arith.constant 0 : index
    %142 = vector.load %arg4[%c0_73, %c0_74, %c0_75] : memref<1x1x8xf32, #tpu.memory_space<vmem>>, vector<1x1x8xf32>
    %143 = vector.shape_cast %142 : vector<1x1x8xf32> to vector<1x8xf32>
    %c0_76 = arith.constant 0 : index
    %c0_77 = arith.constant 0 : index
    %c0_78 = arith.constant 0 : index
    %144 = vector.load %arg5[%c0_76, %c0_77, %c0_78] : memref<1x1x8xf32, #tpu.memory_space<vmem>>, vector<1x1x8xf32>
    %145 = vector.shape_cast %144 : vector<1x1x8xf32> to vector<1x8xf32>
    %cst_79 = arith.constant dense<0.000000e+00> : vector<8xf32>
    %146 = vector.multi_reduction <add>, %141, %cst_79 [0] : vector<256x8xf32> to vector<8xf32>
    %147 = vector.shape_cast %146 : vector<8xf32> to vector<1x8xf32>
    %cst_80 = arith.constant 2.560000e+02 : f32
    %148 = vector.broadcast %cst_80 : f32 to vector<1x8xf32>
    %149 = arith.divf %147, %148 : vector<1x8xf32>
    %150 = arith.mulf %141, %141 : vector<256x8xf32>
    %cst_81 = arith.constant dense<0.000000e+00> : vector<8xf32>
    %151 = vector.multi_reduction <add>, %150, %cst_81 [0] : vector<256x8xf32> to vector<8xf32>
    %152 = vector.shape_cast %151 : vector<8xf32> to vector<1x8xf32>
    %cst_82 = arith.constant 2.560000e+02 : f32
    %153 = vector.broadcast %cst_82 : f32 to vector<1x8xf32>
    %154 = arith.divf %152, %153 : vector<1x8xf32>
    %155 = arith.mulf %149, %149 : vector<1x8xf32>
    %156 = arith.subf %154, %155 : vector<1x8xf32>
    %cst_83 = arith.constant 0.000000e+00 : f32
    %157 = vector.broadcast %cst_83 : f32 to vector<1x8xf32>
    %158 = arith.maximumf %156, %157 : vector<1x8xf32>
    %159 = vector.broadcast %149 : vector<1x8xf32> to vector<256x8xf32>
    %160 = arith.subf %141, %159 : vector<256x8xf32>
    %cst_84 = arith.constant 9.99999974E-6 : f32
    %161 = vector.broadcast %cst_84 : f32 to vector<1x8xf32>
    %162 = arith.addf %158, %161 : vector<1x8xf32>
    %163 = math.rsqrt %162 : vector<1x8xf32>
    %164 = vector.broadcast %163 : vector<1x8xf32> to vector<256x8xf32>
    %165 = arith.mulf %160, %164 : vector<256x8xf32>
    %cst_85 = arith.constant 1.000000e+00 : f32
    %166 = vector.broadcast %cst_85 : f32 to vector<1x8xf32>
    %167 = arith.addf %166, %143 : vector<1x8xf32>
    %168 = vector.broadcast %167 : vector<1x8xf32> to vector<256x8xf32>
    %169 = arith.mulf %168, %165 : vector<256x8xf32>
    %170 = vector.broadcast %145 : vector<1x8xf32> to vector<256x8xf32>
    %171 = arith.addf %169, %170 : vector<256x8xf32>
    %cst_86 = arith.constant 0.000000e+00 : f32
    %172 = vector.broadcast %cst_86 : f32 to vector<256x8xf32>
    %173 = arith.cmpf oge, %171, %172 : vector<256x8xf32>
    %cst_87 = arith.constant 2.000000e-01 : f32
    %174 = vector.broadcast %cst_87 : f32 to vector<256x8xf32>
    %175 = arith.mulf %174, %171 : vector<256x8xf32>
    %176 = arith.select %173, %171, %175 : vector<256x8xi1>, vector<256x8xf32>
    %c0_88 = arith.constant 0 : index
    %c0_89 = arith.constant 0 : index
    %177 = vector.load %arg9[%c0_88, %c0_89] : memref<1x128xf32, #tpu.memory_space<vmem>>, vector<1x128xf32>
    %cst_90 = arith.constant 0.000000e+00 : f32
    %178 = vector.broadcast %cst_90 : f32 to vector<24x8xf32>
    %c0_91 = arith.constant 0 : index
    %c0_92 = arith.constant 0 : index
    %179 = vector.load %arg13[%c0_91, %c0_92] : memref<304x8xf32, #tpu.memory_space<vmem>>, vector<24x8xf32>
    tpu.vector_store %arg13[%c0_91, %c0_92], %178 {strides = array<i32>} : memref<304x8xf32, #tpu.memory_space<vmem>>, vector<24x8xf32>,
    %c280_93 = arith.constant 280 : index
    %c0_94 = arith.constant 0 : index
    %180 = vector.load %arg13[%c280_93, %c0_94] : memref<304x8xf32, #tpu.memory_space<vmem>>, vector<24x8xf32>
    tpu.vector_store %arg13[%c280_93, %c0_94], %178 {strides = array<i32>} : memref<304x8xf32, #tpu.memory_space<vmem>>, vector<24x8xf32>,
    %c24_95 = arith.constant 24 : index
    %c0_96 = arith.constant 0 : index
    %181 = vector.load %arg13[%c24_95, %c0_96] : memref<304x8xf32, #tpu.memory_space<vmem>>, vector<256x8xf32>
    tpu.vector_store %arg13[%c24_95, %c0_96], %176 {strides = array<i32>} : memref<304x8xf32, #tpu.memory_space<vmem>>, vector<256x8xf32>,
    %c7_97 = arith.constant 7 : index
    %c0_98 = arith.constant 0 : index
    %182 = vector.load %arg13[%c7_97, %c0_98] : memref<304x8xf32, #tpu.memory_space<vmem>>, vector<256x8xf32>
    %cst_99 = arith.constant 0.000000e+00 : f32
    %183 = vector.shape_cast %20 : vector<256x1xi1> to vector<256x1xi1>
    %184 = vector.broadcast %183 : vector<256x1xi1> to vector<256x8xi1>
    %185 = vector.broadcast %cst_99 : f32 to vector<256x8xf32>
    %186 = arith.select %184, %182, %185 : vector<256x8xi1>, vector<256x8xf32>
    %187 = arith.truncf %186 : vector<256x8xf32> to vector<256x8xbf16>
    %c0_100 = arith.constant 0 : index
    %c0_101 = arith.constant 0 : index
    %c0_102 = arith.constant 0 : index
    %188 = vector.load %arg8[%c0_100, %c0_101, %c0_102] : memref<9x8x128xbf16, #tpu.memory_space<vmem>>, vector<1x8x128xbf16>
    %189 = vector.shape_cast %188 : vector<1x8x128xbf16> to vector<8x128xbf16>
    %cst_103 = arith.constant dense<0.000000e+00> : vector<256x128xf32>
    %190 = tpu.matmul %187, %189, %cst_103 {dimension_numbers = #tpu.dot_dimension_numbers<[1], [0], [0], [1], [0, 0, 1, 1], [], []>} : vector<256x8xbf16>, vector<8x128xbf16>, vector<256x128xf32> -> vector<256x128xf32>
    %c8_104 = arith.constant 8 : index
    %c0_105 = arith.constant 0 : index
    %191 = vector.load %arg13[%c8_104, %c0_105] : memref<304x8xf32, #tpu.memory_space<vmem>>, vector<256x8xf32>
    %192 = arith.truncf %191 : vector<256x8xf32> to vector<256x8xbf16>
    %c1_106 = arith.constant 1 : index
    %c0_107 = arith.constant 0 : index
    %c0_108 = arith.constant 0 : index
    %193 = vector.load %arg8[%c1_106, %c0_107, %c0_108] : memref<9x8x128xbf16, #tpu.memory_space<vmem>>, vector<1x8x128xbf16>
    %194 = vector.shape_cast %193 : vector<1x8x128xbf16> to vector<8x128xbf16>
    %cst_109 = arith.constant dense<0.000000e+00> : vector<256x128xf32>
    %195 = tpu.matmul %192, %194, %cst_109 {dimension_numbers = #tpu.dot_dimension_numbers<[1], [0], [0], [1], [0, 0, 1, 1], [], []>} : vector<256x8xbf16>, vector<8x128xbf16>, vector<256x128xf32> -> vector<256x128xf32>
    %196 = arith.addf %190, %195 : vector<256x128xf32>
    %c9_110 = arith.constant 9 : index
    %c0_111 = arith.constant 0 : index
    %197 = vector.load %arg13[%c9_110, %c0_111] : memref<304x8xf32, #tpu.memory_space<vmem>>, vector<256x8xf32>
    %cst_112 = arith.constant 0.000000e+00 : f32
    %198 = vector.shape_cast %22 : vector<256x1xi1> to vector<256x1xi1>
    %199 = vector.broadcast %198 : vector<256x1xi1> to vector<256x8xi1>
    %200 = vector.broadcast %cst_112 : f32 to vector<256x8xf32>
    %201 = arith.select %199, %197, %200 : vector<256x8xi1>, vector<256x8xf32>
    %202 = arith.truncf %201 : vector<256x8xf32> to vector<256x8xbf16>
    %c2_113 = arith.constant 2 : index
    %c0_114 = arith.constant 0 : index
    %c0_115 = arith.constant 0 : index
    %203 = vector.load %arg8[%c2_113, %c0_114, %c0_115] : memref<9x8x128xbf16, #tpu.memory_space<vmem>>, vector<1x8x128xbf16>
    %204 = vector.shape_cast %203 : vector<1x8x128xbf16> to vector<8x128xbf16>
    %cst_116 = arith.constant dense<0.000000e+00> : vector<256x128xf32>
    %205 = tpu.matmul %202, %204, %cst_116 {dimension_numbers = #tpu.dot_dimension_numbers<[1], [0], [0], [1], [0, 0, 1, 1], [], []>} : vector<256x8xbf16>, vector<8x128xbf16>, vector<256x128xf32> -> vector<256x128xf32>
    %206 = arith.addf %196, %205 : vector<256x128xf32>
    %c23_117 = arith.constant 23 : index
    %c0_118 = arith.constant 0 : index
    %207 = vector.load %arg13[%c23_117, %c0_118] : memref<304x8xf32, #tpu.memory_space<vmem>>, vector<256x8xf32>
    %cst_119 = arith.constant 0.000000e+00 : f32
    %208 = vector.shape_cast %20 : vector<256x1xi1> to vector<256x1xi1>
    %209 = vector.broadcast %208 : vector<256x1xi1> to vector<256x8xi1>
    %210 = vector.broadcast %cst_119 : f32 to vector<256x8xf32>
    %211 = arith.select %209, %207, %210 : vector<256x8xi1>, vector<256x8xf32>
    %212 = arith.truncf %211 : vector<256x8xf32> to vector<256x8xbf16>
    %c3_120 = arith.constant 3 : index
    %c0_121 = arith.constant 0 : index
    %c0_122 = arith.constant 0 : index
    %213 = vector.load %arg8[%c3_120, %c0_121, %c0_122] : memref<9x8x128xbf16, #tpu.memory_space<vmem>>, vector<1x8x128xbf16>
    %214 = vector.shape_cast %213 : vector<1x8x128xbf16> to vector<8x128xbf16>
    %cst_123 = arith.constant dense<0.000000e+00> : vector<256x128xf32>
    %215 = tpu.matmul %212, %214, %cst_123 {dimension_numbers = #tpu.dot_dimension_numbers<[1], [0], [0], [1], [0, 0, 1, 1], [], []>} : vector<256x8xbf16>, vector<8x128xbf16>, vector<256x128xf32> -> vector<256x128xf32>
    %216 = arith.addf %206, %215 : vector<256x128xf32>
    %c24_124 = arith.constant 24 : index
    %c0_125 = arith.constant 0 : index
    %217 = vector.load %arg13[%c24_124, %c0_125] : memref<304x8xf32, #tpu.memory_space<vmem>>, vector<256x8xf32>
    %218 = arith.truncf %217 : vector<256x8xf32> to vector<256x8xbf16>
    %c4_126 = arith.constant 4 : index
    %c0_127 = arith.constant 0 : index
    %c0_128 = arith.constant 0 : index
    %219 = vector.load %arg8[%c4_126, %c0_127, %c0_128] : memref<9x8x128xbf16, #tpu.memory_space<vmem>>, vector<1x8x128xbf16>
    %220 = vector.shape_cast %219 : vector<1x8x128xbf16> to vector<8x128xbf16>
    %cst_129 = arith.constant dense<0.000000e+00> : vector<256x128xf32>
    %221 = tpu.matmul %218, %220, %cst_129 {dimension_numbers = #tpu.dot_dimension_numbers<[1], [0], [0], [1], [0, 0, 1, 1], [], []>} : vector<256x8xbf16>, vector<8x128xbf16>, vector<256x128xf32> -> vector<256x128xf32>
    %222 = arith.addf %216, %221 : vector<256x128xf32>
    %c25_130 = arith.constant 25 : index
    %c0_131 = arith.constant 0 : index
    %223 = vector.load %arg13[%c25_130, %c0_131] : memref<304x8xf32, #tpu.memory_space<vmem>>, vector<256x8xf32>
    %cst_132 = arith.constant 0.000000e+00 : f32
    %224 = vector.shape_cast %22 : vector<256x1xi1> to vector<256x1xi1>
    %225 = vector.broadcast %224 : vector<256x1xi1> to vector<256x8xi1>
    %226 = vector.broadcast %cst_132 : f32 to vector<256x8xf32>
    %227 = arith.select %225, %223, %226 : vector<256x8xi1>, vector<256x8xf32>
    %228 = arith.truncf %227 : vector<256x8xf32> to vector<256x8xbf16>
    %c5_133 = arith.constant 5 : index
    %c0_134 = arith.constant 0 : index
    %c0_135 = arith.constant 0 : index
    %229 = vector.load %arg8[%c5_133, %c0_134, %c0_135] : memref<9x8x128xbf16, #tpu.memory_space<vmem>>, vector<1x8x128xbf16>
    %230 = vector.shape_cast %229 : vector<1x8x128xbf16> to vector<8x128xbf16>
    %cst_136 = arith.constant dense<0.000000e+00> : vector<256x128xf32>
    %231 = tpu.matmul %228, %230, %cst_136 {dimension_numbers = #tpu.dot_dimension_numbers<[1], [0], [0], [1], [0, 0, 1, 1], [], []>} : vector<256x8xbf16>, vector<8x128xbf16>, vector<256x128xf32> -> vector<256x128xf32>
    %232 = arith.addf %222, %231 : vector<256x128xf32>
    %c39_137 = arith.constant 39 : index
    %c0_138 = arith.constant 0 : index
    %233 = vector.load %arg13[%c39_137, %c0_138] : memref<304x8xf32, #tpu.memory_space<vmem>>, vector<256x8xf32>
    %cst_139 = arith.constant 0.000000e+00 : f32
    %234 = vector.shape_cast %20 : vector<256x1xi1> to vector<256x1xi1>
    %235 = vector.broadcast %234 : vector<256x1xi1> to vector<256x8xi1>
    %236 = vector.broadcast %cst_139 : f32 to vector<256x8xf32>
    %237 = arith.select %235, %233, %236 : vector<256x8xi1>, vector<256x8xf32>
    %238 = arith.truncf %237 : vector<256x8xf32> to vector<256x8xbf16>
    %c6_140 = arith.constant 6 : index
    %c0_141 = arith.constant 0 : index
    %c0_142 = arith.constant 0 : index
    %239 = vector.load %arg8[%c6_140, %c0_141, %c0_142] : memref<9x8x128xbf16, #tpu.memory_space<vmem>>, vector<1x8x128xbf16>
    %240 = vector.shape_cast %239 : vector<1x8x128xbf16> to vector<8x128xbf16>
    %cst_143 = arith.constant dense<0.000000e+00> : vector<256x128xf32>
    %241 = tpu.matmul %238, %240, %cst_143 {dimension_numbers = #tpu.dot_dimension_numbers<[1], [0], [0], [1], [0, 0, 1, 1], [], []>} : vector<256x8xbf16>, vector<8x128xbf16>, vector<256x128xf32> -> vector<256x128xf32>
    %242 = arith.addf %232, %241 : vector<256x128xf32>
    %c40_144 = arith.constant 40 : index
    %c0_145 = arith.constant 0 : index
    %243 = vector.load %arg13[%c40_144, %c0_145] : memref<304x8xf32, #tpu.memory_space<vmem>>, vector<256x8xf32>
    %244 = arith.truncf %243 : vector<256x8xf32> to vector<256x8xbf16>
    %c7_146 = arith.constant 7 : index
    %c0_147 = arith.constant 0 : index
    %c0_148 = arith.constant 0 : index
    %245 = vector.load %arg8[%c7_146, %c0_147, %c0_148] : memref<9x8x128xbf16, #tpu.memory_space<vmem>>, vector<1x8x128xbf16>
    %246 = vector.shape_cast %245 : vector<1x8x128xbf16> to vector<8x128xbf16>
    %cst_149 = arith.constant dense<0.000000e+00> : vector<256x128xf32>
    %247 = tpu.matmul %244, %246, %cst_149 {dimension_numbers = #tpu.dot_dimension_numbers<[1], [0], [0], [1], [0, 0, 1, 1], [], []>} : vector<256x8xbf16>, vector<8x128xbf16>, vector<256x128xf32> -> vector<256x128xf32>
    %248 = arith.addf %242, %247 : vector<256x128xf32>
    %c41_150 = arith.constant 41 : index
    %c0_151 = arith.constant 0 : index
    %249 = vector.load %arg13[%c41_150, %c0_151] : memref<304x8xf32, #tpu.memory_space<vmem>>, vector<256x8xf32>
    %cst_152 = arith.constant 0.000000e+00 : f32
    %250 = vector.shape_cast %22 : vector<256x1xi1> to vector<256x1xi1>
    %251 = vector.broadcast %250 : vector<256x1xi1> to vector<256x8xi1>
    %252 = vector.broadcast %cst_152 : f32 to vector<256x8xf32>
    %253 = arith.select %251, %249, %252 : vector<256x8xi1>, vector<256x8xf32>
    %254 = arith.truncf %253 : vector<256x8xf32> to vector<256x8xbf16>
    %c8_153 = arith.constant 8 : index
    %c0_154 = arith.constant 0 : index
    %c0_155 = arith.constant 0 : index
    %255 = vector.load %arg8[%c8_153, %c0_154, %c0_155] : memref<9x8x128xbf16, #tpu.memory_space<vmem>>, vector<1x8x128xbf16>
    %256 = vector.shape_cast %255 : vector<1x8x128xbf16> to vector<8x128xbf16>
    %cst_156 = arith.constant dense<0.000000e+00> : vector<256x128xf32>
    %257 = tpu.matmul %254, %256, %cst_156 {dimension_numbers = #tpu.dot_dimension_numbers<[1], [0], [0], [1], [0, 0, 1, 1], [], []>} : vector<256x8xbf16>, vector<8x128xbf16>, vector<256x128xf32> -> vector<256x128xf32>
    %258 = arith.addf %248, %257 : vector<256x128xf32>
    %259 = vector.broadcast %177 : vector<1x128xf32> to vector<256x128xf32>
    %260 = arith.addf %258, %259 : vector<256x128xf32>
    %261 = arith.truncf %1 : vector<256x4xf32> to vector<256x4xbf16>
    %c0_157 = arith.constant 0 : index
    %c0_158 = arith.constant 0 : index
    %262 = vector.load %arg10[%c0_157, %c0_158] : memref<4x128xbf16, #tpu.memory_space<vmem>>, vector<4x128xbf16>
    %cst_159 = arith.constant dense<0.000000e+00> : vector<256x128xf32>
    %263 = tpu.matmul %261, %262, %cst_159 {dimension_numbers = #tpu.dot_dimension_numbers<[1], [0], [0], [1], [0, 0, 1, 1], [], []>} : vector<256x4xbf16>, vector<4x128xbf16>, vector<256x128xf32> -> vector<256x128xf32>
    %264 = arith.addf %260, %263 : vector<256x128xf32>
    %cst_160 = arith.constant 0.707106769 : f32
    %265 = vector.broadcast %cst_160 : f32 to vector<256x128xf32>
    %266 = arith.mulf %264, %265 : vector<256x128xf32>
    %c0_161 = arith.constant 0 : index
    %c0_162 = arith.constant 0 : index
    %c0_163 = arith.constant 0 : index
    %267 = vector.load %arg11[%c0_161, %c0_162, %c0_163] : memref<1x256x128xf32, #tpu.memory_space<vmem>>, vector<1x256x128xf32>
    %268 = vector.shape_cast %267 : vector<1x256x128xf32> to vector<256x128xf32>
    %269 = vector.shape_cast %266 : vector<256x128xf32> to vector<1x256x128xf32>
    tpu.vector_store %arg11[%c0_161, %c0_162, %c0_163], %269 {strides = array<i32>} : memref<1x256x128xf32, #tpu.memory_space<vmem>>, vector<1x256x128xf32>,
    return
  }
  func.func @transform_0(%arg0: i32) -> (i32, i32, i32) {
    %c0_i32 = arith.constant 0 : i32
    %c0_i32_0 = arith.constant 0 : i32
    %c0_i32_1 = arith.constant 0 : i32
    return %arg0, %c0_i32, %c0_i32_0 : i32, i32, i32
  }
  func.func @transform_1(%arg0: i32) -> (i32, i32, i32) {
    %c0_i32 = arith.constant 0 : i32
    %c0_i32_0 = arith.constant 0 : i32
    %c0_i32_1 = arith.constant 0 : i32
    return %arg0, %c0_i32, %c0_i32_0 : i32, i32, i32
  }
  func.func @transform_2(%arg0: i32) -> (i32, i32, i32) {
    %c0_i32 = arith.constant 0 : i32
    %c0_i32_0 = arith.constant 0 : i32
    %c0_i32_1 = arith.constant 0 : i32
    return %arg0, %c0_i32, %c0_i32_0 : i32, i32, i32
  }
  func.func @transform_3(%arg0: i32) -> (i32, i32, i32) {
    %c0_i32 = arith.constant 0 : i32
    %c0_i32_0 = arith.constant 0 : i32
    %c0_i32_1 = arith.constant 0 : i32
    return %arg0, %c0_i32, %c0_i32_0 : i32, i32, i32
  }
  func.func @transform_4(%arg0: i32) -> (i32, i32, i32) {
    %c0_i32 = arith.constant 0 : i32
    %c0_i32_0 = arith.constant 0 : i32
    %c0_i32_1 = arith.constant 0 : i32
    return %arg0, %c0_i32, %c0_i32_0 : i32, i32, i32
  }
  func.func @transform_5(%arg0: i32) -> (i32, i32, i32) {
    %c0_i32 = arith.constant 0 : i32
    %c0_i32_0 = arith.constant 0 : i32
    %c0_i32_1 = arith.constant 0 : i32
    %c0_i32_2 = arith.constant 0 : i32
    return %c0_i32, %c0_i32_0, %c0_i32_1 : i32, i32, i32
  }
  func.func @transform_6(%arg0: i32) -> (i32, i32) {
    %c0_i32 = arith.constant 0 : i32
    %c0_i32_0 = arith.constant 0 : i32
    %c0_i32_1 = arith.constant 0 : i32
    return %c0_i32, %c0_i32_0 : i32, i32
  }
  func.func @transform_7(%arg0: i32) -> (i32, i32, i32) {
    %c0_i32 = arith.constant 0 : i32
    %c0_i32_0 = arith.constant 0 : i32
    %c0_i32_1 = arith.constant 0 : i32
    %c0_i32_2 = arith.constant 0 : i32
    return %c0_i32, %c0_i32_0, %c0_i32_1 : i32, i32, i32
  }
  func.func @transform_8(%arg0: i32) -> (i32, i32) {
    %c0_i32 = arith.constant 0 : i32
    %c0_i32_0 = arith.constant 0 : i32
    %c0_i32_1 = arith.constant 0 : i32
    return %c0_i32, %c0_i32_0 : i32, i32
  }
  func.func @transform_9(%arg0: i32) -> (i32, i32) {
    %c0_i32 = arith.constant 0 : i32
    %c0_i32_0 = arith.constant 0 : i32
    %c0_i32_1 = arith.constant 0 : i32
    return %c0_i32, %c0_i32_0 : i32, i32
  }
  func.func @transform_10(%arg0: i32) -> (i32, i32, i32) {
    %c0_i32 = arith.constant 0 : i32
    %c0_i32_0 = arith.constant 0 : i32
    %c0_i32_1 = arith.constant 0 : i32
    return %arg0, %c0_i32, %c0_i32_0 : i32, i32, i32
  }
}

</mosaic_0001>

<bundles_post_ra>
// kernel: tpu_custom_call.1
= control target key start
LH: loop header
LB: loop body
LE: loop exit
PB: predicated region body
PF: predicated region fallthrough
CT: control target
= control target key end

     0   :  { %15 = vsyncpa [#allocation5], 0  ;;  %s13514_s0 = inlined_call_operand.vmem [shape: f32[2,256,4], index: 0, kind: input, shape index: {}]   ;;  %s13515_s1 = inlined_call_operand.vmem [shape: f32[2,1,4], index: 1, kind: input, shape index: {}]   ;;  %s13516_s2 = inlined_call_operand.vmem [shape: f32[2,1,4], index: 2, kind: input, shape index: {}]   ;;  %s13517_s3 = inlined_call_operand.vmem [shape: f32[2,1,8], index: 3, kind: input, shape index: {}]   ;;  %s13518_s4 = inlined_call_operand.vmem [shape: f32[2,1,8], index: 4, kind: input, shape index: {}]   ;;  %s13519_s5 = inlined_call_operand.vmem [shape: bf16[9,4,8], index: 5, kind: input, shape index: {}]   ;;  %s13520_s6 = inlined_call_operand.vmem [shape: f32[1,8], index: 6, kind: input, shape index: {}]   ;;  %s13521_s7 = inlined_call_operand.vmem [shape: bf16[9,8,128], index: 7, kind: input, shape index: {}]   ;;  %s13522_s8 = inlined_call_operand.vmem [shape: f32[1,128], index: 8, kind: input, shape index: {}]   ;;  %s13523_s9 = inlined_call_operand.vmem [shape: bf16[4,128], index: 9, kind: input, shape index: {}]   ;;  %s13524_s10 = inlined_call_operand.hbm [shape: f32[2,256,128], index: 10, kind: output, shape index: {}]  }
   0x1   :  { %17 = vsyncpa [#allocation5 + $0x1], 0  ;;  %s10136_s13 = smov 0   ;;  %s10138_s14 = smov 0  }
   0x2   :  { %s10140_s15 = smov 0   ;;  %s10142_s16 = smov 0  }
   0x3 LB: > { %s10157_s17 = sadd.s32 4294967295, %s10075_s16   ;;  %s8030_s18 = sadd.s32 4294967294, %s10075_s16   ;;  %s10075_s16 = sphi %s10142_s16, %s14674_s16   ;;  %s10071_s15 = sphi %s10140_s15, %s14673_s15   ;;  %s10067_s14 = sphi %s10138_s14, %s14672_s14   ;;  %s10063_s13 = sphi %s10136_s13, %s14671_s13  }
   0x4   : > { %s10161_s19 = sadd.s32 1, %s10075_s16   ;;  %s265_s20 = sadd.s32 1, %s10071_s15 }
   0x5   : > { %s262_s21 = ssub.s32 %s10075_s16, %s10161_s19  ;;  %p275_p0 = scmp.ne.s32.totalorder %s10071_s15, %s10067_s14 }
   0x6   : > { %p263_p1 = scmp.eq.s32.totalorder %s262_s21, 0  ;;  %p276_p2 = scmp.eq.s32.totalorder %s10157_s17, 1 }
   0x7   : > { %p281_p3 = scmp.ne.s32.totalorder %s10067_s14, %s10063_s13  ;;  %p282_p4 = scmp.eq.s32.totalorder %s8030_s18, 1 }
   0x8   : > { %s10172_s22 = scalar_select %p263_p1, %s10071_s15, %s265_s20  }
   0x9   : > { %p10174_p5 = por %p276_p2, %p275_p0  ;;  %p10178_p6 = por %p282_p4, %p281_p3 }
   0xa   : > { %p8033_p7 = scmp.ge.s32.totalorder %s10075_s16, 1  ;;  %p347_p8 = scmp.lt.s32.totalorder %s10075_s16, 3 }
   0xc   : > { %p348_p9 = pnand %p8033_p7, %p347_p8 }
   0xe   : > { %351 = sbr.rel (%p348_p9) target bundleno = 1886 (0x75e), region = 60 }
  0x15   : > { %v8038_v0 = vld [vmem:[%s13519_s5 + $0x2] sm:$0x3]  ;;  %vm13528_vm0 = vcmask 1041408   ;;  %vm13529_vm1 = vcmask 31744   ;;  %p397_p10 = scmp.lt.s32.totalorder %s10157_s17, 1  ;;  %v13526_v2 = vmov 0.0  }
  0x16   : > { %9915 = vmatprep.subr.msk.bf16.mxu0 %vm13528_vm0, %v8038_v0  ;;  %v1630_v1 = vsel %vm13528_vm0, %v8038_v0, 0  ;;  %1348 = vst.msk [vmem:[#allocation2 + $0x8] sm:$0xff] %vm13529_vm1, %v13526_v2  ;;  %1349 = vst.msk [vmem:[#allocation2 + $0x10] sm:$0xff] %vm13529_vm1, %v13526_v2  ;;  %v10205_v3 = vld [vmem:[%s13519_s5] sm:$0x3]  ;;  %s394_s26 = sand.u32 1, %s10067_s14  }
  0x17   : > { %1347 = vst.msk [vmem:[#allocation2] sm:$0xff] %vm13529_vm1, %v13526_v2  ;;  %1350 = vst.msk [vmem:[#allocation2 + $0x118] sm:$0xff] %vm13529_vm1, %v13526_v2  ;;  %8692 = vmatpush3.bf16.msra.mxu0 %v1630_v1  ;;  %s10208_s29 = scalar_select %p397_p10, %s10157_s17, 1 }
  0x18   : > { %1351 = vst.msk [vmem:[#allocation2 + $0x120] sm:$0xff] %vm13529_vm1, %v13526_v2  ;;  %1352 = vst.msk [vmem:[#allocation2 + $0x128] sm:$0xff] %vm13529_vm1, %v13526_v2  ;;  %9916 = vmatprep.subr.msk.bf16.mxu0 %vm13528_vm0, %v10205_v3 }
  0x19   : > { %s8366_s30 = sshll.u32 %s10208_s29, 8  ;;  %s404_s25 = scalar_lea.vmem %s13515_s1, %s10208_s29 }
  0x1a   : > { %s10216_s18 = scalar_lea.vmem %s13514_s0, %s8366_s30  ;;  %s407_s28 = scalar_lea.vmem %s13516_s2, %s10208_s29 }
  0x1b   : > { %v10219_v4 = vld [vmem:[%s10216_s18] sm:$0xff]  ;;  %v10222_v5 = vld [vmem:[%s10216_s18 + $0x8] sm:$0xff]  ;;  %v10225_v6 = vld [vmem:[%s10216_s18 + $0x10] sm:$0xff]  ;;  %s410_s21 = scalar_lea.vmem %s13517_s3, %s10208_s29  ;;  %s413_s27 = scalar_lea.vmem %s13518_s4, %s10208_s29 }
  0x1c   : > { %v10228_v7 = vld [vmem:[%s10216_s18 + $0x18] sm:$0xff]  ;;  %v931_v8 = vsel %vm13529_vm1, %v10219_v4, 0.0  ;;  %v932_v9 = vsel %vm13529_vm1, %v10222_v5, 0.0  ;;  %v934_v10 = vsel %vm13529_vm1, %v10225_v6, 0.0  ;;  %v10237_v13 = vld [vmem:[%s10216_s18 + $0x20] sm:$0xff]  ;;  %v10242_v17 = vld [vmem:[%s10216_s18 + $0x28] sm:$0xff]  ;;  %v1002_v35 = vmul.f32 %v10219_v4, %v10219_v4 }
  0x1d   : > { %v1530_v11 = vld [vmem:[#allocation2 + $0x8] sm:$0xff]  ;;  %v1531_v12 = vld [vmem:[#allocation2 + $0x10] sm:$0xff]  ;;  %v933_v14 = vadd.f32 %v932_v9, %v931_v8  ;;  %v936_v16 = vsel %vm13529_vm1, %v10228_v7, 0.0  ;;  %v938_v19 = vsel %vm13529_vm1, %v10237_v13, 0.0  ;;  %v940_v22 = vsel %vm13529_vm1, %v10242_v17, 0.0  ;;  %v10253_v23 = vld [vmem:[%s10216_s18 + $0x38] sm:$0xff] }
  0x1e   : > { %v1562_v15 = vpack.c.bf16 %v1531_v12, %v1530_v11  ;;  %v10248_v20 = vld [vmem:[%s10216_s18 + $0x30] sm:$0xff]  ;;  %v10258_v26 = vld [vmem:[%s10216_s18 + $0x40] sm:$0xff]  ;;  %v944_v28 = vsel %vm13529_vm1, %v10253_v23, 0.0  ;;  %v10263_v29 = vld [vmem:[%s10216_s18 + $0x48] sm:$0xff]  ;;  %v1003_v36 = vmul.f32 %v10222_v5, %v10222_v5  ;;  %v1004_v39 = vmul.f32 %v10225_v6, %v10225_v6  ;;  %s8367_s29 = sshll.u32 %s10157_s17, 12  ;;  %s13473_s17 = scalar_lea.sflag [#allocation5], %s394_s26 }
  0x1f   : > { %v935_v18 = vadd.f32 %v934_v10, %v933_v14  ;;  %v942_v25 = vsel %vm13529_vm1, %v10248_v20, 0.0  ;;  %v946_v31 = vsel %vm13529_vm1, %v10258_v26, 0.0  ;;  %v10268_v32 = vld [vmem:[%s10216_s18 + $0x50] sm:$0xff]  ;;  %v948_v34 = vsel %vm13529_vm1, %v10263_v29, 0.0  ;;  %v10277_v37 = vld [vmem:[%s10216_s18 + $0x58] sm:$0xff]  ;;  %v10286_v42 = vld [vmem:[%s10216_s18 + $0x60] sm:$0xff]  ;;  %s13464_s12 = scalar_lea.hbm %s13524_s10, %s8367_s29 }
  0x20   : > { %8693 = vmatprep.mubr.msk.bf16.mxu0 %vm13529_vm1, %v1562_v15  ;;  %v950_v40 = vsel %vm13529_vm1, %v10268_v32, 0.0  ;;  %v1005_v41 = vmul.f32 %v10228_v7, %v10228_v7  ;;  %v952_v44 = vsel %vm13529_vm1, %v10277_v37, 0.0  ;;  %v1006_v45 = vmul.f32 %v10237_v13, %v10237_v13  ;;  %v10295_v48 = vld [vmem:[%s10216_s18 + $0x68] sm:$0xff]  ;;  %v10304_v55 = vld [vmem:[%s10216_s18 + $0x70] sm:$0xff]  ;;  %v10312_v61 = vld [vmem:[%s10216_s18 + $0x78] sm:$0xff] }
  0x21   : > { %v937_v21 = vadd.f32 %v936_v16, %v935_v18  ;;  %v1034_v46 = vsel %vm13529_vm1, %v1002_v35, 0.0  ;;  %v1035_v47 = vsel %vm13529_vm1, %v1003_v36, 0.0  ;;  %v1037_v51 = vsel %vm13529_vm1, %v1004_v39, 0.0  ;;  %v10320_v9 = vld [vmem:[%s10216_s18 + $0x80] sm:$0xff]  ;;  %v10328_v16 = vld [vmem:[%s10216_s18 + $0x88] sm:$0xff] }
  0x22   : > { %v1036_v50 = vadd.f32 %v1035_v47, %v1034_v46  ;;  %v954_v52 = vsel %vm13529_vm1, %v10286_v42, 0.0  ;;  %v1007_v53 = vmul.f32 %v10242_v17, %v10242_v17  ;;  %v1039_v54 = vsel %vm13529_vm1, %v1005_v41, 0.0  ;;  %v10352_v41 = vld [vmem:[%s10216_s18 + $0xa0] sm:$0xff] }
  0x23   : > { %v939_v24 = vadd.f32 %v938_v19, %v937_v21  ;;  %v956_v58 = vsel %vm13529_vm1, %v10295_v48, 0.0  ;;  %v1008_v59 = vmul.f32 %v10248_v20, %v10248_v20  ;;  %v1041_v60 = vsel %vm13529_vm1, %v1006_v45, 0.0  ;;  %v10564_v2 = vld [vmem:[%s407_s28] ss:$0 sm:$0xff] }
  0x24   : > { %v1038_v57 = vadd.f32 %v1037_v51, %v1036_v50  ;;  %v958_v0 = vsel %vm13529_vm1, %v10304_v55, 0.0  ;;  %v1009_v1 = vmul.f32 %v10253_v23, %v10253_v23  ;;  %v1043_v8 = vsel %vm13529_vm1, %v1007_v53, 0.0 }
  0x25   : > { %v941_v27 = vadd.f32 %v940_v22, %v939_v24  ;;  %v960_v12 = vsel %vm13529_vm1, %v10312_v61, 0.0  ;;  %v1010_v14 = vmul.f32 %v10258_v26, %v10258_v26  ;;  %v1045_v15 = vsel %vm13529_vm1, %v1008_v59, 0.0 }
  0x26   : > { %v1040_v63 = vadd.f32 %v1039_v54, %v1038_v57  ;;  %v962_v21 = vsel %vm13529_vm1, %v10320_v9, 0.0  ;;  %v1011_v22 = vmul.f32 %v10263_v29, %v10263_v29  ;;  %v1047_v24 = vsel %vm13529_vm1, %v1009_v1, 0.0 }
  0x27   : > { %v943_v30 = vadd.f32 %v942_v25, %v941_v27  ;;  %v10336_v25 = vld [vmem:[%s10216_s18 + $0x90] sm:$0xff]  ;;  %v1013_v39 = vmul.f32 %v10277_v37, %v10277_v37  ;;  %v1014_v46 = vmul.f32 %v10286_v42, %v10286_v42  ;;  %v1015_v53 = vmul.f32 %v10295_v48, %v10295_v48 }
  0x28   : > { %v1042_v11 = vadd.f32 %v1041_v60, %v1040_v63  ;;  %v1016_v60 = vmul.f32 %v10304_v55, %v10304_v55  ;;  %v10376_v63 = vld [vmem:[%s10216_s18 + $0xb8] sm:$0xff] }
  0x29   : > { %v945_v33 = vadd.f32 %v944_v28, %v943_v30  ;;  %v964_v30 = vsel %vm13529_vm1, %v10328_v16, 0.0  ;;  %v1055_v54 = vsel %vm13529_vm1, %v1013_v39, 0.0  ;;  %v1020_v39 = vmul.f32 %v10336_v25, %v10336_v25 }
  0x2a   : > { %v1044_v19 = vadd.f32 %v1043_v8, %v1042_v11  ;;  %v1059_v11 = vsel %vm13529_vm1, %v1015_v53, 0.0 }
  0x2b   : > { %v947_v38 = vadd.f32 %v946_v31, %v945_v33  ;;  %v1012_v31 = vmul.f32 %v10268_v32, %v10268_v32  ;;  %v1049_v33 = vsel %vm13529_vm1, %v1010_v14, 0.0 }
  0x2c   : > { %v1046_v28 = vadd.f32 %v1045_v15, %v1044_v19  ;;  %v1018_v19 = vmul.f32 %v10320_v9, %v10320_v9 }
  0x2d   : > { %v949_v43 = vadd.f32 %v948_v34, %v947_v38  ;;  %v10344_v34 = vld [vmem:[%s10216_s18 + $0x98] sm:$0xff]  ;;  %v966_v38 = vsel %vm13529_vm1, %v10336_v25, 0.0  ;;  %v1053_v47 = vsel %vm13529_vm1, %v1012_v31, 0.0 }
  0x2e   : > { %v1048_v36 = vadd.f32 %v1047_v24, %v1046_v28  ;;  %v968_v45 = vsel %vm13529_vm1, %v10344_v34, 0.0 }
  0x2f   : > { %v951_v49 = vadd.f32 %v950_v40, %v949_v43  ;;  %v1051_v40 = vsel %vm13529_vm1, %v1011_v22, 0.0  ;;  %v10392_v22 = vld [vmem:[%s10216_s18 + $0xc8] sm:$0xff] }
  0x31   : > { %v953_v56 = vadd.f32 %v952_v44, %v951_v49  ;;  %v1050_v44 = vadd.f32 %v1049_v33, %v1048_v36  ;;  %v10360_v49 = vld [vmem:[%s10216_s18 + $0xa8] sm:$0xff]  ;;  %v10400_v33 = vld [vmem:[%s10216_s18 + $0xd0] sm:$0xff] }
  0x32   : > { %v972_v59 = vsel %vm13529_vm1, %v10360_v49, 0.0 }
  0x33   : > { %v955_v62 = vadd.f32 %v954_v52, %v953_v56  ;;  %v1052_v51 = vadd.f32 %v1051_v40, %v1050_v44  ;;  %v970_v52 = vsel %vm13529_vm1, %v10352_v41, 0.0  ;;  %v10368_v56 = vld [vmem:[%s10216_s18 + $0xb0] sm:$0xff]  ;;  %v1065_v40 = vsel %vm13529_vm1, %v1018_v19, 0.0 }
  0x34   : > { %v974_v8 = vsel %vm13529_vm1, %v10368_v56, 0.0 }
  0x35   : > { %v957_v10 = vadd.f32 %v956_v58, %v955_v62  ;;  %v1054_v58 = vadd.f32 %v1053_v47, %v1052_v51  ;;  %v1057_v62 = vsel %vm13529_vm1, %v1014_v46, 0.0  ;;  %v982_v46 = vsel %vm13529_vm1, %v10400_v33, 0.0  ;;  %v10416_v51 = vld [vmem:[%s10216_s18 + $0xe0] sm:$0xff] }
  0x36   : > { %v1021_v47 = vmul.f32 %v10344_v34, %v10344_v34 }
  0x37   : > { %v959_v18 = vadd.f32 %v958_v0, %v957_v10  ;;  %v1056_v1 = vadd.f32 %v1055_v54, %v1054_v58  ;;  %v1017_v10 = vmul.f32 %v10312_v61, %v10312_v61  ;;  %v1069_v58 = vsel %vm13529_vm1, %v1020_v39, 0.0 }
  0x39   : > { %v961_v27 = vadd.f32 %v960_v12, %v959_v18  ;;  %v10384_v12 = vld [vmem:[%s10216_s18 + $0xc0] sm:$0xff]  ;;  %v1058_v15 = vadd.f32 %v1057_v62, %v1056_v1  ;;  %v976_v18 = vsel %vm13529_vm1, %v10376_v63, 0.0  ;;  %v1063_v31 = vsel %vm13529_vm1, %v1017_v10, 0.0  ;;  %v10432_v10 = vld [vmem:[%s10216_s18 + $0xf0] sm:$0xff] }
  0x3a   : > { %v978_v28 = vsel %vm13529_vm1, %v10384_v12, 0.0  ;;  %v1023_v1 = vmul.f32 %v10360_v49, %v10360_v49  ;;  %v1026_v39 = vmul.f32 %v10384_v12, %v10384_v12 }
  0x3b   : > { %v963_v35 = vadd.f32 %v962_v21, %v961_v27  ;;  %v1061_v21 = vsel %vm13529_vm1, %v1016_v60, 0.0  ;;  %v1060_v27 = vadd.f32 %v1059_v11, %v1058_v15 }
  0x3d   : > { %v965_v43 = vadd.f32 %v964_v30, %v963_v35  ;;  %v1019_v30 = vmul.f32 %v10328_v16, %v10328_v16  ;;  %v1062_v36 = vadd.f32 %v1061_v21, %v1060_v27  ;;  %v10440_v21 = vld [vmem:[%s10216_s18 + $0xf8] sm:$0xff] }
  0x3f   : > { %v967_v50 = vadd.f32 %v966_v38, %v965_v43  ;;  %v980_v38 = vsel %vm13529_vm1, %v10392_v22, 0.0  ;;  %v10408_v43 = vld [vmem:[%s10216_s18 + $0xd8] sm:$0xff] }
  0x40   : > { %v984_v54 = vsel %vm13529_vm1, %v10408_v43, 0.0 }
  0x41   : > { %v969_v57 = vadd.f32 %v968_v45, %v967_v50  ;;  %v1064_v45 = vadd.f32 %v1063_v31, %v1062_v36  ;;  %v1067_v50 = vsel %vm13529_vm1, %v1019_v30, 0.0  ;;  %v1025_v30 = vmul.f32 %v10376_v63, %v10376_v63 }
  0x42   : > { %v1075_v31 = vsel %vm13529_vm1, %v1023_v1, 0.0  ;;  %v1030_v1 = vmul.f32 %v10416_v51, %v10416_v51 }
  0x43   : > { %v971_v0 = vadd.f32 %v970_v52, %v969_v57  ;;  %v1066_v53 = vadd.f32 %v1065_v40, %v1064_v45  ;;  %v1022_v57 = vmul.f32 %v10352_v41, %v10352_v41 }
  0x45   : > { %v973_v14 = vadd.f32 %v972_v59, %v971_v0  ;;  %v10424_v59 = vld [vmem:[%s10216_s18 + $0xe8] sm:$0xff]  ;;  %v1068_v62 = vadd.f32 %v1067_v50, %v1066_v53  ;;  %v986_v0 = vsel %vm13529_vm1, %v10416_v51, 0.0  ;;  %v1073_v19 = vsel %vm13529_vm1, %v1022_v57, 0.0 }
  0x46   : > { %v988_v15 = vsel %vm13529_vm1, %v10424_v59, 0.0  ;;  %v1028_v53 = vmul.f32 %v10400_v33, %v10400_v33 }
  0x47   : > { %v975_v24 = vadd.f32 %v974_v8, %v973_v14  ;;  %v1071_v8 = vsel %vm13529_vm1, %v1021_v47, 0.0  ;;  %v1070_v14 = vadd.f32 %v1069_v58, %v1068_v62  ;;  %v1079_v47 = vsel %vm13529_vm1, %v1025_v30, 0.0 }
  0x49   : > { %v977_v35 = vadd.f32 %v976_v18, %v975_v24  ;;  %v1024_v18 = vmul.f32 %v10368_v56, %v10368_v56  ;;  %v1072_v27 = vadd.f32 %v1071_v8, %v1070_v14  ;;  %v1085_v8 = vsel %vm13529_vm1, %v1028_v53, 0.0 }
  0x4b   : > { %v979_v44 = vadd.f32 %v978_v28, %v977_v35  ;;  %v990_v28 = vsel %vm13529_vm1, %v10432_v10, 0.0  ;;  %v1074_v36 = vadd.f32 %v1073_v19, %v1072_v27  ;;  %v1077_v40 = vsel %vm13529_vm1, %v1024_v18, 0.0 }
  0x4c   : > { %v1089_v27 = vsel %vm13529_vm1, %v1030_v1, 0.0  ;;  %v447_v1 = vlaneseq }
  0x4d   : > { %v981_v52 = vadd.f32 %v980_v38, %v979_v44  ;;  %v992_v38 = vsel %vm13529_vm1, %v10440_v21, 0.0  ;;  %v1076_v45 = vadd.f32 %v1075_v31, %v1074_v36  ;;  %v1033_v31 = vmul.f32 %v10440_v21, %v10440_v21 }
  0x4f   : > { %v983_v60 = vadd.f32 %v982_v46, %v981_v52  ;;  %v1027_v46 = vmul.f32 %v10392_v22, %v10392_v22  ;;  %v1078_v52 = vadd.f32 %v1077_v40, %v1076_v45 }
  0x51   : > { %v985_v11 = vadd.f32 %v984_v54, %v983_v60  ;;  %v1081_v54 = vsel %vm13529_vm1, %v1026_v39, 0.0  ;;  %v1080_v58 = vadd.f32 %v1079_v47, %v1078_v52  ;;  %v1029_v60 = vmul.f32 %v10408_v43, %v10408_v43 }
  0x52   : > { %v1083_v62 = vsel %vm13529_vm1, %v1027_v46, 0.0 }
  0x53   : > { %v987_v24 = vadd.f32 %v986_v0, %v985_v11  ;;  %v1082_v0 = vadd.f32 %v1081_v54, %v1080_v58  ;;  %v1087_v18 = vsel %vm13529_vm1, %v1029_v60, 0.0 }
  0x55   : > { %v989_v35 = vadd.f32 %v988_v15, %v987_v24  ;;  %v1084_v14 = vadd.f32 %v1083_v62, %v1082_v0  ;;  %v1031_v15 = vmul.f32 %v10424_v59, %v10424_v59  ;;  %v1032_v24 = vmul.f32 %v10432_v10, %v10432_v10 }
  0x57   : > { %v991_v44 = vadd.f32 %v990_v28, %v989_v35  ;;  %v1086_v19 = vadd.f32 %v1085_v8, %v1084_v14  ;;  %v1091_v35 = vsel %vm13529_vm1, %v1031_v15, 0.0  ;;  %v10483_v14 = vshrl.u32 %v447_v1, 7  ;;  %v928_v15 = vld [vmem:[%s404_s25] sm:$0x1] }
  0x59   : > { %v993_v50 = vadd.f32 %v992_v38, %v991_v44  ;;  %v1088_v30 = vadd.f32 %v1087_v18, %v1086_v19  ;;  %v1093_v38 = vsel %vm13529_vm1, %v1032_v24, 0.0  ;;  %v1095_v44 = vsel %vm13529_vm1, %v1033_v31, 0.0  ;;  %13768 = vst [vmem:[#allocation7_spill] sm:$0xff] %v10483_v14 }
  0x5a   : > { %v1173_v24 = vadd.f32 1.0, %v928_v15 }
  0x5b   : > { %v994_v57 = vrot.slane %v993_v50, 4  ;;  %v1090_v36 = vadd.f32 %v1089_v27, %v1088_v30  ;;  %v13525_v27 = vsub.s32 0, %v10483_v14 }
  0x5d   : > { %v995_v11 = vadd.f32 %v994_v57, %v993_v50  ;;  %v1092_v40 = vadd.f32 %v1091_v35, %v1090_v36  ;;  %v10492_v31 = vrot.slane %v1173_v24, %v13525_v27  ;;  %v10496_v35 = vsel %vm13528_vm0, %v10205_v3, 0 }
  0x5f   : > { %v996_v28 = vrot.slane %v995_v11, 2  ;;  %v1094_v45 = vadd.f32 %v1093_v38, %v1092_v40 }
  0x61   : > { %v997_v39 = vadd.f32 %v996_v28, %v995_v11  ;;  %v1096_v47 = vadd.f32 %v1095_v44, %v1094_v45 }
  0x63   : > { %v998_v46 = vrot.slane %v997_v39, 1  ;;  %v1097_v50 = vrot.slane %v1096_v47, 4 }
  0x65   : > { %v999_v52 = vadd.f32 %v998_v46, %v997_v39  ;;  %v1098_v53 = vadd.f32 %v1097_v50, %v1096_v47 }
  0x67   : > { %v1099_v54 = vrot.slane %v1098_v53, 2  ;;  %v10475_v57 = vmul.f32 0.00390625, %v999_v52 }
  0x69   : > { %v1100_v58 = vadd.f32 %v1099_v54, %v1098_v53  ;;  %v1104_v0 = vmul.f32 %v10475_v57, %v10475_v57  ;;  %v1107_v28 = vsub.f32 %v10219_v4, %v10475_v57  ;;  %v1108_v30 = vsub.f32 %v10222_v5, %v10475_v57 }
  0x6a   : > { %v1109_v36 = vsub.f32 %v10225_v6, %v10475_v57  ;;  %v1110_v38 = vsub.f32 %v10228_v7, %v10475_v57  ;;  %v1111_v4 = vsub.f32 %v10237_v13, %v10475_v57  ;;  %v1112_v5 = vsub.f32 %v10242_v17, %v10475_v57 }
  0x6b   : > { %v1101_v60 = vrot.slane %v1100_v58, 1  ;;  %v1113_v39 = vsub.f32 %v10248_v20, %v10475_v57  ;;  %v1114_v3 = vsub.f32 %v10253_v23, %v10475_v57  ;;  %v1115_v40 = vsub.f32 %v10258_v26, %v10475_v57 }
  0x6c   : > { %v1116_v6 = vsub.f32 %v10263_v29, %v10475_v57  ;;  %v1117_v7 = vsub.f32 %v10268_v32, %v10475_v57  ;;  %v1118_v13 = vsub.f32 %v10277_v37, %v10475_v57  ;;  %v1119_v17 = vsub.f32 %v10286_v42, %v10475_v57 }
  0x6d   : > { %v1102_v62 = vadd.f32 %v1101_v60, %v1100_v58  ;;  %v1120_v20 = vsub.f32 %v10295_v48, %v10475_v57  ;;  %v1121_v23 = vsub.f32 %v10304_v55, %v10475_v57  ;;  %v1122_v44 = vsub.f32 %v10312_v61, %v10475_v57 }
  0x6e   : > { %v1123_v45 = vsub.f32 %v10320_v9, %v10475_v57  ;;  %v1124_v46 = vsub.f32 %v10328_v16, %v10475_v57  ;;  %v1125_v47 = vsub.f32 %v10336_v25, %v10475_v57  ;;  %v1126_v50 = vsub.f32 %v10344_v34, %v10475_v57 }
  0x6f   : > { %v1103_v8 = vmul.f32 0.00390625, %v1102_v62  ;;  %v1127_v52 = vsub.f32 %v10352_v41, %v10475_v57  ;;  %v1128_v53 = vsub.f32 %v10360_v49, %v10475_v57 }
  0x71   : > { %v1105_v11 = vsub.f32 %v1103_v8, %v1104_v0 }
  0x73   : > { %v1106_v18 = vmax.f32 %v1105_v11, 0.0 }
  0x75   : > { %v1139_v19 = vadd.f32 1e-05, %v1106_v18 }
  0x77   : > { %9977 = vrsqrt.f32 %v1139_v19 }
  0x81   : > { %v10550_v0 = vpop.eup %9977 }
  0x82   : > { %v1141_v18 = vmul.f32 %v10550_v0, %v1107_v28  ;;  %v1142_v19 = vmul.f32 %v10550_v0, %v1108_v30  ;;  %v1143_v24 = vmul.f32 %v10550_v0, %v1109_v36  ;;  %v1144_v27 = vmul.f32 %v10550_v0, %v1110_v38 }
  0x83   : > { %v1145_v1 = vmul.f32 %v10550_v0, %v1111_v4  ;;  %v1146_v8 = vmul.f32 %v10550_v0, %v1112_v5  ;;  %v1147_v62 = vmul.f32 %v10550_v0, %v1113_v39  ;;  %v1148_v11 = vmul.f32 %v10550_v0, %v1114_v3 }
  0x84   : > { %v1180_v15 = vmul.f32 %v10492_v31, %v1141_v18  ;;  %v1181_v28 = vmul.f32 %v10492_v31, %v1142_v19  ;;  %v1182_v30 = vmul.f32 %v10492_v31, %v1143_v24  ;;  %v1183_v36 = vmul.f32 %v10492_v31, %v1144_v27 }
  0x85   : > { %v1184_v38 = vmul.f32 %v10492_v31, %v1145_v1  ;;  %v1185_v60 = vmul.f32 %v10492_v31, %v1146_v8  ;;  %v1186_v4 = vmul.f32 %v10492_v31, %v1147_v62  ;;  %v1187_v5 = vmul.f32 %v10492_v31, %v1148_v11 }
  0x86   : > { %v1218_v39 = vadd.f32 %v10564_v2, %v1180_v15  ;;  %v1219_v3 = vadd.f32 %v10564_v2, %v1181_v28  ;;  %v1220_v18 = vadd.f32 %v10564_v2, %v1182_v30  ;;  %v1221_v19 = vadd.f32 %v10564_v2, %v1183_v36 }
  0x87   : > { %v1222_v24 = vadd.f32 %v10564_v2, %v1184_v38  ;;  %v1223_v27 = vadd.f32 %v10564_v2, %v1185_v60  ;;  %v1224_v1 = vadd.f32 %v10564_v2, %v1186_v4  ;;  %v1225_v8 = vadd.f32 %v10564_v2, %v1187_v5 }
  0x88   : > { %vm1250_vm2 = vcmp.ge.f32.partialorder %v1218_v39, 0.0  ;;  %vm1251_vm3 = vcmp.ge.f32.partialorder %v1219_v3, 0.0  ;;  %v1282_v62 = vmul.f32 0.2, %v1218_v39  ;;  %v1283_v11 = vmul.f32 0.2, %v1219_v3 }
  0x89   : > { %vm1252_vm4 = vcmp.ge.f32.partialorder %v1220_v18, 0.0  ;;  %vm1253_vm5 = vcmp.ge.f32.partialorder %v1221_v19, 0.0  ;;  %v1284_v15 = vmul.f32 0.2, %v1220_v18  ;;  %v1285_v28 = vmul.f32 0.2, %v1221_v19 }
  0x8a   : > { %v1314_v58 = vsel %vm1250_vm2, %v1218_v39, %v1282_v62  ;;  %v1315_v30 = vsel %vm1251_vm3, %v1219_v3, %v1283_v11  ;;  %vm1254_vm6 = vcmp.ge.f32.partialorder %v1222_v24, 0.0  ;;  %vm1255_vm7 = vcmp.ge.f32.partialorder %v1223_v27, 0.0 }
  0x8b   : > { %1353 = vst.msk [vmem:[#allocation2 + $0x18] sm:$0xff] %vm13529_vm1, %v1314_v58  ;;  %1354 = vst.msk [vmem:[#allocation2 + $0x20] sm:$0xff] %vm13529_vm1, %v1315_v30  ;;  %v1316_v60 = vsel %vm1252_vm4, %v1220_v18, %v1284_v15  ;;  %v1317_v36 = vsel %vm1253_vm5, %v1221_v19, %v1285_v28  ;;  %v1286_v38 = vmul.f32 0.2, %v1222_v24  ;;  %v1287_v4 = vmul.f32 0.2, %v1223_v27 }
  0x8c   : > { %1355 = vst.msk [vmem:[#allocation2 + $0x28] sm:$0xff] %vm13529_vm1, %v1316_v60  ;;  %1356 = vst.msk [vmem:[#allocation2 + $0x30] sm:$0xff] %vm13529_vm1, %v1317_v36  ;;  %vm1256_vm8 = vcmp.ge.f32.partialorder %v1224_v1, 0.0  ;;  %vm1257_vm9 = vcmp.ge.f32.partialorder %v1225_v8, 0.0  ;;  %v1288_v5 = vmul.f32 0.2, %v1224_v1  ;;  %v1149_v58 = vmul.f32 %v10550_v0, %v1115_v40 }
  0x8d   : > { %v1289_v54 = vmul.f32 0.2, %v1225_v8  ;;  %v1318_v39 = vsel %vm1254_vm6, %v1222_v24, %v1286_v38  ;;  %v1319_v3 = vsel %vm1255_vm7, %v1223_v27, %v1287_v4  ;;  %v1150_v18 = vmul.f32 %v10550_v0, %v1116_v6  ;;  %v10641_v36 = vld [vmem:[%s13519_s5 + $0x4] sm:$0x3] }
  0x8e   : > { %1357 = vst.msk [vmem:[#allocation2 + $0x38] sm:$0xff] %vm13529_vm1, %v1318_v39  ;;  %1358 = vst.msk [vmem:[#allocation2 + $0x40] sm:$0xff] %vm13529_vm1, %v1319_v3  ;;  %v1320_v19 = vsel %vm1256_vm8, %v1224_v1, %v1288_v5  ;;  %v1151_v24 = vmul.f32 %v10550_v0, %v1117_v7  ;;  %v1152_v26 = vmul.f32 %v10550_v0, %v1118_v13 }
  0x8f   : > { %v1321_v62 = vsel %vm1257_vm9, %v1225_v8, %v1289_v54  ;;  %1359 = vst.msk [vmem:[#allocation2 + $0x48] sm:$0xff] %vm13529_vm1, %v1320_v19  ;;  %v1188_v29 = vmul.f32 %v10492_v31, %v1149_v58  ;;  %v1189_v40 = vmul.f32 %v10492_v31, %v1150_v18  ;;  %v1153_v32 = vmul.f32 %v10550_v0, %v1119_v17 }
  0x90   : > { %1360 = vst.msk [vmem:[#allocation2 + $0x50] sm:$0xff] %vm13529_vm1, %v1321_v62  ;;  %v1154_v37 = vmul.f32 %v10550_v0, %v1120_v20  ;;  %v1190_v6 = vmul.f32 %v10492_v31, %v1151_v24  ;;  %v1191_v7 = vmul.f32 %v10492_v31, %v1152_v26  ;;  %v1155_v13 = vmul.f32 %v10550_v0, %v1121_v23 }
  0x91   : > { %v1156_v42 = vmul.f32 %v10550_v0, %v1122_v44  ;;  %v1226_v17 = vadd.f32 %v10564_v2, %v1188_v29  ;;  %v1227_v48 = vadd.f32 %v10564_v2, %v1189_v40  ;;  %v1192_v20 = vmul.f32 %v10492_v31, %v1153_v32 }
  0x92   : > { %v1193_v54 = vmul.f32 %v10492_v31, %v1154_v37  ;;  %v1532_v27 = vld [vmem:[#allocation2 + $0x18] sm:$0xff]  ;;  %v1533_v1 = vld [vmem:[#allocation2 + $0x20] sm:$0xff]  ;;  %v1228_v8 = vadd.f32 %v10564_v2, %v1190_v6  ;;  %v1229_v55 = vadd.f32 %v10564_v2, %v1191_v7  ;;  %v1194_v23 = vmul.f32 %v10492_v31, %v1155_v13 }
  0x93   : > { %v1195_v61 = vmul.f32 %v10492_v31, %v1156_v42  ;;  %v1563_v11 = vpack.c.bf16 %v1533_v1, %v1532_v27  ;;  %v1534_v44 = vld [vmem:[#allocation2 + $0x28] sm:$0xff]  ;;  %v1535_v15 = vld [vmem:[#allocation2 + $0x30] sm:$0xff]  ;;  %vm1258_vm10 = vcmp.ge.f32.partialorder %v1226_v17, 0.0  ;;  %vm1259_vm11 = vcmp.ge.f32.partialorder %v1227_v48, 0.0 }
  0x94   : > { %v1290_v28 = vmul.f32 0.2, %v1226_v17  ;;  %v1564_v30 = vpack.c.bf16 %v1535_v15, %v1534_v44  ;;  %v1291_v60 = vmul.f32 0.2, %v1227_v48  ;;  %vm1260_vm12 = vcmp.ge.f32.partialorder %v1228_v8, 0.0 }
  0x95   : > { %vm1261_vm13 = vcmp.ge.f32.partialorder %v1229_v55, 0.0  ;;  %8694 = vmatmul.mubr.msk.bf16.vlgmr.msra.gmra.mrb[0].mxu0 %vm13529_vm1, %v1563_v11  ;;  %v1536_v38 = vld [vmem:[#allocation2 + $0x38] sm:$0xff]  ;;  %v1537_v4 = vld [vmem:[#allocation2 + $0x40] sm:$0xff]  ;;  %v1292_v39 = vmul.f32 0.2, %v1228_v8  ;;  %v1230_v58 = vadd.f32 %v10564_v2, %v1192_v20  ;;  %v1231_v26 = vadd.f32 %v10564_v2, %v1193_v54 }
  0x96   : > { %v1322_v5 = vsel %vm1258_vm10, %v1226_v17, %v1290_v28  ;;  %v1293_v3 = vmul.f32 0.2, %v1229_v55  ;;  %8726 = vmatpush3.bf16.msra.mxu0 %v10496_v35  ;;  %8697 = vmatprep.mubr.msk.bf16.mxu0 %vm13529_vm1, %v1564_v30  ;;  %v1565_v18 = vpack.c.bf16 %v1537_v4, %v1536_v38  ;;  %v1538_v19 = vld [vmem:[#allocation2 + $0x48] sm:$0xff]  ;;  %v1323_v24 = vsel %vm1259_vm11, %v1227_v48, %v1291_v60 }
  0x97   : > { %v1539_v62 = vld [vmem:[#allocation2 + $0x50] sm:$0xff]  ;;  %1361 = vst.msk [vmem:[#allocation2 + $0x58] sm:$0xff] %vm13529_vm1, %v1322_v5  ;;  %1362 = vst.msk [vmem:[#allocation2 + $0x60] sm:$0xff] %vm13529_vm1, %v1323_v24  ;;  %v1324_v40 = vsel %vm1260_vm12, %v1228_v8, %v1292_v39  ;;  %vm1262_vm14 = vcmp.ge.f32.partialorder %v1230_v58, 0.0  ;;  %9917 = vmatprep.subr.msk.bf16.mxu0 %vm13528_vm0, %v10641_v36  ;;  %vm1263_vm15 = vcmp.ge.f32.partialorder %v1231_v26, 0.0  ;;  %v1232_v6 = vadd.f32 %v10564_v2, %v1194_v23 }
  0x98   : > { %v1566_v29 = vpack.c.bf16 %v1539_v62, %v1538_v19  ;;  %v1325_v32 = vsel %vm1261_vm13, %v1229_v55, %v1293_v3  ;;  %1363 = vst.msk [vmem:[#allocation2 + $0x68] sm:$0xff] %vm13529_vm1, %v1324_v40  ;;  %v1294_v35 = vmul.f32 0.2, %v1230_v58  ;;  %v1295_v37 = vmul.f32 0.2, %v1231_v26 }
  0x99   : > { %1364 = vst.msk [vmem:[#allocation2 + $0x70] sm:$0xff] %vm13529_vm1, %v1325_v32  ;;  %v1233_v7 = vadd.f32 %v10564_v2, %v1195_v61  ;;  %v1157_v13 = vmul.f32 %v10550_v0, %v1123_v45  ;;  %v1158_v42 = vmul.f32 %v10550_v0, %v1124_v46  ;;  %v1159_v17 = vmul.f32 %v10550_v0, %v1125_v47 }
  0x9a   : > { %v1326_v48 = vsel %vm1262_vm14, %v1230_v58, %v1294_v35  ;;  %v1327_v20 = vsel %vm1263_vm15, %v1231_v26, %v1295_v37  ;;  %vm1264_vm2 = vcmp.ge.f32.partialorder %v1232_v6, 0.0  ;;  %v1296_v54 = vmul.f32 0.2, %v1232_v6 }
  0x9b   : > { %1365 = vst.msk [vmem:[#allocation2 + $0x78] sm:$0xff] %vm13529_vm1, %v1326_v48  ;;  %1366 = vst.msk [vmem:[#allocation2 + $0x80] sm:$0xff] %vm13529_vm1, %v1327_v20  ;;  %vm1265_vm3 = vcmp.ge.f32.partialorder %v1233_v7, 0.0  ;;  %v1297_v9 = vmul.f32 0.2, %v1233_v7  ;;  %v1196_v45 = vmul.f32 %v10492_v31, %v1157_v13  ;;  %v1197_v16 = vmul.f32 %v10492_v31, %v1158_v42 }
  0x9c   : > { %v1328_v46 = vsel %vm1264_vm2, %v1232_v6, %v1296_v54  ;;  %v1160_v25 = vmul.f32 %v10550_v0, %v1126_v50  ;;  %v1198_v47 = vmul.f32 %v10492_v31, %v1159_v17  ;;  %v1161_v27 = vmul.f32 %v10550_v0, %v1127_v52 }
  0x9d   : > { %8698 = vmatmul.mubr.msk.bf16.gmra.mrb[4].mxu0 %vm13529_vm1, %v1565_v18  ;;  %v1329_v8 = vsel %vm1265_vm3, %v1233_v7, %v1297_v9  ;;  %1367 = vst.msk [vmem:[#allocation2 + $0x88] sm:$0xff] %vm13529_vm1, %v1328_v46  ;;  %v1234_v55 = vadd.f32 %v10564_v2, %v1196_v45  ;;  %v1235_v23 = vadd.f32 %v10564_v2, %v1197_v16 }
  0x9e   : > { %v1540_v1 = vld [vmem:[#allocation2 + $0x58] sm:$0xff]  ;;  %v1162_v34 = vmul.f32 %v10550_v0, %v1128_v53  ;;  %8701 = vmatprep.mubr.msk.bf16.mxu0 %vm13529_vm1, %v1566_v29  ;;  %v1541_v41 = vld [vmem:[#allocation2 + $0x60] sm:$0xff]  ;;  %1368 = vst.msk [vmem:[#allocation2 + $0x90] sm:$0xff] %vm13529_vm1, %v1329_v8  ;;  %v1199_v50 = vmul.f32 %v10492_v31, %v1160_v25  ;;  %v1236_v52 = vadd.f32 %v10564_v2, %v1198_v47 }
  0x9f   : > { %v1200_v61 = vmul.f32 %v10492_v31, %v1161_v27  ;;  %v13769_v11 = vsub.f32 %v10368_v56, %v10475_v57  ;;  %v1567_v15 = vpack.c.bf16 %v1541_v41, %v1540_v1  ;;  %v1542_v49 = vld [vmem:[#allocation2 + $0x68] sm:$0xff]  ;;  %vm1266_vm4 = vcmp.ge.f32.partialorder %v1234_v55, 0.0 }
  0xa0   : > { %v1543_v28 = vld [vmem:[#allocation2 + $0x70] sm:$0xff]  ;;  %vm1267_vm5 = vcmp.ge.f32.partialorder %v1235_v23, 0.0  ;;  %v1298_v53 = vmul.f32 0.2, %v1234_v55  ;;  %v1299_v60 = vmul.f32 0.2, %v1235_v23  ;;  %v1237_v38 = vadd.f32 %v10564_v2, %v1199_v50 }
  0xa1   : > { %v1163_v44 = vmul.f32 %v10550_v0, %v13769_v11  ;;  %v1568_v30 = vpack.c.bf16 %v1543_v28, %v1542_v49  ;;  %vm1268_vm6 = vcmp.ge.f32.partialorder %v1236_v52, 0.0  ;;  %v1300_v5 = vmul.f32 0.2, %v1236_v52 }
  0xa2   : > { %v1330_v4 = vsel %vm1266_vm4, %v1234_v55, %v1298_v53  ;;  %v1201_v39 = vmul.f32 %v10492_v31, %v1162_v34  ;;  %v1238_v3 = vadd.f32 %v10564_v2, %v1200_v61  ;;  %v1544_v56 = vld [vmem:[#allocation2 + $0x78] sm:$0xff]  ;;  %v1545_v58 = vld [vmem:[#allocation2 + $0x80] sm:$0xff]  ;;  %v1331_v18 = vsel %vm1267_vm5, %v1235_v23, %v1299_v60 }
  0xa3   : > { %1369 = vst.msk [vmem:[#allocation2 + $0x98] sm:$0xff] %vm13529_vm1, %v1330_v4  ;;  %vm1269_vm7 = vcmp.ge.f32.partialorder %v1237_v38, 0.0  ;;  %v1301_v19 = vmul.f32 0.2, %v1237_v38  ;;  %v13770_v62 = vsub.f32 %v10376_v63, %v10475_v57  ;;  %v1569_v26 = vpack.c.bf16 %v1545_v58, %v1544_v56  ;;  %1370 = vst.msk [vmem:[#allocation2 + $0xa0] sm:$0xff] %vm13529_vm1, %v1331_v18 }
  0xa4   : > { %v1332_v29 = vsel %vm1268_vm6, %v1236_v52, %v1300_v5  ;;  %v1239_v40 = vadd.f32 %v10564_v2, %v1201_v39  ;;  %vm1270_vm8 = vcmp.ge.f32.partialorder %v1238_v3, 0.0  ;;  %v1546_v32 = vld [vmem:[#allocation2 + $0x88] sm:$0xff]  ;;  %v1302_v37 = vmul.f32 0.2, %v1238_v3 }
  0xa5   : > { %v1164_v24 = vmul.f32 %v10550_v0, %v13770_v62  ;;  %v1333_v35 = vsel %vm1269_vm7, %v1237_v38, %v1301_v19  ;;  %1371 = vst.msk [vmem:[#allocation2 + $0xa8] sm:$0xff] %vm13529_vm1, %v1332_v29  ;;  %v1202_v6 = vmul.f32 %v10492_v31, %v1163_v44  ;;  %8702 = vmatmul.mubr.msk.bf16.gmra.mrb[8].mxu0 %vm13529_vm1, %v1567_v15  ;;  %v1547_v63 = vld [vmem:[#allocation2 + $0x90] sm:$0xff] }
  0xa6   : > { %1372 = vst.msk [vmem:[#allocation2 + $0xb0] sm:$0xff] %vm13529_vm1, %v1333_v35  ;;  %vm1271_vm9 = vcmp.ge.f32.partialorder %v1239_v40, 0.0  ;;  %v1303_v13 = vmul.f32 0.2, %v1239_v40  ;;  %v13771_v42 = vsub.f32 %v10384_v12, %v10475_v57  ;;  %v13772_v48 = vsub.f32 %v10392_v22, %v10475_v57  ;;  %8705 = vmatprep.mubr.msk.bf16.mxu0 %vm13529_vm1, %v1568_v30 }
  0xa7   : > { %v1203_v7 = vmul.f32 %v10492_v31, %v1164_v24  ;;  %v1570_v54 = vpack.c.bf16 %v1547_v63, %v1546_v32  ;;  %v1334_v9 = vsel %vm1270_vm8, %v1238_v3, %v1302_v37  ;;  %v1240_v45 = vadd.f32 %v10564_v2, %v1202_v6 }
  0xa8   : > { %v1165_v17 = vmul.f32 %v10550_v0, %v13771_v42  ;;  %v1166_v20 = vmul.f32 %v10550_v0, %v13772_v48  ;;  %v1335_v46 = vsel %vm1271_vm9, %v1239_v40, %v1303_v13  ;;  %1373 = vst.msk [vmem:[#allocation2 + $0xb8] sm:$0xff] %vm13529_vm1, %v1334_v9  ;;  %v13773_v22 = vsub.f32 %v10400_v33, %v10475_v57 }
  0xa9   : > { %v1241_v16 = vadd.f32 %v10564_v2, %v1203_v7  ;;  %1374 = vst.msk [vmem:[#allocation2 + $0xc0] sm:$0xff] %vm13529_vm1, %v1335_v46  ;;  %vm1272_vm10 = vcmp.ge.f32.partialorder %v1240_v45, 0.0  ;;  %v1304_v27 = vmul.f32 0.2, %v1240_v45  ;;  %v13774_v23 = vsub.f32 %v10408_v43, %v10475_v57 }
  0xaa   : > { %v1204_v12 = vmul.f32 %v10492_v31, %v1165_v17  ;;  %v1205_v25 = vmul.f32 %v10492_v31, %v1166_v20  ;;  %v1167_v47 = vmul.f32 %v10550_v0, %v13773_v22  ;;  %v13775_v52 = vsub.f32 %v10416_v51, %v10475_v57  ;;  %v1548_v53 = vld [vmem:[#allocation2 + $0x98] sm:$0xff] }
  0xab   : > { %vm1273_vm11 = vcmp.ge.f32.partialorder %v1241_v16, 0.0  ;;  %v1305_v1 = vmul.f32 0.2, %v1241_v16  ;;  %v1168_v34 = vmul.f32 %v10550_v0, %v13774_v23  ;;  %v1336_v33 = vsel %vm1272_vm10, %v1240_v45, %v1304_v27 }
  0xac   : > { %v1242_v8 = vadd.f32 %v10564_v2, %v1204_v12  ;;  %v1243_v55 = vadd.f32 %v10564_v2, %v1205_v25  ;;  %v1206_v41 = vmul.f32 %v10492_v31, %v1167_v47  ;;  %v1169_v61 = vmul.f32 %v10550_v0, %v13775_v52  ;;  %1375 = vst.msk [vmem:[#allocation2 + $0xc8] sm:$0xff] %vm13529_vm1, %v1336_v33  ;;  %v1550_v39 = vld [vmem:[#allocation2 + $0xa8] sm:$0xff] }
  0xad   : > { %v1337_v50 = vsel %vm1273_vm11, %v1241_v16, %v1305_v1  ;;  %v13776_v11 = vsub.f32 %v10424_v59, %v10475_v57  ;;  %v1207_v49 = vmul.f32 %v10492_v31, %v1168_v34  ;;  %8706 = vmatmul.mubr.msk.bf16.gmra.mrb[12].mxu0 %vm13529_vm1, %v1569_v26  ;;  %v1549_v59 = vld [vmem:[#allocation2 + $0xa0] sm:$0xff]  ;;  %v1551_v3 = vld [vmem:[#allocation2 + $0xb0] sm:$0xff]  ;;  %v484_v9 = vand.u32 15, %v10483_v14 }
  0xae   : > { %1376 = vst.msk [vmem:[#allocation2 + $0xd0] sm:$0xff] %vm13529_vm1, %v1337_v50  ;;  %vm1274_vm12 = vcmp.ge.f32.partialorder %v1242_v8, 0.0  ;;  %vm1275_vm13 = vcmp.ge.f32.partialorder %v1243_v55, 0.0  ;;  %v1306_v43 = vmul.f32 0.2, %v1242_v8  ;;  %v1244_v28 = vadd.f32 %v10564_v2, %v1206_v41  ;;  %8709 = vmatprep.mubr.msk.bf16.mxu0 %vm13529_vm1, %v1570_v54  ;;  %v1385_v25 = vld [vmem:[#allocation2 + $0x7] sm:$0xff] }
  0xaf   : > { %v1170_v44 = vmul.f32 %v10550_v0, %v13776_v11  ;;  %v1307_v15 = vmul.f32 0.2, %v1243_v55  ;;  %v1208_v51 = vmul.f32 %v10492_v31, %v1169_v61  ;;  %v1245_v4 = vadd.f32 %v10564_v2, %v1207_v49  ;;  %v1552_v37 = vld [vmem:[#allocation2 + $0xb8] sm:$0xff]  ;;  %v1386_v1 = vld [vmem:[#allocation2 + $0xf] sm:$0xff] }
  0xb0   : > { %v1338_v30 = vsel %vm1274_vm12, %v1242_v8, %v1306_v43  ;;  %vm1276_vm14 = vcmp.ge.f32.partialorder %v1244_v28, 0.0  ;;  %v1308_v5 = vmul.f32 0.2, %v1244_v28  ;;  %v1571_v18 = vpack.c.bf16 %v1549_v59, %v1548_v53  ;;  %v1553_v6 = vld [vmem:[#allocation2 + $0xc0] sm:$0xff]  ;;  %v1387_v50 = vld [vmem:[#allocation2 + $0x17] sm:$0xff] }
  0xb1   : > { %v1209_v60 = vmul.f32 %v10492_v31, %v1170_v44  ;;  %v1339_v38 = vsel %vm1275_vm13, %v1243_v55, %v1307_v15  ;;  %1377 = vst.msk [vmem:[#allocation2 + $0xd8] sm:$0xff] %vm13529_vm1, %v1338_v30  ;;  %v1246_v56 = vadd.f32 %v10564_v2, %v1208_v51  ;;  %vm1277_vm15 = vcmp.ge.f32.partialorder %v1245_v4, 0.0  ;;  %v10811_v44 = vld [vmem:[#allocation2 + $0x27] sm:$0xff]  ;;  %v1388_v15 = vld [vmem:[#allocation2 + $0x1f] sm:$0xff] }
  0xb2   : > { %1378 = vst.msk [vmem:[#allocation2 + $0xe0] sm:$0xff] %vm13529_vm1, %v1339_v38  ;;  %v1309_v19 = vmul.f32 0.2, %v1245_v4  ;;  %v1340_v62 = vsel %vm1276_vm14, %v1244_v28, %v1308_v5  ;;  %v10765_v29 = vpack.c.bf16 %v1551_v3, %v1550_v39  ;;  %v10773_v13 = vpack.c.bf16 %v1553_v6, %v1552_v37  ;;  %v10819_v28 = vld [vmem:[#allocation2 + $0x2f] sm:$0xff] }
  0xb3   : > { %v1247_v58 = vadd.f32 %v10564_v2, %v1209_v60  ;;  %1379 = vst.msk [vmem:[#allocation2 + $0xe8] sm:$0xff] %vm13529_vm1, %v1340_v62  ;;  %vm1278_vm2 = vcmp.ge.f32.partialorder %v1246_v56, 0.0  ;;  %v1310_v24 = vmul.f32 0.2, %v1246_v56  ;;  %v1554_v7 = vld [vmem:[#allocation2 + $0xc8] sm:$0xff]  ;;  %v450_v46 = vadd.s32 16, %v10483_v14 }
  0xb4   : > { %v1341_v40 = vsel %vm1277_vm15, %v1245_v4, %v1309_v19  ;;  %vm10787_vm4 = vcmp.ge.s32.totalorder %v484_v9, 1  ;;  %v13780_v12 = vmov 0  ;;  %v452_v22 = vadd.s32 32, %v10483_v14  ;;  %v10845_v62 = vld [vmem:[#allocation2 + $0x47] sm:$0xff] }
  0xb5   : > { %vm1279_vm3 = vcmp.ge.f32.partialorder %v1247_v58, 0.0  ;;  %v1311_v26 = vmul.f32 0.2, %v1247_v58  ;;  %1380 = vst.msk [vmem:[#allocation2 + $0xf0] sm:$0xff] %vm13529_vm1, %v1341_v40  ;;  %v1342_v32 = vsel %vm1278_vm2, %v1246_v56, %v1310_v24  ;;  %8710 = vmatmul.mubr.msk.bf16.gmra.mrb[16].mxu0 %vm13529_vm1, %v1571_v18  ;;  %v1555_v63 = vld [vmem:[#allocation2 + $0xd0] sm:$0xff]  ;;  %v13781_v12 = vsel %vm10787_vm4, 4294967295, %v13780_v12 }
  0xb6   : > { %1381 = vst.msk [vmem:[#allocation2 + $0xf8] sm:$0xff] %vm13529_vm1, %v1342_v32  ;;  %8713 = vmatprep.mubr.msk.bf16.mxu0 %vm13529_vm1, %v10765_v29  ;;  %v10775_v42 = vpack.c.bf16 %v1555_v63, %v1554_v7  ;;  %13782 = vst [vmem:[#allocation11_spill] sm:$0xff] %v13781_v12  ;;  %v1481_v8 = vsel %vm10787_vm4, %v1385_v25, 0.0  ;;  %v498_v55 = vand.u32 15, %v450_v46  ;;  %v512_v23 = vand.u32 15, %v452_v22  ;;  %v10837_v56 = vld [vmem:[#allocation2 + $0x37] sm:$0xff] }
  0xb7   : > { %v1343_v35 = vsel %vm1279_vm3, %v1247_v58, %v1311_v26  ;;  %v1513_v41 = vpack.c.bf16 %v1386_v1, %v1481_v8  ;;  %v454_v52 = vadd.s32 48, %v10483_v14  ;;  %v1137_v61 = vsub.f32 %v10432_v10, %v10475_v57  ;;  %v10855_v40 = vld [vmem:[#allocation2 + $0x3f] sm:$0xff]  ;;  %v10881_v25 = vld [vmem:[#allocation2 + $0x67] sm:$0xff]  ;;  %v10891_v1 = vld [vmem:[#allocation2 + $0x6f] sm:$0xff] }
  0xb8   : > { %1382 = vst.msk [vmem:[#allocation2 + $0x100] sm:$0xff] %vm13529_vm1, %v1343_v35  ;;  %13777 = vst [vmem:[#allocation8_spill] sm:$0xff] %v10775_v42  ;;  %v1556_v17 = vld [vmem:[#allocation2 + $0xd8] sm:$0xff]  ;;  %vm10800_vm5 = vcmp.ge.s32.totalorder %v498_v55, 1  ;;  %vm10807_vm6 = vcmp.ge.s32.totalorder %v512_v23, 1  ;;  %v456_v43 = vadd.s32 64, %v10483_v14 }
  0xb9   : > { %v1557_v48 = vld [vmem:[#allocation2 + $0xe0] sm:$0xff]  ;;  %v1483_v49 = vsel %vm10800_vm5, %v1387_v50, 0.0  ;;  %v1485_v10 = vsel %vm10807_vm6, %v10811_v44, 0.0  ;;  %v526_v51 = vand.u32 15, %v454_v52  ;;  %v1171_v53 = vmul.f32 %v10550_v0, %v1137_v61  ;;  %v10860_v35 = vld [vmem:[#allocation2 + $0x4f] sm:$0xff]  ;;  %v10902_v61 = vld [vmem:[#allocation2 + $0x77] sm:$0xff] }
  0xba   : > { %v1558_v20 = vld [vmem:[#allocation2 + $0xe8] sm:$0xff]  ;;  %v10782_v45 = vpack.c.bf16 %v1557_v48, %v1556_v17  ;;  %v2427_v59 = vsel %vm10787_vm4, %v1387_v50, 0.0  ;;  %v540_v30 = vand.u32 15, %v456_v43  ;;  %v1514_v38 = vpack.c.bf16 %v1388_v15, %v1483_v49 }
  0xbb   : > { %v10827_v60 = vpack.c.bf16 %v1388_v15, %v2427_v59  ;;  %v1210_v4 = vmul.f32 %v10492_v31, %v1171_v53  ;;  %v1515_v5 = vpack.c.bf16 %v10819_v28, %v1485_v10  ;;  %v2200_v39 = vsel %vm13528_vm0, %v10641_v36, 0  ;;  %v10851_v36 = vld [vmem:[%s13519_s5 + $0x6] sm:$0x3]  ;;  %v10919_v59 = vld [vmem:[#allocation2 + $0x8f] sm:$0xff] }
  0xbc   : > { %v1559_v54 = vld [vmem:[#allocation2 + $0xf0] sm:$0xff]  ;;  %13778 = vst [vmem:[#allocation9_spill] sm:$0xff] %v10782_v45  ;;  %vm10833_vm7 = vcmp.ge.s32.totalorder %v526_v51, 1  ;;  %v458_v58 = vadd.s32 80, %v10483_v14  ;;  %vm10841_vm8 = vcmp.ge.s32.totalorder %v540_v30, 1  ;;  %v13790_v19 = vmov 0 }
  0xbd   : > { %8714 = vmatmul.mubr.msk.bf16.gmra.mrb[20].mxu0 %vm13529_vm1, %v10773_v13  ;;  %v10784_v16 = vpack.c.bf16 %v1559_v54, %v1558_v20  ;;  %v1560_v47 = vld [vmem:[#allocation2 + $0xf8] sm:$0xff]  ;;  %v1248_v18 = vadd.f32 %v10564_v2, %v1210_v4  ;;  %v13791_v19 = vsel %vm10841_vm8, 4294967295, %v13790_v19  ;;  %v460_v24 = vadd.s32 96, %v10483_v14  ;;  %v10909_v49 = vld [vmem:[#allocation2 + $0x87] sm:$0xff] }
  0xbe   : > { %8717 = vmatprep.mubr.msk.bf16.mxu0 %vm13529_vm1, %v10775_v42  ;;  %13792 = vst [vmem:[#allocation13_spill] sm:$0xff] %v13791_v19  ;;  %v1487_v32 = vsel %vm10833_vm7, %v10837_v56, 0.0  ;;  %v1489_v37 = vsel %vm10841_vm8, %v10845_v62, 0.0  ;;  %v554_v6 = vand.u32 15, %v458_v58  ;;  %v10874_v54 = vld [vmem:[#allocation2 + $0x57] sm:$0xff]  ;;  %v462_v9 = vadd.s32 112, %v10483_v14 }
  0xbf   : > { %13779 = vst [vmem:[#allocation10_spill] sm:$0xff] %v10784_v16  ;;  %v1561_v27 = vld [vmem:[#allocation2 + $0x100] sm:$0xff]  ;;  %vm1280_vm9 = vcmp.ge.f32.partialorder %v1248_v18, 0.0  ;;  %v1312_v26 = vmul.f32 0.2, %v1248_v18  ;;  %v568_v63 = vand.u32 15, %v460_v24  ;;  %v1516_v17 = vpack.c.bf16 %v10855_v40, %v1487_v32 }
  0xc0   : > { %v10798_v34 = vpack.c.bf16 %v1561_v27, %v1560_v47  ;;  %v1517_v48 = vpack.c.bf16 %v10860_v35, %v1489_v37  ;;  %vm10870_vm10 = vcmp.ge.s32.totalorder %v554_v6, 1  ;;  %v13795_v46 = vmov 0  ;;  %v10886_v47 = vld [vmem:[#allocation2 + $0x5f] sm:$0xff]  ;;  %v10937_v32 = vld [vmem:[#allocation2 + $0xa7] sm:$0xff]  ;;  %v11049_v42 = vld [vmem:[#allocation2 + $0x31] sm:$0xff] }
  0xc1   : > { %v1344_v7 = vsel %vm1280_vm9, %v1248_v18, %v1312_v26  ;;  %vm10877_vm11 = vcmp.ge.s32.totalorder %v568_v63, 1  ;;  %v464_v22 = vadd.s32 128, %v10483_v14  ;;  %v1491_v27 = vsel %vm10870_vm10, %v10874_v54, 0.0  ;;  %v10914_v51 = vld [vmem:[#allocation2 + $0x7f] sm:$0xff]  ;;  %v10930_v18 = vld [vmem:[#allocation2 + $0x97] sm:$0xff]  ;;  %v10947_v63 = vld [vmem:[#allocation2 + $0xaf] sm:$0xff] }
  0xc2   : > { %13783 = vst [vmem:[#allocation12_spill] sm:$0xff] %v10798_v34  ;;  %1383 = vst.msk [vmem:[#allocation2 + $0x108] sm:$0xff] %vm13529_vm1, %v1344_v7  ;;  %v13796_v46 = vsel %vm10877_vm11, 4294967295, %v13795_v46  ;;  %v1493_v8 = vsel %vm10877_vm11, %v10881_v25, 0.0  ;;  %v582_v55 = vand.u32 15, %v462_v9  ;;  %v13797_v52 = vmov 0 }
  0xc3   : > { %v596_v23 = vand.u32 15, %v464_v22  ;;  %v1519_v50 = vpack.c.bf16 %v10891_v1, %v1493_v8  ;;  %v466_v43 = vadd.s32 144, %v10483_v14  ;;  %v13800_v15 = vmov 0  ;;  %v10942_v6 = vld [vmem:[#allocation2 + $0x9f] sm:$0xff]  ;;  %13839 = vst [vmem:[#allocation29_spill] sm:$0xff] %v11049_v42 }
  0xc4   : > { %vm10898_vm12 = vcmp.ge.s32.totalorder %v582_v55, 1  ;;  %v468_v10 = vadd.s32 160, %v10483_v14  ;;  %v13803_v58 = vmov 0  ;;  %v470_v24 = vadd.s32 176, %v10483_v14  ;;  %v10958_v55 = vld [vmem:[#allocation2 + $0xb7] sm:$0xff] }
  0xc5   : > { %8718 = vmatmul.mubr.msk.bf16.gmra.mrb[24].mxu0 %vm13529_vm1, %v10782_v45  ;;  %v13798_v52 = vsel %vm10898_vm12, 4294967295, %v13797_v52  ;;  %vm10905_vm13 = vcmp.ge.s32.totalorder %v596_v23, 1  ;;  %v1495_v53 = vsel %vm10898_vm12, %v10902_v61, 0.0  ;;  %v13806_v26 = vmov 0 }
  0xc6   : > { %8721 = vmatprep.mubr.msk.bf16.mxu0 %vm13529_vm1, %v10784_v16  ;;  %13799 = vst [vmem:[#allocation14_spill] sm:$0xff] %v13798_v52  ;;  %v13801_v15 = vsel %vm10905_vm13, 4294967295, %v13800_v15  ;;  %v1497_v30 = vsel %vm10905_vm13, %v10909_v49, 0.0  ;;  %v624_v4 = vand.u32 15, %v468_v10  ;;  %v472_v37 = vadd.s32 192, %v10483_v14  ;;  %v10970_v10 = vld [vmem:[#allocation2 + $0xbf] sm:$0xff] }
  0xc7   : > { %13802 = vst [vmem:[#allocation15_spill] sm:$0xff] %v13801_v15  ;;  %v13809_v8 = vmov 0  ;;  %v474_v23 = vadd.s32 208, %v10483_v14  ;;  %v13832_v16 = vmov 0  ;;  %v13836_v45 = vmov 0 }
  0xc8   : > { %vm10933_vm15 = vcmp.ge.s32.totalorder %v624_v4, 1  ;;  %v652_v9 = vand.u32 15, %v472_v37 }
  0xc9   : > { %v13807_v26 = vsel %vm10933_vm15, 4294967295, %v13806_v26  ;;  %v666_v4 = vand.u32 15, %v474_v23 }
  0xca   : > { %13808 = vst [vmem:[#allocation17_spill] sm:$0xff] %v13807_v26  ;;  %vm10961_vm3 = vcmp.ge.s32.totalorder %v652_v9, 1  ;;  %v478_v9 = vadd.s32 240, %v10483_v14 }
  0xcb   : > { %vm10985_vm9 = vcmp.ge.s32.totalorder %v666_v4, 1 }
  0xcc   : > { %v694_v4 = vand.u32 15, %v478_v9  ;;  %v13826_v9 = vmov 0 }
  0xcd   : > { %8722 = vmatmul.mubr.msk.bf16.gmra.mrb[28].mxu0 %vm13529_vm1, %v10798_v34 }
  0xce   : > { %8727 = vmatprep.mubr.msk.bf16.mxu0 %vm13529_vm1, %v1513_v41  ;;  %v1518_v41 = vpack.c.bf16 %v10886_v47, %v1491_v27  ;;  %vm11015_vm4 = vcmp.ge.s32.totalorder %v694_v4, 1  ;;  %v2005_v4 = vld [vmem:[#allocation2 + $0x9] sm:$0xff] }
  0xd5   : > { %8728 = vmatmul.mubr.msk.bf16.vlgmr.msra.gmra.mrb[0].mxu0 %vm13529_vm1, %v1514_v38  ;;  %v610_v38 = vand.u32 15, %v466_v43  ;;  %v476_v43 = vadd.s32 224, %v10483_v14 }
  0xd6   : > { %8760 = vmatpush3.bf16.msra.mxu0 %v2200_v39  ;;  %8731 = vmatprep.mubr.msk.bf16.mxu0 %vm13529_vm1, %v1515_v5  ;;  %v1520_v5 = vpack.c.bf16 %v10914_v51, %v1495_v53  ;;  %v1521_v39 = vpack.c.bf16 %v10919_v59, %v1497_v30  ;;  %v10975_v30 = vld [vmem:[#allocation2 + $0xcf] sm:$0xff] }
  0xd7   : > { %9918 = vmatprep.subr.msk.bf16.mxu0 %vm13528_vm0, %v10851_v36  ;;  %vm10926_vm14 = vcmp.ge.s32.totalorder %v610_v38, 1 }
  0xd8   : > { %v13804_v58 = vsel %vm10926_vm14, 4294967295, %v13803_v58  ;;  %v1499_v7 = vsel %vm10926_vm14, %v10930_v18, 0.0 }
  0xd9   : > { %13805 = vst [vmem:[#allocation16_spill] sm:$0xff] %v13804_v58  ;;  %v1522_v22 = vpack.c.bf16 %v10942_v6, %v1499_v7 }
  0xdd   : > { %8732 = vmatmul.mubr.msk.bf16.gmra.mrb[4].mxu0 %vm13529_vm1, %v1516_v17  ;;  %v1501_v17 = vsel %vm10933_vm15, %v10937_v32, 0.0 }
  0xde   : > { %8735 = vmatprep.mubr.msk.bf16.mxu0 %vm13529_vm1, %v1517_v48  ;;  %v638_v48 = vand.u32 15, %v470_v24  ;;  %v1523_v27 = vpack.c.bf16 %v10947_v63, %v1501_v17  ;;  %v13815_v17 = vmov 0 }
  0xdf   : > { %v13816_v17 = vsel %vm10985_vm9, 4294967295, %v13815_v17 }
  0xe0   : > { %vm10954_vm2 = vcmp.ge.s32.totalorder %v638_v48, 1  ;;  %13817 = vst [vmem:[#allocation20_spill] sm:$0xff] %v13816_v17  ;;  %v10989_v48 = vld [vmem:[#allocation2 + $0xd7] sm:$0xff] }
  0xe1   : > { %v13810_v8 = vsel %vm10954_vm2, 4294967295, %v13809_v8  ;;  %v1503_v53 = vsel %vm10954_vm2, %v10958_v55, 0.0  ;;  %v1507_v23 = vsel %vm10985_vm9, %v10989_v48, 0.0  ;;  %vm13825_vm9 = vcmask 31744  }
  0xe2   : > { %13811 = vst [vmem:[#allocation18_spill] sm:$0xff] %v13810_v8  ;;  %v1524_v24 = vpack.c.bf16 %v10970_v10, %v1503_v53  ;;  %v11008_v53 = vld [vmem:[#allocation2 + $0xef] sm:$0xff] }
  0xe5   : > { %8736 = vmatmul.mubr.msk.bf16.gmra.mrb[8].mxu0 %vm13529_vm1, %v1518_v41  ;;  %v13812_v41 = vmov 0 }
  0xe6   : > { %8739 = vmatprep.mubr.msk.bf16.mxu0 %vm13529_vm1, %v1519_v50  ;;  %v13813_v41 = vsel %vm10961_vm3, 4294967295, %v13812_v41  ;;  %v10965_v50 = vld [vmem:[#allocation2 + $0xc7] sm:$0xff] }
  0xe7   : > { %13814 = vst [vmem:[#allocation19_spill] sm:$0xff] %v13813_v41  ;;  %v1505_v38 = vsel %vm10961_vm3, %v10965_v50, 0.0  ;;  %vm13829_vm3 = vmmov %vm13825_vm9 }
  0xe8   : > { %v1525_v37 = vpack.c.bf16 %v10975_v30, %v1505_v38 }
  0xed   : > { %8740 = vmatmul.mubr.msk.bf16.gmra.mrb[12].mxu0 %vm13529_vm1, %v1520_v5  ;;  %v680_v5 = vand.u32 15, %v476_v43 }
  0xee   : > { %8743 = vmatprep.mubr.msk.bf16.mxu0 %vm13529_vm1, %v1521_v39  ;;  %v1138_v39 = vsub.f32 %v10440_v21, %v10475_v57  ;;  %v449_v21 = vadd.s32 8, %v10483_v14 }
  0xef   : > { %vm10992_vm0 = vcmp.ge.s32.totalorder %v680_v5, 1 }
  0xf0   : > { %v1172_v7 = vmul.f32 %v10550_v0, %v1138_v39  ;;  %v11002_v0 = vld [vmem:[#allocation2 + $0xdf] sm:$0xff] }
  0xf1   : > { %v1526_v39 = vpack.c.bf16 %v11002_v0, %v1507_v23  ;;  %v453_v23 = vadd.s32 40, %v10483_v14 }
  0xf2   : > { %v1211_v57 = vmul.f32 %v10492_v31, %v1172_v7  ;;  %v491_v31 = vand.u32 15, %v449_v21  ;;  %v13821_v7 = vmov 0  ;;  %v2006_v21 = vld [vmem:[#allocation2 + $0x11] sm:$0xff] }
  0xf3   : > { %v13822_v7 = vsel %vm11015_vm4, 4294967295, %v13821_v7 }
  0xf4   : > { %v1249_v43 = vadd.f32 %v10564_v2, %v1211_v57  ;;  %13823 = vst [vmem:[#allocation22_spill] sm:$0xff] %v13822_v7  ;;  %v11019_v2 = vld [vmem:[#allocation2 + $0xf7] sm:$0xff]  ;;  %v451_v57 = vadd.s32 24, %v10483_v14 }
  0xf5   : > { %8744 = vmatmul.mubr.msk.bf16.gmra.mrb[16].mxu0 %vm13529_vm1, %v1522_v22  ;;  %v13818_v22 = vmov 0  ;;  %13824 = vst [vmem:[#allocation23_spill] sm:$0xff] %v11019_v2 }
  0xf6   : > { %8747 = vmatprep.mubr.msk.bf16.mxu0 %vm13529_vm1, %v1523_v27  ;;  %v13819_v22 = vsel %vm10992_vm0, 4294967295, %v13818_v22  ;;  %v10996_v27 = vld [vmem:[#allocation2 + $0xe7] sm:$0xff]  ;;  %v1313_v5 = vmul.f32 0.2, %v1249_v43 }
  0xf7   : > { %13820 = vst [vmem:[#allocation21_spill] sm:$0xff] %v13819_v22  ;;  %v1509_v38 = vsel %vm10992_vm0, %v10996_v27, 0.0  ;;  %vm11023_vm0 = vcmp.le.s32.totalorder %v491_v31, 14 }
  0xf8   : > { %v13827_v9 = vsel %vm11023_vm0, 4294967295, %v13826_v9  ;;  %v2102_v31 = vsel %vm11023_vm0, %v2006_v21, 0.0  ;;  %v11054_v21 = vld [vmem:[#allocation2 + $0x19] sm:$0xff] }
  0xf9   : > { %13828 = vst [vmem:[#allocation24_spill] sm:$0xff] %v13827_v9  ;;  %v2133_v34 = vpack.c.bf16 %v2102_v31, %v2005_v4  ;;  %13841 = vst [vmem:[#allocation30_spill] sm:$0xff] %v11054_v21  ;;  %v13844_v9 = vmov 0 }
  0xfd   : > { %8748 = vmatmul.mubr.msk.bf16.gmra.mrb[20].mxu0 %vm13529_vm1, %v1524_v24  ;;  %v1527_v24 = vpack.c.bf16 %v11008_v53, %v1509_v38  ;;  %v1511_v38 = vsel %vm11015_vm4, %v11019_v2, 0.0  ;;  %vm13856_vm4 = vcmask 1041408  }
  0xfe   : > { %8751 = vmatprep.mubr.msk.bf16.mxu0 %vm13529_vm1, %v1525_v37  ;;  %vm1281_vm1 = vcmp.ge.f32.partialorder %v1249_v43, 0.0 }
  0xff   : > { %v1345_v37 = vsel %vm1281_vm1, %v1249_v43, %v1313_v5  ;;  %vm13830_vm1 = vmmov %vm13829_vm3  ;;  %v11030_v43 = vld [vmem:[#allocation2 + $0xff] sm:$0xff]  ;;  %v505_v5 = vand.u32 15, %v451_v57  ;;  %v457_v57 = vadd.s32 72, %v10483_v14 }
 0x100   : > { %1384 = vst.msk [vmem:[#allocation2 + $0x110] sm:$0xff] %vm13825_vm9, %v1345_v37  ;;  %13831 = vst [vmem:[#allocation25_spill] sm:$0xff] %v11030_v43  ;;  %v519_v37 = vand.u32 15, %v453_v23  ;;  %v1528_v12 = vpack.c.bf16 %v11030_v43, %v1511_v38  ;;  %v11059_v38 = vld [vmem:[#allocation2 + $0x29] sm:$0xff] }
 0x101   : > { %vm11038_vm9 = vcmp.le.s32.totalorder %v505_v5, 14  ;;  %vm13840_vm0 = vmmov %vm13830_vm1  ;;  %13842 = vst [vmem:[#allocation31_spill] sm:$0xff] %v11059_v38  ;;  %v547_v5 = vand.u32 15, %v457_v57  ;;  %v461_v57 = vadd.s32 104, %v10483_v14 }
 0x102   : > { %v13833_v16 = vsel %vm11038_vm9, 4294967295, %v13832_v16 }
 0x103   : > { %13834 = vst [vmem:[#allocation26_spill] sm:$0xff] %v13833_v16  ;;  %v11072_v16 = vld [vmem:[#allocation2 + $0x41] sm:$0xff] }
 0x104   : > { %13847 = vst [vmem:[#allocation33_spill] sm:$0xff] %v11072_v16 }
 0x105   : > { %8752 = vmatmul.mubr.msk.bf16.gmra.mrb[24].mxu0 %vm13829_vm3, %v1526_v39  ;;  %v11042_v39 = vld [vmem:[#allocation2 + $0x21] sm:$0xff]  ;;  %vm11045_vm3 = vcmp.le.s32.totalorder %v519_v37, 14 }
 0x106   : > { %8755 = vmatprep.mubr.msk.bf16.mxu0 %vm13830_vm1, %v1527_v24  ;;  %13835 = vst [vmem:[#allocation27_spill] sm:$0xff] %v11042_v39  ;;  %v455_v24 = vadd.s32 56, %v10483_v14  ;;  %v13837_v45 = vsel %vm11045_vm3, 4294967295, %v13836_v45  ;;  %v2104_v23 = vsel %vm11038_vm9, %v11042_v39, 0.0  ;;  %v2106_v4 = vsel %vm11045_vm3, %v11049_v42, 0.0 }
 0x107   : > { %13838 = vst [vmem:[#allocation28_spill] sm:$0xff] %v13837_v45  ;;  %v2134_v37 = vpack.c.bf16 %v2104_v23, %v11054_v21  ;;  %v459_v39 = vadd.s32 88, %v10483_v14  ;;  %vm11075_vm9 = vcmp.le.s32.totalorder %v547_v5, 14  ;;  %v13848_v45 = vmov 0  ;;  %v11089_v23 = vld [vmem:[#allocation2 + $0x39] sm:$0xff]  ;;  %v11135_v21 = vld [vmem:[#allocation2 + $0x81] sm:$0xff] }
 0x108   : > { %v533_v31 = vand.u32 15, %v455_v24  ;;  %v13849_v45 = vsel %vm11075_vm9, 4294967295, %v13848_v45  ;;  %v11079_v24 = vld [vmem:[#allocation2 + $0x51] sm:$0xff]  ;;  %13854 = vst [vmem:[#allocation36_spill] sm:$0xff] %v11089_v23  ;;  %v13857_v42 = vmov 0  ;;  %13872 = vst [vmem:[#allocation45_spill] sm:$0xff] %v11135_v21 }
 0x109   : > { %13850 = vst [vmem:[#allocation34_spill] sm:$0xff] %v13849_v45  ;;  %13851 = vst [vmem:[#allocation35_spill] sm:$0xff] %v11079_v24  ;;  %v2110_v5 = vsel %vm11075_vm9, %v11079_v24, 0.0  ;;  %v13861_v45 = vmov 0 }
 0x10d   : > { %8756 = vmatmul.mubr.msk.bf16.gmra.mrb[28].mxu0 %vm13830_vm1, %v1528_v12  ;;  %v2135_v12 = vpack.c.bf16 %v2106_v4, %v11059_v38  ;;  %vm11068_vm1 = vcmp.le.s32.totalorder %v533_v31, 14  ;;  %v11094_v31 = vld [vmem:[#allocation2 + $0x49] sm:$0xff]  ;;  %v561_v38 = vand.u32 15, %v459_v39  ;;  %v11114_v39 = vld [vmem:[#allocation2 + $0x71] sm:$0xff] }
 0x10e   : > { %8761 = vmatprep.mubr.msk.bf16.mxu0 %vm13840_vm0, %v2133_v34  ;;  %vm13843_vm0 = vcmask 1041408   ;;  %v13845_v9 = vsel %vm11068_vm1, 4294967295, %v13844_v9  ;;  %v2108_v4 = vsel %vm11068_vm1, %v11072_v16, 0.0  ;;  %13855 = vst [vmem:[#allocation37_spill] sm:$0xff] %v11094_v31  ;;  %v463_v16 = vadd.s32 120, %v10483_v14  ;;  %13864 = vst [vmem:[#allocation41_spill] sm:$0xff] %v11114_v39 }
 0x10f   : > { %v2526_v34 = vsel %vm13843_vm0, %v10851_v36, 0  ;;  %13846 = vst [vmem:[#allocation32_spill] sm:$0xff] %v13845_v9  ;;  %v11085_v36 = vld [vmem:[%s13519_s5 + $0x8] sm:$0x3]  ;;  %vm13852_vm0 = vcmask 31744  }
 0x110   : > { %vm13853_vm3 = vmmov %vm13852_vm0  ;;  %v11107_v9 = vld [vmem:[#allocation2 + $0x61] sm:$0xff] }
 0x111   : > { %13860 = vst [vmem:[#allocation39_spill] sm:$0xff] %v11107_v9  ;;  %v14384_v20 = vld [vmem:[#allocation28_spill] sm:$0xff] }
 0x115   : > { %8762 = vmatmul.mubr.msk.bf16.vlgmr.msra.gmra.mrb[0].mxu0 %vm13852_vm0, %v2134_v37  ;;  %v575_v37 = vand.u32 15, %v461_v57  ;;  %v465_v57 = vadd.s32 136, %v10483_v14 }
 0x116   : > { %8794 = vmatpush3.bf16.msra.mxu0 %v2526_v34  ;;  %8765 = vmatprep.mubr.msk.bf16.mxu0 %vm13853_vm3, %v2135_v12  ;;  %v2136_v34 = vpack.c.bf16 %v2108_v4, %v11089_v23  ;;  %v2137_v12 = vpack.c.bf16 %v2110_v5, %v11094_v31  ;;  %vm11103_vm3 = vcmp.le.s32.totalorder %v561_v38, 14  ;;  %v11119_v38 = vld [vmem:[#allocation2 + $0x59] sm:$0xff]  ;;  %v11124_v5 = vld [vmem:[#allocation2 + $0x69] sm:$0xff]  ;;  %v589_v31 = vand.u32 15, %v463_v16 }
 0x117   : > { %9919 = vmatprep.subr.msk.bf16.mxu0 %vm13856_vm4, %v11085_v36  ;;  %v13858_v42 = vsel %vm11103_vm3, 4294967295, %v13857_v42  ;;  %vm11110_vm0 = vcmp.le.s32.totalorder %v575_v37, 14  ;;  %vm13865_vm4 = vcmask 31744   ;;  %13867 = vst [vmem:[#allocation42_spill] sm:$0xff] %v11119_v38  ;;  %v2112_v4 = vsel %vm11103_vm3, %v11107_v9, 0.0  ;;  %13868 = vst [vmem:[#allocation43_spill] sm:$0xff] %v11124_v5 }
 0x118   : > { %13859 = vst [vmem:[#allocation38_spill] sm:$0xff] %v13858_v42  ;;  %v13862_v45 = vsel %vm11110_vm0, 4294967295, %v13861_v45  ;;  %vm13866_vm9 = vmmov %vm13865_vm4  ;;  %v2114_v37 = vsel %vm11110_vm0, %v11114_v39, 0.0  ;;  %v603_v24 = vand.u32 15, %v465_v57  ;;  %v2138_v23 = vpack.c.bf16 %v2112_v4, %v11119_v38  ;;  %v11152_v4 = vld [vmem:[#allocation2 + $0x89] sm:$0xff]  ;;  %v11163_v38 = vld [vmem:[#allocation2 + $0xa1] sm:$0xff] }
 0x119   : > { %13863 = vst [vmem:[#allocation40_spill] sm:$0xff] %v13862_v45  ;;  %v467_v42 = vadd.s32 152, %v10483_v14  ;;  %v13873_v9 = vmov 0  ;;  %v11142_v45 = vld [vmem:[#allocation2 + $0x91] sm:$0xff]  ;;  %v469_v16 = vadd.s32 168, %v10483_v14  ;;  %vm13877_vm0 = vcmask 31744  }
 0x11a   : > { %13876 = vst [vmem:[#allocation47_spill] sm:$0xff] %v11142_v45  ;;  %vm13878_vm3 = vmmov %vm13877_vm0 }
 0x11b   : > { %13880 = vst [vmem:[#allocation49_spill] sm:$0xff] %v11152_v4  ;;  %13884 = vst [vmem:[#allocation51_spill] sm:$0xff] %v11163_v38 }
 0x11d   : > { %8766 = vmatmul.mubr.msk.bf16.gmra.mrb[4].mxu0 %vm13865_vm4, %v2136_v34  ;;  %v2139_v34 = vpack.c.bf16 %v2114_v37, %v11124_v5  ;;  %vm11131_vm4 = vcmp.le.s32.totalorder %v589_v31, 14  ;;  %v11147_v31 = vld [vmem:[#allocation2 + $0x79] sm:$0xff]  ;;  %v617_v37 = vand.u32 15, %v467_v42  ;;  %v631_v5 = vand.u32 15, %v469_v16 }
 0x11e   : > { %8769 = vmatprep.mubr.msk.bf16.mxu0 %vm13866_vm9, %v2137_v12  ;;  %v13869_v12 = vmov 0  ;;  %vm11138_vm9 = vcmp.le.s32.totalorder %v603_v24, 14  ;;  %13879 = vst [vmem:[#allocation48_spill] sm:$0xff] %v11147_v31  ;;  %v2116_v57 = vsel %vm11131_vm4, %v11135_v21, 0.0  ;;  %v13885_v21 = vmov 0  ;;  %v11175_v16 = vld [vmem:[#allocation2 + $0x99] sm:$0xff] }
 0x11f   : > { %v13870_v12 = vsel %vm11131_vm4, 4294967295, %v13869_v12  ;;  %v13874_v9 = vsel %vm11138_vm9, 4294967295, %v13873_v9  ;;  %v2118_v24 = vsel %vm11138_vm9, %v11142_v45, 0.0  ;;  %v2140_v39 = vpack.c.bf16 %v2116_v57, %v11147_v31  ;;  %13891 = vst [vmem:[#allocation54_spill] sm:$0xff] %v11175_v16  ;;  %v11191_v31 = vld [vmem:[#allocation2 + $0xc1] sm:$0xff] }
 0x120   : > { %13871 = vst [vmem:[#allocation44_spill] sm:$0xff] %v13870_v12  ;;  %13875 = vst [vmem:[#allocation46_spill] sm:$0xff] %v13874_v9  ;;  %v471_v12 = vadd.s32 184, %v10483_v14  ;;  %v11170_v9 = vld [vmem:[#allocation2 + $0xb1] sm:$0xff]  ;;  %v473_v42 = vadd.s32 200, %v10483_v14  ;;  %vm13889_vm9 = vcmask 31744  }
 0x121   : > { %13888 = vst [vmem:[#allocation53_spill] sm:$0xff] %v11170_v9  ;;  %vm13890_vm4 = vmmov %vm13889_vm9 }
 0x122   : > { %13896 = vst [vmem:[#allocation57_spill] sm:$0xff] %v11191_v31 }
 0x125   : > { %8770 = vmatmul.mubr.msk.bf16.gmra.mrb[8].mxu0 %vm13877_vm0, %v2138_v23  ;;  %v2141_v23 = vpack.c.bf16 %v2118_v24, %v11152_v4  ;;  %vm11159_vm0 = vcmp.le.s32.totalorder %v617_v37, 14  ;;  %v11180_v24 = vld [vmem:[#allocation2 + $0xa9] sm:$0xff]  ;;  %v645_v37 = vand.u32 15, %v471_v12  ;;  %v659_v4 = vand.u32 15, %v473_v42  ;;  %v11203_v42 = vld [vmem:[#allocation2 + $0xb9] sm:$0xff] }
 0x126   : > { %8773 = vmatprep.mubr.msk.bf16.mxu0 %vm13878_vm3, %v2139_v34  ;;  %v13881_v34 = vmov 0  ;;  %vm11166_vm3 = vcmp.le.s32.totalorder %v631_v5, 14  ;;  %v2120_v57 = vsel %vm11159_vm0, %v11163_v38, 0.0  ;;  %13892 = vst [vmem:[#allocation55_spill] sm:$0xff] %v11180_v24  ;;  %v13897_v38 = vmov 0 }
 0x127   : > { %v13882_v34 = vsel %vm11159_vm0, 4294967295, %v13881_v34  ;;  %v13886_v21 = vsel %vm11166_vm3, 4294967295, %v13885_v21  ;;  %v2122_v5 = vsel %vm11166_vm3, %v11170_v9, 0.0  ;;  %v2142_v45 = vpack.c.bf16 %v2120_v57, %v11175_v16  ;;  %v11219_v16 = vld [vmem:[#allocation2 + $0xe1] sm:$0xff] }
 0x128   : > { %13883 = vst [vmem:[#allocation50_spill] sm:$0xff] %v13882_v34  ;;  %13887 = vst [vmem:[#allocation52_spill] sm:$0xff] %v13886_v21  ;;  %v475_v34 = vadd.s32 216, %v10483_v14  ;;  %v11198_v21 = vld [vmem:[#allocation2 + $0xd1] sm:$0xff]  ;;  %v477_v12 = vadd.s32 232, %v10483_v14  ;;  %vm13900_vm3 = vcmask 31744  }
 0x129   : > { %vm13901_vm0 = vmmov %vm13900_vm3 }
 0x12d   : > { %8774 = vmatmul.mubr.msk.bf16.gmra.mrb[12].mxu0 %vm13889_vm9, %v2140_v39  ;;  %v2143_v39 = vpack.c.bf16 %v2122_v5, %v11180_v24  ;;  %vm11187_vm9 = vcmp.le.s32.totalorder %v645_v37, 14  ;;  %v11208_v5 = vld [vmem:[#allocation2 + $0xc9] sm:$0xff]  ;;  %v673_v37 = vand.u32 15, %v475_v34  ;;  %v687_v24 = vand.u32 15, %v477_v12  ;;  %v11230_v34 = vld [vmem:[#allocation2 + $0xd9] sm:$0xff] }
 0x12e   : > { %8777 = vmatprep.mubr.msk.bf16.mxu0 %vm13890_vm4, %v2141_v23  ;;  %v13893_v23 = vmov 0  ;;  %vm11194_vm4 = vcmp.le.s32.totalorder %v659_v4, 14  ;;  %v2124_v57 = vsel %vm11187_vm9, %v11191_v31, 0.0  ;;  %v13905_v31 = vmov 0 }
 0x12f   : > { %v13894_v23 = vsel %vm11187_vm9, 4294967295, %v13893_v23  ;;  %v13898_v38 = vsel %vm11194_vm4, 4294967295, %v13897_v38  ;;  %v2126_v4 = vsel %vm11194_vm4, %v11198_v21, 0.0  ;;  %v2144_v9 = vpack.c.bf16 %v2124_v57, %v11203_v42  ;;  %v11235_v57 = vld [vmem:[#allocation2 + $0xe9] sm:$0xff] }
 0x130   : > { %13895 = vst [vmem:[#allocation56_spill] sm:$0xff] %v13894_v23  ;;  %13899 = vst [vmem:[#allocation58_spill] sm:$0xff] %v13898_v38  ;;  %v479_v23 = vadd.s32 248, %v10483_v14  ;;  %v11226_v38 = vld [vmem:[#allocation2 + $0xf1] sm:$0xff]  ;;  %vm13908_vm4 = vcmask 31744  }
 0x131   : > { %vm13909_vm9 = vmmov %vm13908_vm4 }
 0x135   : > { %8778 = vmatmul.mubr.msk.bf16.gmra.mrb[16].mxu0 %vm13900_vm3, %v2142_v45  ;;  %v2145_v45 = vpack.c.bf16 %v2126_v4, %v11208_v5  ;;  %vm11215_vm3 = vcmp.le.s32.totalorder %v673_v37, 14  ;;  %v701_v4 = vand.u32 15, %v479_v23 }
 0x136   : > { %8781 = vmatprep.mubr.msk.bf16.mxu0 %vm13901_vm0, %v2143_v39  ;;  %v13902_v39 = vmov 0  ;;  %vm11222_vm0 = vcmp.le.s32.totalorder %v687_v24, 14  ;;  %v2128_v12 = vsel %vm11215_vm3, %v11219_v16, 0.0 }
 0x137   : > { %v13903_v39 = vsel %vm11215_vm3, 4294967295, %v13902_v39  ;;  %v13906_v31 = vsel %vm11222_vm0, 4294967295, %v13905_v31  ;;  %v2130_v24 = vsel %vm11222_vm0, %v11226_v38, 0.0  ;;  %v2146_v37 = vpack.c.bf16 %v2128_v12, %v11230_v34  ;;  %vm13913_vm3 = vmmov %vm13909_vm9 }
 0x138   : > { %13904 = vst [vmem:[#allocation59_spill] sm:$0xff] %v13903_v39  ;;  %13907 = vst [vmem:[#allocation60_spill] sm:$0xff] %v13906_v31  ;;  %v2147_v14 = vpack.c.bf16 %v2130_v24, %v11235_v57  ;;  %v11250_v39 = vld [vmem:[#allocation2 + $0xf9] sm:$0xff]  ;;  %v2429_v24 = vsel %vm10800_vm5, %v10811_v44, 0.0 }
 0x139   : > { %vm13914_vm0 = vmmov %vm13913_vm3 }
 0x13a   : > { %vm13915_vm1 = vmmov %vm13914_vm0 }
 0x13d   : > { %8782 = vmatmul.mubr.msk.bf16.gmra.mrb[20].mxu0 %vm13908_vm4, %v2144_v9  ;;  %vm11242_vm4 = vcmp.le.s32.totalorder %v701_v4, 14  ;;  %v13910_v9 = vmov 0  ;;  %v2460_v4 = vpack.c.bf16 %v10819_v28, %v2429_v24  ;;  %v2435_v24 = vsel %vm10841_vm8, %v10874_v54, 0.0 }
 0x13e   : > { %8785 = vmatprep.mubr.msk.bf16.mxu0 %vm13909_vm9, %v2145_v45  ;;  %v13911_v9 = vsel %vm11242_vm4, 4294967295, %v13910_v9  ;;  %v11246_v45 = vld [vmem:[#allocation2 + $0x101] sm:$0xff] }
 0x13f   : > { %13912 = vst [vmem:[#allocation61_spill] sm:$0xff] %v13911_v9  ;;  %v2132_v23 = vsel %vm11242_vm4, %v11246_v45, 0.0 }
 0x140   : > { %v2148_v12 = vpack.c.bf16 %v2132_v23, %v11250_v39 }
 0x145   : > { %8786 = vmatmul.mubr.msk.bf16.gmra.mrb[24].mxu0 %vm13909_vm9, %v2146_v37 }
 0x146   : > { %8789 = vmatprep.mubr.msk.bf16.mxu0 %vm13913_vm3, %v2147_v14  ;;  %v2431_v14 = vsel %vm10807_vm6, %v10837_v56, 0.0  ;;  %vm13916_vm3 = vcmask 1041408  }
 0x147   : > { %v2461_v37 = vpack.c.bf16 %v10855_v40, %v2431_v14  ;;  %v2820_v23 = vsel %vm13916_vm3, %v11085_v36, 0  ;;  %vm13918_vm9 = vmmov %vm13916_vm3  ;;  %v2463_v14 = vpack.c.bf16 %v10886_v47, %v2435_v24  ;;  %v2443_v24 = vsel %vm10905_vm13, %v10930_v18, 0.0 }
 0x148   : > { %vm13919_vm3 = vmmov %vm13914_vm0 }
 0x14d   : > { %8790 = vmatmul.mubr.msk.bf16.gmra.mrb[28].mxu0 %vm13914_vm0, %v2148_v12  ;;  %v8122_v12 = vld [vmem:[%s13519_s5 + $0xa] sm:$0x3] }
 0x14e   : > { %8795 = vmatprep.mubr.msk.bf16.mxu0 %vm13915_vm1, %v10827_v60  ;;  %vm13917_vm1 = vmmov %vm13914_vm0  ;;  %v2433_v60 = vsel %vm10833_vm7, %v10845_v62, 0.0 }
 0x14f   : > { %v2462_v36 = vpack.c.bf16 %v10860_v35, %v2433_v60  ;;  %v2441_v60 = vsel %vm10898_vm12, %v10909_v49, 0.0 }
 0x155   : > { %8796 = vmatmul.mubr.msk.bf16.vlgmr.msra.gmra.mrb[0].mxu0 %vm13917_vm1, %v2460_v4  ;;  %vm13920_vm1 = vmmov %vm13914_vm0  ;;  %v2437_v4 = vsel %vm10870_vm10, %v10881_v25, 0.0 }
 0x156   : > { %8828 = vmatpush3.bf16.msra.mxu0 %v2820_v23  ;;  %8799 = vmatprep.mubr.msk.bf16.mxu0 %vm13914_vm0, %v2461_v37  ;;  %v2439_v37 = vsel %vm10877_vm11, %v10902_v61, 0.0  ;;  %v2464_v23 = vpack.c.bf16 %v10891_v1, %v2437_v4  ;;  %v2447_v4 = vsel %vm10933_vm15, %v10958_v55, 0.0  ;;  %vm13927_vm15 = vmmov %vm13914_vm0 }
 0x157   : > { %9920 = vmatprep.subr.msk.bf16.mxu0 %vm13918_vm9, %v8122_v12  ;;  %v2465_v19 = vpack.c.bf16 %v10914_v51, %v2439_v37  ;;  %vm13921_vm9 = vmmov %vm13914_vm0 }
 0x15d   : > { %8800 = vmatmul.mubr.msk.bf16.gmra.mrb[4].mxu0 %vm13919_vm3, %v2462_v36  ;;  %v2466_v36 = vpack.c.bf16 %v10919_v59, %v2441_v60  ;;  %vm13922_vm3 = vmmov %vm13914_vm0  ;;  %v2449_v60 = vsel %vm10954_vm2, %v10965_v50, 0.0 }
 0x15e   : > { %8803 = vmatprep.mubr.msk.bf16.mxu0 %vm13920_vm1, %v2463_v14  ;;  %v2467_v14 = vpack.c.bf16 %v10942_v6, %v2443_v24  ;;  %vm13923_vm1 = vmmov %vm13914_vm0 }
 0x165   : > { %8804 = vmatmul.mubr.msk.bf16.gmra.mrb[8].mxu0 %vm13914_vm0, %v2464_v23  ;;  %v2469_v23 = vpack.c.bf16 %v10970_v10, %v2447_v4 }
 0x166   : > { %8807 = vmatprep.mubr.msk.bf16.mxu0 %vm13921_vm9, %v2465_v19  ;;  %v2445_v19 = vsel %vm10926_vm14, %v10937_v32, 0.0  ;;  %vm13924_vm9 = vmmov %vm13914_vm0 }
 0x167   : > { %v2468_v37 = vpack.c.bf16 %v10947_v63, %v2445_v19 }
 0x16d   : > { %8808 = vmatmul.mubr.msk.bf16.gmra.mrb[12].mxu0 %vm13922_vm3, %v2466_v36  ;;  %vm13925_vm3 = vnez %v13813_v41  ;;  %v2470_v36 = vpack.c.bf16 %v10975_v30, %v2449_v60  ;;  %v11333_v41 = vld [vmem:[#allocation2 + $0x107] sm:$0xff]  ;;  %v11337_v60 = vld [vmem:[#allocation2 + $0x10f] sm:$0xff] }
 0x16e   : > { %8811 = vmatprep.mubr.msk.bf16.mxu0 %vm13923_vm1, %v2467_v14  ;;  %v2451_v24 = vsel %vm13925_vm3, %v10989_v48, 0.0  ;;  %vm13926_vm1 = vmmov %vm13914_vm0  ;;  %13930 = vst [vmem:[#allocation62_spill] sm:$0xff] %v11333_v41 }
 0x16f   : > { %v2471_v14 = vpack.c.bf16 %v11002_v0, %v2451_v24  ;;  %vm13931_vm3 = vmmov %vm13926_vm1  ;;  %13933 = vst [vmem:[#allocation63_spill] sm:$0xff] %v11337_v60 }
 0x170   : > { %vm13932_vm2 = vmmov %vm13926_vm1 }
 0x175   : > { %8812 = vmatmul.mubr.msk.bf16.gmra.mrb[16].mxu0 %vm13914_vm0, %v2468_v37  ;;  %vm13928_vm0 = vnez %v13816_v17 }
 0x176   : > { %8815 = vmatprep.mubr.msk.bf16.mxu0 %vm13924_vm9, %v2469_v23  ;;  %v2453_v19 = vsel %vm13928_vm0, %v10996_v27, 0.0  ;;  %vm13929_vm9 = vnez %v13819_v22 }
 0x177   : > { %v2455_v4 = vsel %vm13929_vm9, %v11019_v2, 0.0  ;;  %v2472_v37 = vpack.c.bf16 %v11008_v53, %v2453_v19  ;;  %vm13935_vm9 = vmmov %vm13926_vm1  ;;  %v2723_v19 = vld [vmem:[#allocation2 + $0x28] sm:$0xff] }
 0x178   : > { %v2473_v23 = vpack.c.bf16 %v11030_v43, %v2455_v4  ;;  %v2724_v4 = vld [vmem:[#allocation2 + $0x30] sm:$0xff]  ;;  %v2726_v43 = vld [vmem:[#allocation2 + $0x40] sm:$0xff] }
 0x17d   : > { %8816 = vmatmul.mubr.msk.bf16.gmra.mrb[20].mxu0 %vm13926_vm1, %v2470_v36  ;;  %v2721_v36 = vld [vmem:[#allocation2 + $0x18] sm:$0xff] }
 0x17e   : > { %8819 = vmatprep.mubr.msk.bf16.mxu0 %vm13927_vm15, %v2471_v14  ;;  %vm13934_vm15 = vnez %v13822_v7  ;;  %v2722_v14 = vld [vmem:[#allocation2 + $0x20] sm:$0xff] }
 0x17f   : > { %v2457_v24 = vsel %vm13934_vm15, %v11333_v41, 0.0  ;;  %v2753_v17 = vpack.c.bf16 %v2722_v14, %v2721_v36  ;;  %v8139_v41 = vld [vmem:[%s13519_s5 + $0xc] sm:$0x3]  ;;  %v2730_v36 = vld [vmem:[#allocation2 + $0x60] sm:$0xff]  ;;  %v2732_v14 = vld [vmem:[#allocation2 + $0x70] sm:$0xff] }
 0x180   : > { %v2474_v22 = vpack.c.bf16 %v11337_v60, %v2457_v24  ;;  %v2729_v24 = vld [vmem:[#allocation2 + $0x58] sm:$0xff] }
 0x185   : > { %8820 = vmatmul.mubr.msk.bf16.gmra.mrb[24].mxu0 %vm13931_vm3, %v2472_v37  ;;  %v2725_v37 = vld [vmem:[#allocation2 + $0x38] sm:$0xff]  ;;  %vm13939_vm3 = vmmov %vm13926_vm1 }
 0x186   : > { %8823 = vmatprep.mubr.msk.bf16.mxu0 %vm13932_vm2, %v2473_v23  ;;  %v11345_v23 = vpack.c.bf16 %v2724_v4, %v2723_v19  ;;  %v11347_v2 = vpack.c.bf16 %v2726_v43, %v2725_v37  ;;  %vm13938_vm2 = vcmask 1041408   ;;  %v2733_v19 = vld [vmem:[#allocation2 + $0x78] sm:$0xff]  ;;  %v2734_v4 = vld [vmem:[#allocation2 + $0x80] sm:$0xff] }
 0x187   : > { %v3146_v7 = vsel %vm13938_vm2, %v8122_v12, 0  ;;  %v11360_v12 = vpack.c.bf16 %v2730_v36, %v2729_v24  ;;  %v2737_v24 = vld [vmem:[#allocation2 + $0x98] sm:$0xff]  ;;  %v2738_v36 = vld [vmem:[#allocation2 + $0xa0] sm:$0xff] }
 0x188   : > { %13936 = vst [vmem:[#allocation64_spill] sm:$0xff] %v11345_v23  ;;  %13937 = vst [vmem:[#allocation65_spill] sm:$0xff] %v11347_v2 }
 0x189   : > { %13943 = vst [vmem:[#allocation67_spill] sm:$0xff] %v11360_v12 }
 0x18d   : > { %8824 = vmatmul.mubr.msk.bf16.gmra.mrb[28].mxu0 %vm13926_vm1, %v2474_v22  ;;  %v2728_v22 = vld [vmem:[#allocation2 + $0x50] sm:$0xff] }
 0x18e   : > { %8829 = vmatprep.mubr.msk.bf16.mxu0 %vm13935_vm9, %v2753_v17  ;;  %vm13940_vm9 = vmmov %vm13926_vm1  ;;  %v2727_v17 = vld [vmem:[#allocation2 + $0x48] sm:$0xff] }
 0x18f   : > { %vm13941_vm1 = vmmov %vm13938_vm2  ;;  %v11358_v43 = vpack.c.bf16 %v2728_v22, %v2727_v17  ;;  %v2735_v17 = vld [vmem:[#allocation2 + $0x88] sm:$0xff]  ;;  %v2736_v22 = vld [vmem:[#allocation2 + $0x90] sm:$0xff] }
 0x190   : > { %vm13944_vm2 = vmmov %vm13939_vm3 }
 0x191   : > { %13942 = vst [vmem:[#allocation66_spill] sm:$0xff] %v11358_v43  ;;  %vm13945_vm15 = vmmov %vm13944_vm2 }
 0x195   : > { %8830 = vmatmul.mubr.msk.bf16.vlgmr.msra.gmra.mrb[0].mxu0 %vm13939_vm3, %v11345_v23  ;;  %vm13948_vm3 = vmmov %vm13944_vm2  ;;  %v13976_v23 = vld [vmem:[#allocation31_spill] sm:$0xff] }
 0x196   : > { %8862 = vmatpush3.bf16.msra.mxu0 %v3146_v7  ;;  %8833 = vmatprep.mubr.msk.bf16.mxu0 %vm13940_vm9, %v11347_v2  ;;  %v2731_v7 = vld [vmem:[#allocation2 + $0x68] sm:$0xff]  ;;  %v11368_v2 = vpack.c.bf16 %v2734_v4, %v2733_v19  ;;  %vm13949_vm9 = vmmov %vm13944_vm2  ;;  %v13960_v19 = vld [vmem:[#allocation10_spill] sm:$0xff] }
 0x197   : > { %9921 = vmatprep.subr.msk.bf16.mxu0 %vm13941_vm1, %v8139_v41  ;;  %v11366_v37 = vpack.c.bf16 %v2732_v14, %v2731_v7  ;;  %vm13953_vm1 = vmmov %vm13944_vm2  ;;  %v13956_v7 = vld [vmem:[#allocation8_spill] sm:$0xff]  ;;  %v13958_v14 = vld [vmem:[#allocation9_spill] sm:$0xff] }
 0x198   : > { %13947 = vst [vmem:[#allocation69_spill] sm:$0xff] %v11368_v2  ;;  %vm13959_vm0 = vmmov %vm13953_vm1  ;;  %v13962_v4 = vld [vmem:[#allocation12_spill] sm:$0xff] }
 0x199   : > { %13946 = vst [vmem:[#allocation68_spill] sm:$0xff] %v11366_v37  ;;  %vm13961_vm14 = vmmov %vm13959_vm0 }
 0x19d   : > { %8834 = vmatmul.mubr.msk.bf16.gmra.mrb[4].mxu0 %vm13944_vm2, %v11358_v43  ;;  %v11374_v43 = vpack.c.bf16 %v2736_v22, %v2735_v17  ;;  %v2751_v17 = vld [vmem:[#allocation2 + $0x108] sm:$0xff]  ;;  %v2752_v22 = vld [vmem:[#allocation2 + $0x110] sm:$0xff] }
 0x19e   : > { %8837 = vmatprep.mubr.msk.bf16.mxu0 %vm13945_vm15, %v11360_v12  ;;  %v11376_v12 = vpack.c.bf16 %v2738_v36, %v2737_v24  ;;  %vm13952_vm15 = vmmov %vm13944_vm2  ;;  %v13964_v24 = vld [vmem:[#allocation27_spill] sm:$0xff]  ;;  %v13965_v36 = vld [vmem:[#allocation24_spill] sm:$0xff] }
 0x19f   : > { %13950 = vst [vmem:[#allocation70_spill] sm:$0xff] %v11374_v43  ;;  %vm13954_vm2 = vmmov %vm13953_vm1 }
 0x1a0   : > { %13951 = vst [vmem:[#allocation71_spill] sm:$0xff] %v11376_v12 }
 0x1a5   : > { %8838 = vmatmul.mubr.msk.bf16.gmra.mrb[8].mxu0 %vm13948_vm3, %v11366_v37  ;;  %vm13955_vm3 = vmmov %vm13953_vm1 }
 0x1a6   : > { %8841 = vmatprep.mubr.msk.bf16.mxu0 %vm13949_vm9, %v11368_v2  ;;  %vm13957_vm9 = vmmov %vm13953_vm1  ;;  %v13974_v2 = vld [vmem:[#allocation28_spill] sm:$0xff] }
 0x1ad   : > { %8842 = vmatmul.mubr.msk.bf16.gmra.mrb[12].mxu0 %vm13952_vm15, %v11374_v43  ;;  %vm13963_vm15 = vmmov %vm13959_vm0 }
 0x1ae   : > { %8845 = vmatprep.mubr.msk.bf16.mxu0 %vm13953_vm1, %v11376_v12  ;;  %vm13966_vm1 = vnez %v13965_v36  ;;  %v11397_v12 = vpack.c.bf16 %v2752_v22, %v2751_v17 }
 0x1b0   : > { %13967 = vst [vmem:[#allocation8_spill] sm:$0xff] %v11397_v12 }
 0x1b5   : > { %8846 = vmatmul.mubr.msk.bf16.gmra.mrb[16].mxu0 %vm13954_vm2, %v10765_v29  ;;  %v3048_v29 = vsel %vm13966_vm1, %v13964_v24, 0.0  ;;  %vm13969_vm2 = vmmov %vm13959_vm0  ;;  %v13977_v24 = vld [vmem:[#allocation36_spill] sm:$0xff] }
 0x1b6   : > { %8849 = vmatprep.mubr.msk.bf16.mxu0 %vm13955_vm3, %v10773_v13  ;;  %v13968_v13 = vld [vmem:[#allocation30_spill] sm:$0xff]  ;;  %vm13975_vm3 = vnez %v13974_v2  ;;  %v13984_v2 = vld [vmem:[#allocation39_spill] sm:$0xff] }
 0x1b7   : > { %v3079_v43 = vpack.c.bf16 %v3048_v29, %v13968_v13  ;;  %v8156_v29 = vld [vmem:[%s13519_s5 + $0xe] sm:$0x3] }
 0x1b8   : > { %v13982_v13 = vld [vmem:[#allocation32_spill] sm:$0xff] }
 0x1bd   : > { %8850 = vmatmul.mubr.msk.bf16.gmra.mrb[20].mxu0 %vm13957_vm9, %v13956_v7  ;;  %v13970_v7 = vld [vmem:[#allocation29_spill] sm:$0xff]  ;;  %vm13978_vm9 = vcmask 1041408  }
 0x1be   : > { %8853 = vmatprep.mubr.msk.bf16.mxu0 %vm13959_vm0, %v13958_v14  ;;  %v13971_v14 = vld [vmem:[#allocation26_spill] sm:$0xff]  ;;  %v3472_v22 = vsel %vm13978_vm9, %v8139_v41, 0  ;;  %v13988_v41 = vld [vmem:[#allocation37_spill] sm:$0xff] }
 0x1c5   : > { %8854 = vmatmul.mubr.msk.bf16.gmra.mrb[24].mxu0 %vm13961_vm14, %v13960_v19  ;;  %vm13972_vm14 = vnez %v13971_v14  ;;  %v13985_v14 = vld [vmem:[#allocation34_spill] sm:$0xff] }
 0x1c6   : > { %8857 = vmatprep.mubr.msk.bf16.mxu0 %vm13963_vm15, %v13962_v4  ;;  %v3050_v19 = vsel %vm13972_vm14, %v13970_v7, 0.0  ;;  %v13973_v4 = vld [vmem:[#allocation33_spill] sm:$0xff]  ;;  %vm13979_vm15 = vmmov %vm13959_vm0 }
 0x1c7   : > { %v3052_v37 = vsel %vm13975_vm3, %v13973_v4, 0.0  ;;  %v3080_v36 = vpack.c.bf16 %v3050_v19, %v13976_v23  ;;  %vm13986_vm3 = vnez %v13985_v14  ;;  %vm13987_vm14 = vmmov %vm13978_vm9  ;;  %v13989_v19 = vld [vmem:[#allocation42_spill] sm:$0xff]  ;;  %v13998_v14 = vld [vmem:[#allocation43_spill] sm:$0xff] }
 0x1c8   : > { %v3081_v17 = vpack.c.bf16 %v3052_v37, %v13977_v24  ;;  %v3056_v23 = vsel %vm13986_vm3, %v13984_v2, 0.0 }
 0x1c9   : > { %v3083_v24 = vpack.c.bf16 %v3056_v23, %v13989_v19  ;;  %v14003_v23 = vld [vmem:[#allocation44_spill] sm:$0xff]  ;;  %v14006_v19 = vld [vmem:[#allocation46_spill] sm:$0xff] }
 0x1cd   : > { %8858 = vmatmul.mubr.msk.bf16.gmra.mrb[28].mxu0 %vm13969_vm2, %v11397_v12  ;;  %vm13980_vm2 = vmmov %vm13959_vm0  ;;  %v13999_v12 = vld [vmem:[#allocation48_spill] sm:$0xff] }
 0x1ce   : > { %8863 = vmatprep.mubr.msk.bf16.mxu0 %vm13959_vm0, %v3079_v43  ;;  %v13981_v43 = vld [vmem:[#allocation35_spill] sm:$0xff]  ;;  %vm13983_vm0 = vnez %v13982_v13  ;;  %vm13990_vm9 = vmmov %vm13980_vm2  ;;  %v13995_v13 = vld [vmem:[#allocation45_spill] sm:$0xff] }
 0x1cf   : > { %v3054_v7 = vsel %vm13983_vm0, %v13981_v43, 0.0  ;;  %v13996_v43 = vld [vmem:[#allocation40_spill] sm:$0xff]  ;;  %vm14001_vm3 = vmmov %vm13990_vm9 }
 0x1d0   : > { %v3082_v37 = vpack.c.bf16 %v3054_v7, %v13988_v41  ;;  %vm13997_vm0 = vnez %v13996_v43  ;;  %v14002_v7 = vld [vmem:[#allocation47_spill] sm:$0xff]  ;;  %v14009_v43 = vld [vmem:[#allocation54_spill] sm:$0xff] }
 0x1d1   : > { %v3060_v4 = vsel %vm13997_vm0, %v13995_v13, 0.0  ;;  %vm14010_vm0 = vmmov %vm14001_vm3 }
 0x1d2   : > { %v3085_v60 = vpack.c.bf16 %v3060_v4, %v13999_v12  ;;  %v14012_v4 = vld [vmem:[#allocation53_spill] sm:$0xff]  ;;  %v14016_v12 = vld [vmem:[#allocation52_spill] sm:$0xff] }
 0x1d5   : > { %8864 = vmatmul.mubr.msk.bf16.vlgmr.msra.gmra.mrb[0].mxu0 %vm13979_vm15, %v3080_v36  ;;  %vm13991_vm15 = vmmov %vm13980_vm2  ;;  %v13992_v36 = vld [vmem:[#allocation41_spill] sm:$0xff] }
 0x1d6   : > { %8896 = vmatpush3.bf16.msra.mxu0 %v3472_v22  ;;  %8867 = vmatprep.mubr.msk.bf16.mxu0 %vm13980_vm2, %v3081_v17  ;;  %v13993_v17 = vld [vmem:[#allocation38_spill] sm:$0xff] }
 0x1d7   : > { %9922 = vmatprep.subr.msk.bf16.mxu0 %vm13987_vm14, %v8156_v29  ;;  %vm13994_vm2 = vnez %v13993_v17  ;;  %vm14000_vm14 = vmmov %vm13990_vm9 }
 0x1d8   : > { %v3058_v22 = vsel %vm13994_vm2, %v13992_v36, 0.0  ;;  %v14008_v36 = vld [vmem:[#allocation49_spill] sm:$0xff]  ;;  %vm14011_vm2 = vmmov %vm14010_vm0 }
 0x1d9   : > { %v3084_v2 = vpack.c.bf16 %v3058_v22, %v13998_v14  ;;  %v14015_v22 = vld [vmem:[#allocation57_spill] sm:$0xff] }
 0x1dd   : > { %8868 = vmatmul.mubr.msk.bf16.gmra.mrb[4].mxu0 %vm13990_vm9, %v3082_v37  ;;  %vm14004_vm9 = vnez %v14003_v23  ;;  %v14005_v37 = vld [vmem:[#allocation51_spill] sm:$0xff] }
 0x1de   : > { %8871 = vmatprep.mubr.msk.bf16.mxu0 %vm13991_vm15, %v3083_v24  ;;  %v3062_v24 = vsel %vm14004_vm9, %v14002_v7, 0.0  ;;  %vm14007_vm15 = vnez %v14006_v19  ;;  %v14018_v7 = vld [vmem:[#allocation55_spill] sm:$0xff]  ;;  %vm14020_vm9 = vmmov %vm14010_vm0 }
 0x1df   : > { %v3064_v17 = vsel %vm14007_vm15, %v14005_v37, 0.0  ;;  %v3086_v41 = vpack.c.bf16 %v3062_v24, %v14008_v36  ;;  %vm14019_vm15 = vmmov %vm14010_vm0 }
 0x1e0   : > { %v3087_v13 = vpack.c.bf16 %v3064_v17, %v14009_v43  ;;  %v14023_v17 = vld [vmem:[#allocation58_spill] sm:$0xff] }
 0x1e5   : > { %8872 = vmatmul.mubr.msk.bf16.gmra.mrb[8].mxu0 %vm14000_vm14, %v3084_v2  ;;  %v14013_v2 = vld [vmem:[#allocation50_spill] sm:$0xff] }
 0x1e6   : > { %8875 = vmatprep.mubr.msk.bf16.mxu0 %vm14001_vm3, %v3085_v60  ;;  %vm14014_vm14 = vnez %v14013_v2  ;;  %vm14017_vm3 = vnez %v14016_v12 }
 0x1e7   : > { %v3066_v60 = vsel %vm14014_vm14, %v14012_v4, 0.0  ;;  %v3068_v23 = vsel %vm14017_vm3, %v14015_v22, 0.0  ;;  %vm14025_vm3 = vmmov %vm14020_vm9 }
 0x1e8   : > { %v3088_v14 = vpack.c.bf16 %v3066_v60, %v14018_v7  ;;  %v3089_v19 = vpack.c.bf16 %v3068_v23, %v11203_v42  ;;  %vm14026_vm14 = vmmov %vm14025_vm3 }
 0x1ed   : > { %8876 = vmatmul.mubr.msk.bf16.gmra.mrb[12].mxu0 %vm14010_vm0, %v3086_v41  ;;  %v14021_v41 = vld [vmem:[#allocation56_spill] sm:$0xff] }
 0x1ee   : > { %8879 = vmatprep.mubr.msk.bf16.mxu0 %vm14011_vm2, %v3087_v13  ;;  %vm14022_vm0 = vnez %v14021_v41  ;;  %vm14024_vm2 = vnez %v14023_v17  ;;  %v11476_v41 = vld [vmem:[#allocation2 + $0x111] sm:$0xff] }
 0x1ef   : > { %v3070_v13 = vsel %vm14022_vm0, %v11198_v21, 0.0  ;;  %v3072_v24 = vsel %vm14024_vm2, %v11219_v16, 0.0  ;;  %vm14030_vm2 = vmmov %vm14025_vm3 }
 0x1f0   : > { %v3090_v2 = vpack.c.bf16 %v3070_v13, %v11208_v5  ;;  %v3091_v12 = vpack.c.bf16 %v3072_v24, %v11230_v34  ;;  %vm14031_vm0 = vmmov %vm14030_vm2  ;;  %v14032_v13 = vld [vmem:[#allocation11_spill] sm:$0xff] }
 0x1f5   : > { %8880 = vmatmul.mubr.msk.bf16.gmra.mrb[16].mxu0 %vm14019_vm15, %v3088_v14  ;;  %v14027_v14 = vld [vmem:[#allocation59_spill] sm:$0xff] }
 0x1f6   : > { %8883 = vmatprep.mubr.msk.bf16.mxu0 %vm14020_vm9, %v3089_v19  ;;  %vm14028_vm15 = vnez %v14027_v14  ;;  %vm14029_vm9 = vnez %v13906_v31 }
 0x1f7   : > { %v3074_v19 = vsel %vm14028_vm15, %v11226_v38, 0.0  ;;  %v3076_v23 = vsel %vm14029_vm9, %v11246_v45, 0.0  ;;  %vm14035_vm9 = vmmov %vm14031_vm0 }
 0x1f8   : > { %v3092_v60 = vpack.c.bf16 %v3074_v19, %v11235_v57  ;;  %v3093_v17 = vpack.c.bf16 %v3076_v23, %v11250_v39 }
 0x1fd   : > { %8884 = vmatmul.mubr.msk.bf16.gmra.mrb[20].mxu0 %vm14025_vm3, %v3090_v2  ;;  %v11480_v2 = vld [vmem:[#allocation2 + $0x109] sm:$0xff]  ;;  %vm14034_vm3 = vmmov %vm14031_vm0 }
 0x1fe   : > { %8887 = vmatprep.mubr.msk.bf16.mxu0 %vm14026_vm14, %v3091_v12  ;;  %v3078_v12 = vsel %vm11242_vm4, %v11476_v41, 0.0  ;;  %vm14033_vm14 = vnez %v14032_v13 }
 0x1ff   : > { %v3373_v24 = vsel %vm14033_vm14, %v10811_v44, 0.0  ;;  %v3094_v19 = vpack.c.bf16 %v3078_v12, %v11480_v2 }
 0x200   : > { %v3405_v23 = vpack.c.bf16 %v10819_v28, %v3373_v24  ;;  %v8173_v28 = vld [vmem:[%s13519_s5 + $0x10] sm:$0x3] }
 0x205   : > { %8888 = vmatmul.mubr.msk.bf16.gmra.mrb[24].mxu0 %vm14030_vm2, %v3092_v60  ;;  %v3377_v60 = vsel %vm10807_vm6, %v10845_v62, 0.0 }
 0x206   : > { %8891 = vmatprep.mubr.msk.bf16.mxu0 %vm14031_vm0, %v3093_v17  ;;  %v3375_v17 = vsel %vm10800_vm5, %v10837_v56, 0.0  ;;  %v3407_v44 = vpack.c.bf16 %v10860_v35, %v3377_v60  ;;  %vm14036_vm0 = vcmask 1041408   ;;  %v3379_v56 = vsel %vm10833_vm7, %v10874_v54, 0.0  ;;  %v14058_v60 = vld [vmem:[#allocation21_spill] sm:$0xff] }
 0x207   : > { %v3406_v9 = vpack.c.bf16 %v10855_v40, %v3375_v17  ;;  %v3766_v12 = vsel %vm14036_vm0, %v8156_v29, 0  ;;  %v3381_v40 = vsel %vm10841_vm8, %v10881_v25, 0.0  ;;  %v3408_v35 = vpack.c.bf16 %v10886_v47, %v3379_v56  ;;  %v14057_v17 = vld [vmem:[#allocation62_spill] sm:$0xff]  ;;  %v14061_v56 = vld [vmem:[#allocation63_spill] sm:$0xff] }
 0x208   : > { %v3409_v29 = vpack.c.bf16 %v10891_v1, %v3381_v40  ;;  %v3385_v54 = vsel %vm10877_vm11, %v10909_v49, 0.0  ;;  %v3387_v47 = vsel %vm10898_vm12, %v10930_v18, 0.0  ;;  %v3389_v1 = vsel %vm10905_vm13, %v10937_v32, 0.0  ;;  %v3371_v40 = vld [vmem:[#allocation2 + $0x117] sm:$0xff] }
 0x209   : > { %v3411_v24 = vpack.c.bf16 %v10919_v59, %v3385_v54  ;;  %v3413_v49 = vpack.c.bf16 %v10947_v63, %v3389_v1  ;;  %v14050_v63 = vld [vmem:[#allocation19_spill] sm:$0xff]  ;;  %v14075_v1 = vld [vmem:[#allocation68_spill] sm:$0xff] }
 0x20d   : > { %8892 = vmatmul.mubr.msk.bf16.gmra.mrb[28].mxu0 %vm14034_vm3, %v3094_v19  ;;  %vm14039_vm3 = vmmov %vm14036_vm0 }
 0x20e   : > { %8897 = vmatprep.mubr.msk.bf16.mxu0 %vm14035_vm9, %v3405_v23  ;;  %vm14037_vm9 = vmmov %vm14030_vm2 }
 0x20f   : > { %vm14040_vm0 = vmmov %vm14030_vm2 }
 0x210   : > { %vm14047_vm13 = vmmov %vm14040_vm0 }
 0x211   : > { %vm14048_vm12 = vmmov %vm14040_vm0 }
 0x215   : > { %8898 = vmatmul.mubr.msk.bf16.vlgmr.msra.gmra.mrb[0].mxu0 %vm14030_vm2, %v3406_v9  ;;  %vm14041_vm2 = vmmov %vm14040_vm0  ;;  %v3383_v9 = vsel %vm10870_vm10, %v10902_v61, 0.0  ;;  %v3412_v61 = vpack.c.bf16 %v10942_v6, %v3387_v47  ;;  %v14074_v47 = vld [vmem:[#allocation67_spill] sm:$0xff] }
 0x216   : > { %8930 = vmatpush3.bf16.msra.mxu0 %v3766_v12  ;;  %8901 = vmatprep.mubr.msk.bf16.mxu0 %vm14037_vm9, %v3407_v44  ;;  %v3410_v25 = vpack.c.bf16 %v10914_v51, %v3383_v9  ;;  %vm14042_vm9 = vmmov %vm14040_vm0  ;;  %v14060_v44 = vld [vmem:[#allocation25_spill] sm:$0xff]  ;;  %v14067_v9 = vld [vmem:[#allocation64_spill] sm:$0xff] }
 0x217   : > { %9923 = vmatprep.subr.msk.bf16.mxu0 %vm14039_vm3, %v8173_v28  ;;  %vm14043_vm3 = vmmov %vm14040_vm0 }
 0x21d   : > { %8902 = vmatmul.mubr.msk.bf16.gmra.mrb[4].mxu0 %vm14040_vm0, %v3408_v35 }
 0x21e   : > { %8905 = vmatprep.mubr.msk.bf16.mxu0 %vm14041_vm2, %v3409_v29  ;;  %vm14044_vm2 = vmmov %vm14040_vm0 }
 0x225   : > { %8906 = vmatmul.mubr.msk.bf16.gmra.mrb[8].mxu0 %vm14042_vm9, %v3410_v25  ;;  %vm14045_vm9 = vnez %v13804_v58  ;;  %v14070_v25 = vld [vmem:[#allocation65_spill] sm:$0xff] }
 0x226   : > { %8909 = vmatprep.mubr.msk.bf16.mxu0 %vm14043_vm3, %v3411_v24  ;;  %v3391_v51 = vsel %vm14045_vm9, %v10958_v55, 0.0  ;;  %vm14046_vm3 = vnez %v13807_v26  ;;  %v14072_v24 = vld [vmem:[#allocation66_spill] sm:$0xff] }
 0x227   : > { %v3393_v59 = vsel %vm14046_vm3, %v10965_v50, 0.0  ;;  %v3414_v18 = vpack.c.bf16 %v10970_v10, %v3391_v51  ;;  %vm14052_vm3 = vmmov %vm14048_vm12  ;;  %v14054_v10 = vld [vmem:[#allocation23_spill] sm:$0xff]  ;;  %v3684_v51 = vld [vmem:[#allocation2 + $0xb0] sm:$0xff] }
 0x228   : > { %v3415_v32 = vpack.c.bf16 %v10975_v30, %v3393_v59  ;;  %vm14053_vm9 = vmmov %vm14052_vm3  ;;  %v14055_v30 = vld [vmem:[#allocation20_spill] sm:$0xff] }
 0x22d   : > { %8910 = vmatmul.mubr.msk.bf16.gmra.mrb[12].mxu0 %vm14040_vm0, %v3412_v61  ;;  %vm14049_vm0 = vnez %v13810_v8  ;;  %v14077_v61 = vld [vmem:[#allocation69_spill] sm:$0xff] }
 0x22e   : > { %8913 = vmatprep.mubr.msk.bf16.mxu0 %vm14044_vm2, %v3413_v49  ;;  %v3395_v6 = vsel %vm14049_vm0, %v10989_v48, 0.0  ;;  %vm14051_vm2 = vnez %v14050_v63  ;;  %v14079_v49 = vld [vmem:[#allocation70_spill] sm:$0xff] }
 0x22f   : > { %v3397_v55 = vsel %vm14051_vm2, %v10996_v27, 0.0  ;;  %v3416_v19 = vpack.c.bf16 %v11002_v0, %v3395_v6  ;;  %vm14062_vm2 = vmmov %vm14052_vm3  ;;  %v3372_v0 = vld [vmem:[#allocation2 + $0x11f] sm:$0xff] }
 0x230   : > { %v3417_v50 = vpack.c.bf16 %v11008_v53, %v3397_v55  ;;  %vm14063_vm0 = vmmov %vm14062_vm2  ;;  %v14064_v53 = vld [vmem:[#allocation22_spill] sm:$0xff]  ;;  %v3686_v6 = vld [vmem:[#allocation2 + $0xc0] sm:$0xff] }
 0x231   : > { %vm14071_vm11 = vmmov %vm14063_vm0  ;;  %v3687_v55 = vld [vmem:[#allocation2 + $0xc8] sm:$0xff] }
 0x235   : > { %8914 = vmatmul.mubr.msk.bf16.gmra.mrb[16].mxu0 %vm14047_vm13, %v3414_v18  ;;  %vm14056_vm13 = vnez %v14055_v30  ;;  %v14081_v18 = vld [vmem:[#allocation71_spill] sm:$0xff] }
 0x236   : > { %8917 = vmatprep.mubr.msk.bf16.mxu0 %vm14048_vm12, %v3415_v32  ;;  %v3399_v23 = vsel %vm14056_vm13, %v14054_v10, 0.0  ;;  %vm14059_vm12 = vnez %v14058_v60  ;;  %vm14068_vm13 = vmmov %vm14063_vm0  ;;  %v3685_v32 = vld [vmem:[#allocation2 + $0xb8] sm:$0xff] }
 0x237   : > { %v3401_v48 = vsel %vm14059_vm12, %v14057_v17, 0.0  ;;  %v3418_v12 = vpack.c.bf16 %v14060_v44, %v3399_v23  ;;  %vm14069_vm12 = vcmask 1041408   ;;  %v3689_v23 = vld [vmem:[#allocation2 + $0xd8] sm:$0xff]  ;;  %v3690_v17 = vld [vmem:[#allocation2 + $0xe0] sm:$0xff]  ;;  %v3692_v44 = vld [vmem:[#allocation2 + $0xf0] sm:$0xff] }
 0x238   : > { %v3419_v27 = vpack.c.bf16 %v14061_v56, %v3401_v48  ;;  %v4092_v54 = vsel %vm14069_vm12, %v8173_v28, 0  ;;  %v3683_v28 = vld [vmem:[#allocation2 + $0xa8] sm:$0xff]  ;;  %vm14083_vm12 = vmmov %vm14063_vm0 }
 0x239   : > { %v3707_v59 = vpack.c.bf16 %v3684_v51, %v3683_v28  ;;  %v3691_v48 = vld [vmem:[#allocation2 + $0xe8] sm:$0xff]  ;;  %v14094_v28 = vld [vmem:[#allocation26_spill] sm:$0xff] }
 0x23a   : > { %v3711_v56 = vpack.c.bf16 %v3692_v44, %v3691_v48  ;;  %v14105_v48 = vld [vmem:[#allocation41_spill] sm:$0xff]  ;;  %v14106_v44 = vld [vmem:[#allocation34_spill] sm:$0xff] }
 0x23d   : > { %8918 = vmatmul.mubr.msk.bf16.gmra.mrb[20].mxu0 %vm14052_vm3, %v3416_v19  ;;  %vm14066_vm3 = vmmov %vm14063_vm0  ;;  %v3688_v19 = vld [vmem:[#allocation2 + $0xd0] sm:$0xff] }
 0x23e   : > { %8921 = vmatprep.mubr.msk.bf16.mxu0 %vm14053_vm9, %v3417_v50  ;;  %vm14065_vm9 = vnez %v14064_v53  ;;  %v3708_v50 = vpack.c.bf16 %v3686_v6, %v3685_v32  ;;  %v3709_v10 = vpack.c.bf16 %v3688_v19, %v3687_v55  ;;  %v14099_v6 = vld [vmem:[#allocation36_spill] sm:$0xff]  ;;  %v14100_v19 = vld [vmem:[#allocation37_spill] sm:$0xff] }
 0x23f   : > { %v3403_v35 = vsel %vm14065_vm9, %v3371_v40, 0.0  ;;  %vm14076_vm9 = vmmov %vm14063_vm0  ;;  %v3694_v40 = vld [vmem:[#allocation2 + $0x100] sm:$0xff] }
 0x240   : > { %v3420_v29 = vpack.c.bf16 %v3372_v0, %v3403_v35  ;;  %v3962_v35 = vld [vmem:[#allocation2 + $0x31] sm:$0xff] }
 0x245   : > { %8922 = vmatmul.mubr.msk.bf16.gmra.mrb[24].mxu0 %vm14062_vm2, %v3418_v12  ;;  %vm14073_vm2 = vmmov %vm14063_vm0  ;;  %v3710_v12 = vpack.c.bf16 %v3690_v17, %v3689_v23  ;;  %v14103_v23 = vld [vmem:[#allocation32_spill] sm:$0xff] }
 0x246   : > { %8925 = vmatprep.mubr.msk.bf16.mxu0 %vm14063_vm0, %v3419_v27  ;;  %v3693_v27 = vld [vmem:[#allocation2 + $0xf8] sm:$0xff] }
 0x247   : > { %v3712_v0 = vpack.c.bf16 %v3694_v40, %v3693_v27  ;;  %v14109_v40 = vld [vmem:[#allocation43_spill] sm:$0xff] }
 0x24d   : > { %8926 = vmatmul.mubr.msk.bf16.gmra.mrb[28].mxu0 %vm14066_vm3, %v3420_v29  ;;  %vm14078_vm3 = vmmov %vm14063_vm0  ;;  %v14088_v29 = vld [vmem:[#allocation8_spill] sm:$0xff] }
 0x24e   : > { %8931 = vmatprep.mubr.msk.bf16.mxu0 %vm14068_vm13, %v14067_v9  ;;  %vm14080_vm13 = vmmov %vm14063_vm0  ;;  %v3697_v9 = vld [vmem:[#allocation2 + $0x118] sm:$0xff] }
 0x255   : > { %8932 = vmatmul.mubr.msk.bf16.vlgmr.msra.gmra.mrb[0].mxu0 %vm14071_vm11, %v14070_v25  ;;  %vm14082_vm11 = vmmov %vm14063_vm0  ;;  %v3961_v25 = vld [vmem:[#allocation2 + $0x29] sm:$0xff] }
 0x256   : > { %8964 = vmatpush3.bf16.msra.mxu0 %v4092_v54  ;;  %8935 = vmatprep.mubr.msk.bf16.mxu0 %vm14073_vm2, %v14072_v24  ;;  %vm14085_vm2 = vmmov %vm14063_vm0  ;;  %v3698_v54 = vld [vmem:[#allocation2 + $0x120] sm:$0xff] }
 0x25d   : > { %8936 = vmatmul.mubr.msk.bf16.gmra.mrb[4].mxu0 %vm14063_vm0, %v14074_v47  ;;  %v3994_v47 = vsel %vm13966_vm1, %v3962_v35, 0.0  ;;  %v14112_v35 = vld [vmem:[#allocation45_spill] sm:$0xff] }
 0x25e   : > { %8939 = vmatprep.mubr.msk.bf16.mxu0 %vm14076_vm9, %v14075_v1  ;;  %vm14084_vm9 = vmmov %vm14063_vm0  ;;  %v3714_v1 = vpack.c.bf16 %v3698_v54, %v3697_v9  ;;  %v14115_v54 = vld [vmem:[#allocation47_spill] sm:$0xff] }
 0x265   : > { %8940 = vmatmul.mubr.msk.bf16.gmra.mrb[8].mxu0 %vm14078_vm3, %v14077_v61  ;;  %vm14086_vm3 = vmmov %vm14063_vm0  ;;  %v4025_v61 = vpack.c.bf16 %v3994_v47, %v3961_v25  ;;  %v14116_v25 = vld [vmem:[#allocation40_spill] sm:$0xff] }
 0x266   : > { %8943 = vmatprep.mubr.msk.bf16.mxu0 %vm14080_vm13, %v14079_v49  ;;  %vm14087_vm13 = vmmov %vm14063_vm0  ;;  %v14093_v49 = vld [vmem:[#allocation33_spill] sm:$0xff] }
 0x26d   : > { %8944 = vmatmul.mubr.msk.bf16.gmra.mrb[12].mxu0 %vm14082_vm11, %v14081_v18  ;;  %vm14089_vm11 = vmmov %vm14063_vm0  ;;  %v14097_v18 = vld [vmem:[#allocation28_spill] sm:$0xff] }
 0x26e   : > { %8947 = vmatprep.mubr.msk.bf16.mxu0 %vm14083_vm12, %v3707_v59  ;;  %vm14091_vm12 = vmmov %vm14063_vm0  ;;  %v14096_v59 = vld [vmem:[#allocation35_spill] sm:$0xff] }
 0x275   : > { %8948 = vmatmul.mubr.msk.bf16.gmra.mrb[16].mxu0 %vm14084_vm9, %v3708_v50  ;;  %vm14092_vm9 = vmmov %vm14063_vm0 }
 0x276   : > { %8951 = vmatprep.mubr.msk.bf16.mxu0 %vm14085_vm2, %v3709_v10  ;;  %vm14095_vm2 = vnez %v14094_v28  ;;  %v14102_v10 = vld [vmem:[#allocation39_spill] sm:$0xff] }
 0x277   : > { %v3996_v51 = vsel %vm14095_vm2, %v14093_v49, 0.0 }
 0x278   : > { %v4026_v55 = vpack.c.bf16 %v3996_v51, %v14099_v6  ;;  %v14121_v51 = vld [vmem:[#allocation44_spill] sm:$0xff] }
 0x27d   : > { %8952 = vmatmul.mubr.msk.bf16.gmra.mrb[20].mxu0 %vm14063_vm0, %v3710_v12  ;;  %vm14098_vm0 = vnez %v14097_v18 }
 0x27e   : > { %8955 = vmatprep.mubr.msk.bf16.mxu0 %vm14086_vm3, %v3711_v56  ;;  %v3998_v32 = vsel %vm14098_vm0, %v14096_v59, 0.0  ;;  %v14108_v56 = vld [vmem:[#allocation42_spill] sm:$0xff]  ;;  %vm14111_vm0 = vmmov %vm14086_vm3 }
 0x27f   : > { %v4027_v50 = vpack.c.bf16 %v3998_v32, %v14100_v19  ;;  %v14123_v32 = vld [vmem:[#allocation46_spill] sm:$0xff] }
 0x285   : > { %8956 = vmatmul.mubr.msk.bf16.gmra.mrb[24].mxu0 %vm14087_vm13, %v3712_v0  ;;  %vm14101_vm13 = vmmov %vm14086_vm3 }
 0x286   : > { %8959 = vmatprep.mubr.msk.bf16.mxu0 %vm14089_vm11, %v14088_v29  ;;  %vm14104_vm11 = vnez %v14103_v23  ;;  %v14113_v29 = vld [vmem:[#allocation38_spill] sm:$0xff] }
 0x287   : > { %v4000_v17 = vsel %vm14104_vm11, %v14102_v10, 0.0  ;;  %vm14120_vm11 = vmmov %vm14111_vm0  ;;  %v14129_v10 = vld [vmem:[#allocation52_spill] sm:$0xff] }
 0x288   : > { %v4028_v27 = vpack.c.bf16 %v4000_v17, %v14108_v56  ;;  %v3992_v56 = vld [vmem:[#allocation2 + $0x121] sm:$0xff] }
 0x28d   : > { %8960 = vmatmul.mubr.msk.bf16.gmra.mrb[28].mxu0 %vm14091_vm12, %v3714_v1  ;;  %vm14107_vm12 = vnez %v14106_v44  ;;  %v14118_v1 = vld [vmem:[#allocation48_spill] sm:$0xff] }
 0x28e   : > { %8965 = vmatprep.mubr.msk.bf16.mxu0 %vm14092_vm9, %v4025_v61  ;;  %v4002_v12 = vsel %vm14107_vm12, %v14105_v48, 0.0  ;;  %vm14110_vm9 = vmmov %vm14086_vm3  ;;  %v14135_v48 = vld [vmem:[#allocation58_spill] sm:$0xff] }
 0x28f   : > { %v4029_v0 = vpack.c.bf16 %v4002_v12, %v14109_v40  ;;  %vm14119_vm12 = vmmov %vm14111_vm0 }
 0x295   : > { %8966 = vmatmul.mubr.msk.bf16.vlgmr.msra.gmra.mrb[0].mxu0 %vm14086_vm3, %v4026_v55  ;;  %vm14114_vm3 = vnez %v14113_v29 }
 0x296   : > { %8969 = vmatprep.mubr.msk.bf16.mxu0 %vm14101_vm13, %v4027_v50  ;;  %v4004_v9 = vsel %vm14114_vm3, %v14112_v35, 0.0  ;;  %vm14117_vm13 = vnez %v14116_v25  ;;  %vm14126_vm3 = vmmov %vm14120_vm11 }
 0x297   : > { %v4006_v47 = vsel %vm14117_vm13, %v14115_v54, 0.0  ;;  %v4030_v61 = vpack.c.bf16 %v4004_v9, %v14118_v1  ;;  %vm14125_vm13 = vmmov %vm14120_vm11 }
 0x298   : > { %v4031_v49 = vpack.c.bf16 %v4006_v47, %v14008_v36  ;;  %v14127_v36 = vld [vmem:[#allocation50_spill] sm:$0xff] }
 0x29d   : > { %8970 = vmatmul.mubr.msk.bf16.gmra.mrb[4].mxu0 %vm14110_vm9, %v4028_v27  ;;  %vm14122_vm9 = vnez %v14121_v51  ;;  %v4024_v27 = vsel %vm11242_vm4, %v3992_v56, 0.0 }
 0x29e   : > { %8973 = vmatprep.mubr.msk.bf16.mxu0 %vm14111_vm0, %v4029_v0  ;;  %v4008_v59 = vsel %vm14122_vm9, %v14005_v37, 0.0  ;;  %vm14124_vm0 = vnez %v14123_v32 }
 0x29f   : > { %v4010_v6 = vsel %vm14124_vm0, %v14012_v4, 0.0  ;;  %v4032_v55 = vpack.c.bf16 %v4008_v59, %v14009_v43  ;;  %vm14131_vm0 = vmmov %vm14126_vm3  ;;  %v14133_v43 = vld [vmem:[#allocation56_spill] sm:$0xff] }
 0x2a0   : > { %v4033_v19 = vpack.c.bf16 %v4010_v6, %v14018_v7  ;;  %vm14132_vm9 = vmmov %vm14131_vm0 }
 0x2a5   : > { %8974 = vmatmul.mubr.msk.bf16.gmra.mrb[8].mxu0 %vm14119_vm12, %v4030_v61  ;;  %vm14128_vm12 = vnez %v14127_v36 }
 0x2a6   : > { %8977 = vmatprep.mubr.msk.bf16.mxu0 %vm14120_vm11, %v4031_v49  ;;  %v4012_v50 = vsel %vm14128_vm12, %v14015_v22, 0.0  ;;  %vm14130_vm11 = vnez %v14129_v10  ;;  %vm14138_vm12 = vmmov %vm14131_vm0 }
 0x2a7   : > { %v4014_v37 = vsel %vm14130_vm11, %v11198_v21, 0.0  ;;  %v4034_v17 = vpack.c.bf16 %v4012_v50, %v11203_v42  ;;  %vm14137_vm11 = vmmov %vm14131_vm0  ;;  %v4020_v42 = vsel %vm14028_vm15, %v11246_v45, 0.0  ;;  %v14143_v45 = vmov 0.0  }
 0x2a8   : > { %v4035_v4 = vpack.c.bf16 %v4014_v37, %v11208_v5  ;;  %v4038_v5 = vpack.c.bf16 %v4020_v42, %v11250_v39  ;;  %v11687_v39 = vld [vmem:[%s13520_s6] ss:$0 sm:$0xff] }
 0x2ad   : > { %8978 = vmatmul.mubr.msk.bf16.gmra.mrb[12].mxu0 %vm14125_vm13, %v4032_v55  ;;  %vm14134_vm13 = vnez %v14133_v43 }
 0x2ae   : > { %8981 = vmatprep.mubr.msk.bf16.mxu0 %vm14126_vm3, %v4033_v19  ;;  %v4016_v7 = vsel %vm14134_vm13, %v11219_v16, 0.0  ;;  %vm14136_vm3 = vnez %v14135_v48 }
 0x2af   : > { %v4018_v22 = vsel %vm14136_vm3, %v11226_v38, 0.0  ;;  %v4036_v12 = vpack.c.bf16 %v4016_v7, %v11230_v34  ;;  %vm14140_vm3 = vmmov %vm14131_vm0  ;;  %v3991_v34 = vld [vmem:[#allocation2 + $0x119] sm:$0xff] }
 0x2b0   : > { %v4037_v21 = vpack.c.bf16 %v4018_v22, %v11235_v57  ;;  %v4040_v40 = vpack.c.bf16 %v4024_v27, %v3991_v34 }
 0x2b5   : > { %8982 = vmatmul.mubr.msk.bf16.gmra.mrb[16].mxu0 %vm14131_vm0, %v4034_v17 }
 0x2b6   : > { %8985 = vmatprep.mubr.msk.bf16.mxu0 %vm14132_vm9, %v4035_v4  ;;  %vm14139_vm9 = vnez %v13906_v31 }
 0x2b7   : > { %v4022_v16 = vsel %vm14139_vm9, %v11476_v41, 0.0 }
 0x2b8   : > { %v4039_v38 = vpack.c.bf16 %v4022_v16, %v11480_v2 }
 0x2bd   : > { %8986 = vmatmul.mubr.msk.bf16.gmra.mrb[20].mxu0 %vm14137_vm11, %v4036_v12  ;;  %vm13694_vm11 = vcmask 64512  }
 0x2be   : > { %8989 = vmatprep.mubr.msk.bf16.mxu0 %vm14138_vm12, %v4037_v21  ;;  %vm14142_vm12 = vmmov %vm14131_vm0  ;;  %4743 = vst.msk [vmem:[#allocation3] sm:$0xff] %vm13694_vm11, %v14143_v45 }
 0x2bf   : > { %4744 = vst.msk [vmem:[#allocation3 + $0x8] sm:$0xff] %vm13694_vm11, %v14143_v45  ;;  %4745 = vst.msk [vmem:[#allocation3 + $0x10] sm:$0xff] %vm13694_vm11, %v14143_v45 }
 0x2c0   : > { %4746 = vst.msk [vmem:[#allocation3 + $0x118] sm:$0xff] %vm13694_vm11, %v14143_v45  ;;  %4747 = vst.msk [vmem:[#allocation3 + $0x120] sm:$0xff] %vm13694_vm11, %v14143_v45 }
 0x2c1   : > { %4748 = vst.msk [vmem:[#allocation3 + $0x128] sm:$0xff] %vm13694_vm11, %v14143_v45 }
 0x2c5   : > { %8990 = vmatmul.mubr.msk.bf16.gmra.mrb[24].mxu0 %vm14131_vm0, %v4038_v5 }
 0x2c6   : > { %8993 = vmatprep.mubr.msk.bf16.mxu0 %vm14140_vm3, %v4039_v38  ;;  %vm13693_vm3 = vcmask 1043456  }
 0x2cd   : > { %8994 = vmatmul.mubr.msk.bf16.gmra.mrb[28].mxu0 %vm14142_vm12, %v4040_v40 }
 0x368   : > { %v8967_v41 = vpop.f32.mrb[0].mxu0 }
 0x369   : > { %v4128_v2 = vpop.f32.mrb[1].mxu0  ;;  %v11690_v0 = vadd.f32 %v8967_v41, %v11687_v39 }
 0x36a   : > { %v11693_v35 = vadd.f32 %v11687_v39, %v4128_v2  ;;  %v8968_v9 = vpop.f32.mrb[2].mxu0 }
 0x36b   : > { %v4131_v54 = vpop.f32.mrb[3].mxu0  ;;  %v11698_v1 = vadd.f32 %v8968_v9, %v11687_v39  ;;  %v4400_v49 = vmul.f32 %v11690_v0, %v11690_v0  ;;  %v4331_v50 = vsel %vm13694_vm11, %v11690_v0, 0.0 }
 0x36c   : > { %v4398_v47 = vmul.f32 %v11693_v35, %v11693_v35  ;;  %v11701_v61 = vadd.f32 %v11687_v39, %v4131_v54  ;;  %v4328_v59 = vsel %vm13694_vm11, %v11693_v35, 0.0 }
 0x36d   : > { %v4401_v17 = vmul.f32 %v11698_v1, %v11698_v1  ;;  %v4433_v42 = vsel %vm13694_vm11, %v4400_v49, 0.0  ;;  %v4333_v16 = vsel %vm13694_vm11, %v11698_v1, 0.0 }
 0x36e   : > { %v4329_v6 = vsel %vm13694_vm11, %v11701_v61, 0.0  ;;  %v4399_v55 = vmul.f32 %v11701_v61, %v11701_v61  ;;  %v4430_v37 = vsel %vm13694_vm11, %v4398_v47, 0.0 }
 0x36f   : > { %v4330_v19 = vadd.f32 %v4329_v6, %v4328_v59  ;;  %v4435_v45 = vsel %vm13694_vm11, %v4401_v17, 0.0 }
 0x370   : > { %v4431_v4 = vsel %vm13694_vm11, %v4399_v55, 0.0  ;;  %v8971_v7 = vpop.f32.mrb[4].mxu0 }
 0x371   : > { %v4332_v22 = vadd.f32 %v4331_v50, %v4330_v19  ;;  %v4432_v12 = vadd.f32 %v4431_v4, %v4430_v37  ;;  %v4144_v21 = vpop.f32.mrb[5].mxu0  ;;  %v11724_v34 = vadd.f32 %v8971_v7, %v11687_v39 }
 0x372   : > { %v11721_v5 = vadd.f32 %v11687_v39, %v4144_v21  ;;  %v8972_v38 = vpop.f32.mrb[6].mxu0 }
 0x373   : > { %v4434_v56 = vadd.f32 %v4433_v42, %v4432_v12  ;;  %v4334_v27 = vadd.f32 %v4333_v16, %v4332_v22  ;;  %v4147_v40 = vpop.f32.mrb[7].mxu0  ;;  %v11735_v49 = vadd.f32 %v8972_v38, %v11687_v39  ;;  %v4404_v55 = vmul.f32 %v11724_v34, %v11724_v34 }
 0x374   : > { %v4335_v41 = vsel %vm13694_vm11, %v11721_v5, 0.0  ;;  %v4402_v2 = vmul.f32 %v11721_v5, %v11721_v5  ;;  %v11732_v9 = vadd.f32 %v11687_v39, %v4147_v40  ;;  %v4339_v17 = vsel %vm13694_vm11, %v11724_v34, 0.0 }
 0x375   : > { %v4336_v54 = vadd.f32 %v4335_v41, %v4334_v27  ;;  %v4436_v47 = vadd.f32 %v4435_v45, %v4434_v56  ;;  %v4405_v7 = vmul.f32 %v11735_v49, %v11735_v49  ;;  %v4341_v42 = vsel %vm13694_vm11, %v11735_v49, 0.0 }
 0x376   : > { %v4437_v59 = vsel %vm13694_vm11, %v4402_v2, 0.0  ;;  %v4337_v6 = vsel %vm13694_vm11, %v11732_v9, 0.0  ;;  %v4403_v37 = vmul.f32 %v11732_v9, %v11732_v9  ;;  %v4441_v27 = vsel %vm13694_vm11, %v4404_v55, 0.0 }
 0x377   : > { %v4438_v19 = vadd.f32 %v4437_v59, %v4436_v47  ;;  %v4338_v50 = vadd.f32 %v4337_v6, %v4336_v54  ;;  %v4443_v6 = vsel %vm13694_vm11, %v4405_v7, 0.0 }
 0x378   : > { %v8975_v4 = vpop.f32.mrb[8].mxu0  ;;  %v4439_v12 = vsel %vm13694_vm11, %v4403_v37, 0.0 }
 0x379   : > { %v4340_v22 = vadd.f32 %v4339_v17, %v4338_v50  ;;  %v4160_v21 = vpop.f32.mrb[9].mxu0  ;;  %v4440_v16 = vadd.f32 %v4439_v12, %v4438_v19  ;;  %v11756_v40 = vadd.f32 %v8975_v4, %v11687_v39 }
 0x37a   : > { %v11752_v38 = vadd.f32 %v11687_v39, %v4160_v21  ;;  %v8976_v56 = vpop.f32.mrb[10].mxu0 }
 0x37b   : > { %v4342_v45 = vadd.f32 %v4341_v42, %v4340_v22  ;;  %v4163_v41 = vpop.f32.mrb[11].mxu0  ;;  %v4442_v2 = vadd.f32 %v4441_v27, %v4440_v16  ;;  %v11767_v55 = vadd.f32 %v8976_v56, %v11687_v39  ;;  %v4347_v22 = vsel %vm13694_vm11, %v11756_v40, 0.0  ;;  %v8192_v56 = vld [vmem:[%s13521_s7 + $0x4] sm:$0xf]  ;;  %v4862_v27 = vld [vmem:[#allocation3 + $0x8] sm:$0xff] }
 0x37c   : > { %v4343_v54 = vsel %vm13694_vm11, %v11752_v38, 0.0  ;;  %v4406_v47 = vmul.f32 %v11752_v38, %v11752_v38  ;;  %v11763_v59 = vadd.f32 %v11687_v39, %v4163_v41  ;;  %v4408_v12 = vmul.f32 %v11756_v40, %v11756_v40  ;;  %9924 = vmatprep.subr.msk.bf16.mxu0 %vm13693_vm3, %v8192_v56  ;;  %9925 = vmatprep.subr.msk.bf16.mxu1 %vm13693_vm3, %v8192_v56 }
 0x37d   : > { %v4344_v19 = vadd.f32 %v4343_v54, %v4342_v45  ;;  %v4444_v50 = vadd.f32 %v4443_v6, %v4442_v2  ;;  %v4409_v45 = vmul.f32 %v11767_v55, %v11767_v55  ;;  %v4962_v54 = vsel %vm13693_vm3, %v8192_v56, 0 }
 0x37e   : > { %v4445_v37 = vsel %vm13694_vm11, %v4406_v47, 0.0  ;;  %v4345_v17 = vsel %vm13694_vm11, %v11763_v59, 0.0  ;;  %v4407_v4 = vmul.f32 %v11763_v59, %v11763_v59  ;;  %v4863_v47 = vld [vmem:[#allocation3 + $0x10] sm:$0xff]  ;;  %v4349_v6 = vsel %vm13694_vm11, %v11767_v55, 0.0  ;;  %8998 = vmatpush3.bf16.msra.mxu0 %v4962_v54  ;;  %9338 = vmatpush3.bf16.msra.mxu1 %v4962_v54 }
 0x37f   : > { %v4346_v7 = vadd.f32 %v4345_v17, %v4344_v19  ;;  %v4446_v21 = vadd.f32 %v4445_v37, %v4444_v50  ;;  %v4894_v17 = vpack.c.bf16 %v4863_v47, %v4862_v27  ;;  %v4451_v27 = vsel %vm13694_vm11, %v4409_v45, 0.0 }
 0x380   : > { %v4447_v42 = vsel %vm13694_vm11, %v4407_v4, 0.0  ;;  %v8979_v16 = vpop.f32.mrb[12].mxu0  ;;  %v4449_v4 = vsel %vm13694_vm11, %v4408_v12, 0.0 }
 0x381   : > { %v4348_v41 = vadd.f32 %v4347_v22, %v4346_v7  ;;  %v4176_v2 = vpop.f32.mrb[13].mxu0  ;;  %v4448_v19 = vadd.f32 %v4447_v42, %v4446_v21  ;;  %v11794_v22 = vadd.f32 %v8979_v16, %v11687_v39  ;;  %8999 = vmatprep.mubr.msk.bf16.mxu0 %vm13694_vm11, %v4894_v17 }
 0x382   : > { %v11790_v50 = vadd.f32 %v11687_v39, %v4176_v2  ;;  %v8980_v37 = vpop.f32.mrb[14].mxu0 }
 0x383   : > { %v4350_v7 = vadd.f32 %v4349_v6, %v4348_v41  ;;  %v4179_v57 = vpop.f32.mrb[15].mxu0  ;;  %v4450_v56 = vadd.f32 %v4449_v4, %v4448_v19  ;;  %v11806_v16 = vadd.f32 %v8980_v37, %v11687_v39  ;;  %v4355_v6 = vsel %vm13694_vm11, %v11794_v22, 0.0 }
 0x384   : > { %v4351_v53 = vsel %vm13694_vm11, %v11790_v50, 0.0  ;;  %v4410_v21 = vmul.f32 %v11790_v50, %v11790_v50  ;;  %v11801_v42 = vadd.f32 %v11687_v39, %v4179_v57  ;;  %v11816_v57 = vld [vmem:[%s13521_s7] sm:$0xf] }
 0x385   : > { %v4352_v12 = vadd.f32 %v4351_v53, %v4350_v7  ;;  %v4452_v41 = vadd.f32 %v4451_v27, %v4450_v56  ;;  %v4412_v53 = vmul.f32 %v11794_v22, %v11794_v22  ;;  %9926 = vmatprep.subr.msk.bf16.mxu1 %vm13693_vm3, %v11816_v57  ;;  %v4413_v4 = vmul.f32 %v11806_v16, %v11806_v16 }
 0x386   : > { %v4453_v2 = vsel %vm13694_vm11, %v4410_v21, 0.0  ;;  %v4353_v54 = vsel %vm13694_vm11, %v11801_v42, 0.0  ;;  %v4411_v47 = vmul.f32 %v11801_v42, %v11801_v42  ;;  %v4357_v21 = vsel %vm13694_vm11, %v11806_v16, 0.0 }
 0x387   : > { %v4354_v45 = vadd.f32 %v4353_v54, %v4352_v12  ;;  %v4454_v19 = vadd.f32 %v4453_v2, %v4452_v41  ;;  %v4457_v31 = vsel %vm13694_vm11, %v4412_v53, 0.0 }
 0x388   : > { %v4455_v37 = vsel %vm13694_vm11, %v4411_v47, 0.0  ;;  %v8983_v17 = vpop.f32.mrb[16].mxu0 }
 0x389   : > { %v4356_v7 = vadd.f32 %v4355_v6, %v4354_v45  ;;  %v4192_v56 = vpop.f32.mrb[17].mxu0  ;;  %v4456_v27 = vadd.f32 %v4455_v37, %v4454_v19  ;;  %v11834_v41 = vadd.f32 %v8983_v17, %v11687_v39  ;;  %v4459_v37 = vsel %vm13694_vm11, %v4413_v4, 0.0 }
 0x38a   : > { %v11830_v12 = vadd.f32 %v11687_v39, %v4192_v56  ;;  %v8984_v54 = vpop.f32.mrb[18].mxu0 }
 0x38b   : > { %v4358_v2 = vadd.f32 %v4357_v21, %v4356_v7  ;;  %v4195_v47 = vpop.f32.mrb[19].mxu0  ;;  %v4458_v14 = vadd.f32 %v4457_v31, %v4456_v27  ;;  %v11845_v53 = vadd.f32 %v8984_v54, %v11687_v39  ;;  %v4416_v27 = vmul.f32 %v11834_v41, %v11834_v41 }
 0x38c   : > { %v4359_v45 = vsel %vm13694_vm11, %v11830_v12, 0.0  ;;  %v4414_v6 = vmul.f32 %v11830_v12, %v11830_v12  ;;  %v11841_v19 = vadd.f32 %v11687_v39, %v4195_v47  ;;  %v4363_v4 = vsel %vm13694_vm11, %v11834_v41, 0.0 }
 0x38d   : > { %v4360_v56 = vadd.f32 %v4359_v45, %v4358_v2  ;;  %v4460_v17 = vadd.f32 %v4459_v37, %v4458_v14  ;;  %v4417_v14 = vmul.f32 %v11845_v53, %v11845_v53  ;;  %v4365_v48 = vsel %vm13694_vm11, %v11845_v53, 0.0 }
 0x38e   : > { %v4461_v7 = vsel %vm13694_vm11, %v4414_v6, 0.0  ;;  %v4361_v31 = vsel %vm13694_vm11, %v11841_v19, 0.0  ;;  %v4415_v21 = vmul.f32 %v11841_v19, %v11841_v19 }
 0x38f   : > { %v4362_v47 = vadd.f32 %v4361_v31, %v4360_v56  ;;  %v4462_v2 = vadd.f32 %v4461_v7, %v4460_v17  ;;  %v4465_v31 = vsel %vm13694_vm11, %v4416_v27, 0.0 }
 0x390   : > { %v4463_v54 = vsel %vm13694_vm11, %v4415_v21, 0.0  ;;  %v8987_v45 = vpop.f32.mrb[20].mxu0 }
 0x391   : > { %v4364_v6 = vadd.f32 %v4363_v4, %v4362_v47  ;;  %v4208_v37 = vpop.f32.mrb[21].mxu0  ;;  %v4464_v43 = vadd.f32 %v4463_v54, %v4462_v2  ;;  %v11866_v17 = vadd.f32 %v8987_v45, %v11687_v39  ;;  %v4467_v54 = vsel %vm13694_vm11, %v4417_v14, 0.0 }
 0x392   : > { %v11862_v10 = vadd.f32 %v11687_v39, %v4208_v37  ;;  %v8988_v56 = vpop.f32.mrb[22].mxu0 }
 0x393   : > { %v4366_v7 = vadd.f32 %v4365_v48, %v4364_v6  ;;  %v4211_v21 = vpop.f32.mrb[23].mxu0  ;;  %v4466_v36 = vadd.f32 %v4465_v31, %v4464_v43  ;;  %v11877_v27 = vadd.f32 %v8988_v56, %v11687_v39  ;;  %v4420_v31 = vmul.f32 %v11866_v17, %v11866_v17 }
 0x394   : > { %v4367_v47 = vsel %vm13694_vm11, %v11862_v10, 0.0  ;;  %v4418_v4 = vmul.f32 %v11862_v10, %v11862_v10  ;;  %v11873_v2 = vadd.f32 %v11687_v39, %v4211_v21  ;;  %v4371_v14 = vsel %vm13694_vm11, %v11866_v17, 0.0 }
 0x395   : > { %v4368_v37 = vadd.f32 %v4367_v47, %v4366_v7  ;;  %v4468_v45 = vadd.f32 %v4467_v54, %v4466_v36  ;;  %v4421_v36 = vmul.f32 %v11877_v27, %v11877_v27  ;;  %v4373_v32 = vsel %vm13694_vm11, %v11877_v27, 0.0 }
 0x396   : > { %v4469_v48 = vsel %vm13694_vm11, %v4418_v4, 0.0  ;;  %v4369_v43 = vsel %vm13694_vm11, %v11873_v2, 0.0  ;;  %v4419_v6 = vmul.f32 %v11873_v2, %v11873_v2 }
 0x397   : > { %v4370_v21 = vadd.f32 %v4369_v43, %v4368_v37  ;;  %v4470_v7 = vadd.f32 %v4469_v48, %v4468_v45  ;;  %v4473_v43 = vsel %vm13694_vm11, %v4420_v31, 0.0 }
 0x398   : > { %v4471_v56 = vsel %vm13694_vm11, %v4419_v6, 0.0  ;;  %v8991_v47 = vpop.f32.mrb[24].mxu0 }
 0x399   : > { %v4372_v4 = vadd.f32 %v4371_v14, %v4370_v21  ;;  %v4224_v54 = vpop.f32.mrb[25].mxu0  ;;  %v4472_v51 = vadd.f32 %v4471_v56, %v4470_v7  ;;  %v11898_v45 = vadd.f32 %v8991_v47, %v11687_v39  ;;  %v4475_v56 = vsel %vm13694_vm11, %v4421_v36, 0.0 }
 0x39a   : > { %v11894_v25 = vadd.f32 %v11687_v39, %v4224_v54  ;;  %v8992_v37 = vpop.f32.mrb[26].mxu0 }
 0x39b   : > { %v4374_v48 = vadd.f32 %v4373_v32, %v4372_v4  ;;  %v4227_v6 = vpop.f32.mrb[27].mxu0  ;;  %v4474_v29 = vadd.f32 %v4473_v43, %v4472_v51  ;;  %v11909_v31 = vadd.f32 %v8992_v37, %v11687_v39  ;;  %v4424_v43 = vmul.f32 %v11898_v45, %v11898_v45 }
 0x39c   : > { %v4375_v21 = vsel %vm13694_vm11, %v11894_v25, 0.0  ;;  %v4422_v14 = vmul.f32 %v11894_v25, %v11894_v25  ;;  %v11905_v7 = vadd.f32 %v11687_v39, %v4227_v6  ;;  %v4379_v36 = vsel %vm13694_vm11, %v11898_v45, 0.0 }
 0x39d   : > { %v4376_v54 = vadd.f32 %v4375_v21, %v4374_v48  ;;  %v4476_v47 = vadd.f32 %v4475_v56, %v4474_v29  ;;  %v4425_v29 = vmul.f32 %v11909_v31, %v11909_v31  ;;  %v4381_v44 = vsel %vm13694_vm11, %v11909_v31, 0.0 }
 0x39e   : > { %v4477_v32 = vsel %vm13694_vm11, %v4422_v14, 0.0  ;;  %v4377_v51 = vsel %vm13694_vm11, %v11905_v7, 0.0  ;;  %v4423_v4 = vmul.f32 %v11905_v7, %v11905_v7 }
 0x39f   : > { %v4378_v6 = vadd.f32 %v4377_v51, %v4376_v54  ;;  %v4478_v48 = vadd.f32 %v4477_v32, %v4476_v47  ;;  %v4481_v51 = vsel %vm13694_vm11, %v4424_v43, 0.0 }
 0x3a0   : > { %v4479_v37 = vsel %vm13694_vm11, %v4423_v4, 0.0  ;;  %v8995_v21 = vpop.f32.mrb[28].mxu0 }
 0x3a1   : > { %v4380_v14 = vadd.f32 %v4379_v36, %v4378_v6  ;;  %v4240_v56 = vpop.f32.mrb[29].mxu0  ;;  %v4480_v23 = vadd.f32 %v4479_v37, %v4478_v48  ;;  %v11930_v47 = vadd.f32 %v8995_v21, %v11687_v39  ;;  %v4483_v37 = vsel %vm13694_vm11, %v4425_v29, 0.0 }
 0x3a2   : > { %v11926_v18 = vadd.f32 %v11687_v39, %v4240_v56  ;;  %v8996_v54 = vpop.f32.mrb[30].mxu0 }
 0x3a3   : > { %v4382_v32 = vadd.f32 %v4381_v44, %v4380_v14  ;;  %v4243_v4 = vpop.f32.mrb[31].mxu0  ;;  %v4482_v28 = vadd.f32 %v4481_v51, %v4480_v23  ;;  %v11941_v43 = vadd.f32 %v8996_v54, %v11687_v39  ;;  %v4428_v51 = vmul.f32 %v11930_v47, %v11930_v47 }
 0x3a4   : > { %v4383_v6 = vsel %vm13694_vm11, %v11926_v18, 0.0  ;;  %v4426_v36 = vmul.f32 %v11926_v18, %v11926_v18  ;;  %v11937_v48 = vadd.f32 %v11687_v39, %v4243_v4  ;;  %v4387_v29 = vsel %vm13694_vm11, %v11930_v47, 0.0 }
 0x3a5   : > { %v4384_v56 = vadd.f32 %v4383_v6, %v4382_v32  ;;  %v4484_v21 = vadd.f32 %v4483_v37, %v4482_v28  ;;  %v4429_v28 = vmul.f32 %v11941_v43, %v11941_v43  ;;  %v4389_v6 = vsel %vm13694_vm11, %v11941_v43, 0.0 }
 0x3a6   : > { %v4485_v44 = vsel %vm13694_vm11, %v4426_v36, 0.0  ;;  %v4385_v23 = vsel %vm13694_vm11, %v11937_v48, 0.0  ;;  %v4427_v14 = vmul.f32 %v11937_v48, %v11937_v48  ;;  %v4489_v37 = vsel %vm13694_vm11, %v4428_v51, 0.0 }
 0x3a7   : > { %v4386_v4 = vadd.f32 %v4385_v23, %v4384_v56  ;;  %v4486_v32 = vadd.f32 %v4485_v44, %v4484_v21  ;;  %v4491_v56 = vsel %vm13694_vm11, %v4429_v28, 0.0 }
 0x3a8   : > { %v4487_v39 = vsel %vm13694_vm11, %v4427_v14, 0.0 }
 0x3a9   : > { %v4388_v54 = vadd.f32 %v4387_v29, %v4386_v4  ;;  %v4488_v36 = vadd.f32 %v4487_v39, %v4486_v32 }
 0x3ab   : > { %v4390_v24 = vadd.f32 %v4389_v6, %v4388_v54  ;;  %v4490_v60 = vadd.f32 %v4489_v37, %v4488_v36  ;;  %v14144_v36 = vld [vmem:[#allocation7_spill] sm:$0xff] }
 0x3ad   : > { %v4391_v23 = vrot.slane %v4390_v24, 4  ;;  %v4492_v30 = vadd.f32 %v4491_v56, %v4490_v60 }
 0x3af   : > { %v4392_v63 = vadd.f32 %v4391_v23, %v4390_v24  ;;  %v4493_v21 = vrot.slane %v4492_v30, 4 }
 0x3b1   : > { %v4393_v44 = vrot.slane %v4392_v63, 2  ;;  %v4494_v14 = vadd.f32 %v4493_v21, %v4492_v30 }
 0x3b3   : > { %v4394_v8 = vadd.f32 %v4393_v44, %v4392_v63  ;;  %v4495_v26 = vrot.slane %v4494_v14, 2 }
 0x3b5   : > { %v4395_v58 = vrot.slane %v4394_v8, 1  ;;  %v4496_v4 = vadd.f32 %v4495_v26, %v4494_v14 }
 0x3b7   : > { %v4396_v29 = vadd.f32 %v4395_v58, %v4394_v8  ;;  %v4497_v15 = vrot.slane %v4496_v4, 1 }
 0x3b9   : > { %v11959_v52 = vmul.f32 0.00390625, %v4396_v29  ;;  %v4498_v32 = vadd.f32 %v4497_v15, %v4496_v4  ;;  %v12039_v4 = vld [vmem:[%s413_s27] ss:$0 sm:$0xff]  ;;  %s8034_s27 = sshll.u32 %s394_s26, 8 }
 0x3bb   : > { %v4500_v51 = vmul.f32 %v11959_v52, %v11959_v52  ;;  %v4532_v39 = vsub.f32 %v11937_v48, %v11959_v52  ;;  %v4499_v60 = vmul.f32 0.00390625, %v4498_v32  ;;  %v4512_v63 = vsub.f32 %v11763_v59, %v11959_v52 }
 0x3bc   : > { %v4515_v26 = vsub.f32 %v11790_v50, %v11959_v52  ;;  %v4516_v58 = vsub.f32 %v11801_v42, %v11959_v52  ;;  %v4517_v15 = vsub.f32 %v11794_v22, %v11959_v52  ;;  %v4518_v8 = vsub.f32 %v11806_v16, %v11959_v52 }
 0x3bd   : > { %v4501_v24 = vsub.f32 %v4499_v60, %v4500_v51  ;;  %v4519_v48 = vsub.f32 %v11830_v12, %v11959_v52  ;;  %v4520_v28 = vsub.f32 %v11841_v19, %v11959_v52  ;;  %v4521_v59 = vsub.f32 %v11834_v41, %v11959_v52 }
 0x3be   : > { %v4522_v50 = vsub.f32 %v11845_v53, %v11959_v52  ;;  %v4523_v42 = vsub.f32 %v11862_v10, %v11959_v52  ;;  %v4524_v22 = vsub.f32 %v11873_v2, %v11959_v52  ;;  %v4525_v16 = vsub.f32 %v11866_v17, %v11959_v52 }
 0x3bf   : > { %v4502_v30 = vmax.f32 %v4501_v24, 0.0  ;;  %v4526_v41 = vsub.f32 %v11877_v27, %v11959_v52  ;;  %v4527_v19 = vsub.f32 %v11894_v25, %v11959_v52  ;;  %v4528_v10 = vsub.f32 %v11905_v7, %v11959_v52  ;;  %v4325_v25 = vld [vmem:[%s410_s21] sm:$0x1]  ;;  %s10078_s21 = smov [#allocation4]  }
 0x3c0   : > { %v4529_v53 = vsub.f32 %v11898_v45, %v11959_v52  ;;  %v4530_v17 = vsub.f32 %v11909_v31, %v11959_v52  ;;  %v4531_v2 = vsub.f32 %v11926_v18, %v11959_v52  ;;  %v4533_v54 = vsub.f32 %v11930_v47, %v11959_v52  ;;  %s10017_s25 = sshll.u32 %s10078_s21, 4  ;;  %s10018_s25 = int_to_ptr.vmem [resolvable:$false] %s10017_s25 }
 0x3c1   : > { %v4535_v12 = vadd.f32 1e-05, %v4502_v30  ;;  %v4534_v27 = vsub.f32 %v11941_v43, %v11959_v52  ;;  %v4569_v6 = vadd.f32 1.0, %v4325_v25  ;;  %v14145_v7 = vsub.s32 0, %v14144_v36 }
 0x3c2   : > { %v4503_v45 = vsub.f32 %v11693_v35, %v11959_v52  ;;  %v4504_v31 = vsub.f32 %v11701_v61, %v11959_v52  ;;  %v4505_v18 = vsub.f32 %v11690_v0, %v11959_v52  ;;  %v4506_v47 = vsub.f32 %v11698_v1, %v11959_v52 }
 0x3c3   : > { %9979 = vrsqrt.f32 %v4535_v12  ;;  %v12011_v37 = vrot.slane %v4569_v6, %v14145_v7  ;;  %v4507_v43 = vsub.f32 %v11721_v5, %v11959_v52  ;;  %v4508_v56 = vsub.f32 %v11732_v9, %v11959_v52 }
 0x3c4   : > { %v4509_v35 = vsub.f32 %v11724_v34, %v11959_v52  ;;  %v4510_v0 = vsub.f32 %v11735_v49, %v11959_v52  ;;  %v4511_v23 = vsub.f32 %v11752_v38, %v11959_v52  ;;  %v4513_v21 = vsub.f32 %v11756_v40, %v11959_v52 }
 0x3c5   : > { %v4514_v1 = vsub.f32 %v11767_v55, %v11959_v52 }
 0x3cd   : > { %v9980_v61 = vpop.eup %9979 }
 0x3ce   : > { %v4566_v5 = vmul.f32 %v9980_v61, %v4532_v39  ;;  %v4537_v44 = vmul.f32 %v9980_v61, %v4503_v45  ;;  %v4538_v14 = vmul.f32 %v9980_v61, %v4504_v31  ;;  %v4539_v9 = vmul.f32 %v9980_v61, %v4505_v18 }
 0x3cf   : > { %v4540_v34 = vmul.f32 %v9980_v61, %v4506_v47  ;;  %v4541_v29 = vmul.f32 %v9980_v61, %v4507_v43  ;;  %v4542_v32 = vmul.f32 %v9980_v61, %v4508_v56  ;;  %v4543_v51 = vmul.f32 %v9980_v61, %v4509_v35 }
 0x3d0   : > { %v4605_v49 = vmul.f32 %v12011_v37, %v4566_v5  ;;  %v4544_v60 = vmul.f32 %v9980_v61, %v4510_v0  ;;  %v4545_v38 = vmul.f32 %v9980_v61, %v4511_v23  ;;  %v4546_v24 = vmul.f32 %v9980_v61, %v4512_v63 }
 0x3d1   : > { %v4547_v30 = vmul.f32 %v9980_v61, %v4513_v21  ;;  %v4548_v40 = vmul.f32 %v9980_v61, %v4514_v1  ;;  %v4549_v12 = vmul.f32 %v9980_v61, %v4515_v26  ;;  %v4550_v25 = vmul.f32 %v9980_v61, %v4516_v58 }
 0x3d2   : > { %v4643_v52 = vadd.f32 %v12039_v4, %v4605_v49  ;;  %v4551_v55 = vmul.f32 %v9980_v61, %v4517_v15  ;;  %v4552_v39 = vmul.f32 %v9980_v61, %v4518_v8  ;;  %v4553_v6 = vmul.f32 %v9980_v61, %v4519_v48 }
 0x3d3   : > { %v4554_v36 = vmul.f32 %v9980_v61, %v4520_v28  ;;  %v4555_v7 = vmul.f32 %v9980_v61, %v4521_v59  ;;  %v4556_v45 = vmul.f32 %v9980_v61, %v4522_v50  ;;  %v4557_v31 = vmul.f32 %v9980_v61, %v4523_v42 }
 0x3d4   : > { %vm4675_vm0 = vcmp.ge.f32.partialorder %v4643_v52, 0.0  ;;  %v4707_v18 = vmul.f32 0.2, %v4643_v52  ;;  %v4558_v47 = vmul.f32 %v9980_v61, %v4524_v22  ;;  %v4559_v43 = vmul.f32 %v9980_v61, %v4525_v16 }
 0x3d5   : > { %v4560_v56 = vmul.f32 %v9980_v61, %v4526_v41  ;;  %v4561_v35 = vmul.f32 %v9980_v61, %v4527_v19  ;;  %v4562_v63 = vmul.f32 %v9980_v61, %v4528_v10  ;;  %v4563_v0 = vmul.f32 %v9980_v61, %v4529_v53 }
 0x3d6   : > { %v4739_v23 = vsel %vm4675_vm0, %v4643_v52, %v4707_v18  ;;  %v4564_v26 = vmul.f32 %v9980_v61, %v4530_v17  ;;  %v4565_v58 = vmul.f32 %v9980_v61, %v4531_v2  ;;  %v4567_v21 = vmul.f32 %v9980_v61, %v4533_v54 }
 0x3d7   : > { %4778 = vst.msk [vmem:[#allocation3 + $0x100] sm:$0xff] %vm13694_vm11, %v4739_v23  ;;  %v4568_v15 = vmul.f32 %v9980_v61, %v4534_v27  ;;  %v4576_v8 = vmul.f32 %v12011_v37, %v4537_v44  ;;  %v4577_v48 = vmul.f32 %v12011_v37, %v4538_v14  ;;  %v4578_v28 = vmul.f32 %v12011_v37, %v4539_v9 }
 0x3d8   : > { %v4579_v59 = vmul.f32 %v12011_v37, %v4540_v34  ;;  %v4580_v50 = vmul.f32 %v12011_v37, %v4541_v29  ;;  %v4581_v42 = vmul.f32 %v12011_v37, %v4542_v32  ;;  %v4582_v22 = vmul.f32 %v12011_v37, %v4543_v51 }
 0x3d9   : > { %v4583_v16 = vmul.f32 %v12011_v37, %v4544_v60  ;;  %v4584_v41 = vmul.f32 %v12011_v37, %v4545_v38  ;;  %v4585_v19 = vmul.f32 %v12011_v37, %v4546_v24  ;;  %v4586_v10 = vmul.f32 %v12011_v37, %v4547_v30 }
 0x3da   : > { %v4587_v53 = vmul.f32 %v12011_v37, %v4548_v40  ;;  %v4588_v17 = vmul.f32 %v12011_v37, %v4549_v12  ;;  %v4589_v2 = vmul.f32 %v12011_v37, %v4550_v25  ;;  %v4590_v54 = vmul.f32 %v12011_v37, %v4551_v55 }
 0x3db   : > { %v4591_v27 = vmul.f32 %v12011_v37, %v4552_v39  ;;  %v4592_v61 = vmul.f32 %v12011_v37, %v4553_v6  ;;  %v4593_v1 = vmul.f32 %v12011_v37, %v4554_v36  ;;  %v4594_v5 = vmul.f32 %v12011_v37, %v4555_v7 }
 0x3dc   : > { %v4595_v44 = vmul.f32 %v12011_v37, %v4556_v45  ;;  %v4596_v14 = vmul.f32 %v12011_v37, %v4557_v31  ;;  %v4597_v9 = vmul.f32 %v12011_v37, %v4558_v47  ;;  %v4598_v34 = vmul.f32 %v12011_v37, %v4559_v43 }
 0x3dd   : > { %v4599_v29 = vmul.f32 %v12011_v37, %v4560_v56  ;;  %v4600_v32 = vmul.f32 %v12011_v37, %v4561_v35  ;;  %v4601_v51 = vmul.f32 %v12011_v37, %v4562_v63  ;;  %v4602_v49 = vmul.f32 %v12011_v37, %v4563_v0 }
 0x3de   : > { %v4603_v60 = vmul.f32 %v12011_v37, %v4564_v26  ;;  %v4604_v38 = vmul.f32 %v12011_v37, %v4565_v58  ;;  %v4606_v24 = vmul.f32 %v12011_v37, %v4567_v21  ;;  %v4607_v30 = vmul.f32 %v12011_v37, %v4568_v15 }
 0x3df   : > { %v4614_v40 = vadd.f32 %v12039_v4, %v4576_v8  ;;  %v12077_v12 = vadd.f32 %v12039_v4, %v4577_v48  ;;  %v12080_v25 = vadd.f32 %v12039_v4, %v4578_v28  ;;  %v12083_v52 = vadd.f32 %v12039_v4, %v4579_v59 }
 0x3e0   : > { %v12086_v55 = vadd.f32 %v12039_v4, %v4580_v50  ;;  %v12089_v39 = vadd.f32 %v12039_v4, %v4581_v42  ;;  %v12092_v6 = vadd.f32 %v12039_v4, %v4582_v22  ;;  %v12095_v37 = vadd.f32 %v12039_v4, %v4583_v16 }
 0x3e1   : > { %v12098_v36 = vadd.f32 %v12039_v4, %v4584_v41  ;;  %v12101_v7 = vadd.f32 %v12039_v4, %v4585_v19  ;;  %v12104_v45 = vadd.f32 %v12039_v4, %v4586_v10  ;;  %v12107_v31 = vadd.f32 %v12039_v4, %v4587_v53 }
 0x3e2   : > { %v12110_v18 = vadd.f32 %v12039_v4, %v4588_v17  ;;  %v12113_v47 = vadd.f32 %v12039_v4, %v4589_v2  ;;  %v12116_v43 = vadd.f32 %v12039_v4, %v4590_v54  ;;  %v12119_v56 = vadd.f32 %v12039_v4, %v4591_v27 }
 0x3e3   : > { %v12122_v35 = vadd.f32 %v12039_v4, %v4592_v61  ;;  %v12125_v63 = vadd.f32 %v12039_v4, %v4593_v1  ;;  %v12128_v0 = vadd.f32 %v12039_v4, %v4594_v5  ;;  %v12131_v23 = vadd.f32 %v12039_v4, %v4595_v44 }
 0x3e4   : > { %v12134_v26 = vadd.f32 %v12039_v4, %v4596_v14  ;;  %v12137_v58 = vadd.f32 %v12039_v4, %v4597_v9  ;;  %v12140_v21 = vadd.f32 %v12039_v4, %v4598_v34  ;;  %v12143_v15 = vadd.f32 %v12039_v4, %v4599_v29 }
 0x3e5   : > { %v12146_v8 = vadd.f32 %v12039_v4, %v4600_v32  ;;  %v12149_v48 = vadd.f32 %v12039_v4, %v4601_v51  ;;  %v12152_v28 = vadd.f32 %v12039_v4, %v4602_v49  ;;  %v12155_v59 = vadd.f32 %v12039_v4, %v4603_v60 }
 0x3e6   : > { %v12158_v50 = vadd.f32 %v12039_v4, %v4604_v38  ;;  %v12161_v42 = vadd.f32 %v12039_v4, %v4606_v24  ;;  %vm4650_vm4 = vcmp.ge.f32.partialorder %v12086_v55, 0.0  ;;  %vm4651_vm9 = vcmp.ge.f32.partialorder %v12089_v39, 0.0 }
 0x3e7   : > { %vm4652_vm15 = vcmp.ge.f32.partialorder %v12092_v6, 0.0  ;;  %v4678_v22 = vmul.f32 0.2, %v4614_v40  ;;  %v4679_v16 = vmul.f32 0.2, %v12077_v12  ;;  %v12178_v41 = vadd.f32 %v12039_v4, %v4607_v30 }
 0x3e8   : > { %v4680_v19 = vmul.f32 0.2, %v12080_v25  ;;  %v4681_v10 = vmul.f32 0.2, %v12083_v52  ;;  %v4682_v53 = vmul.f32 0.2, %v12086_v55 }
 0x3e9   : > { %v4683_v4 = vmul.f32 0.2, %v12089_v39  ;;  %v4684_v17 = vmul.f32 0.2, %v12092_v6  ;;  %v4685_v2 = vmul.f32 0.2, %v12095_v37 }
 0x3ea   : > { %vm14146_vm12 = vcmp.ge.f32.partialorder %v4614_v40, 0.0  ;;  %v4686_v27 = vmul.f32 0.2, %v12098_v36  ;;  %v4687_v61 = vmul.f32 0.2, %v12101_v7  ;;  %vm14147_vm13 = vcmp.ge.f32.partialorder %v12077_v12, 0.0 }
 0x3eb   : > { %v4710_v54 = vsel %vm14146_vm12, %v4614_v40, %v4678_v22  ;;  %v4688_v1 = vmul.f32 0.2, %v12104_v45  ;;  %v4711_v5 = vsel %vm14147_vm13, %v12077_v12, %v4679_v16  ;;  %vm14148_vm0 = vcmask 64512  }
 0x3ec   : > { %4749 = vst.msk [vmem:[#allocation3 + $0x18] sm:$0xff] %vm14148_vm0, %v4710_v54  ;;  %vm4672_vm12 = vcmp.ge.f32.partialorder %v12152_v28, 0.0  ;;  %vm4673_vm2 = vcmp.ge.f32.partialorder %v12155_v59, 0.0  ;;  %v4689_v44 = vmul.f32 0.2, %v12107_v31  ;;  %vm14149_vm1 = vcmp.ge.f32.partialorder %v12080_v25, 0.0  ;;  %vm14150_vm13 = vmmov %vm14148_vm0 }
 0x3ed   : > { %v4690_v14 = vmul.f32 0.2, %v12110_v18  ;;  %v4691_v9 = vmul.f32 0.2, %v12113_v47  ;;  %v4712_v34 = vsel %vm14149_vm1, %v12080_v25, %v4680_v19  ;;  %4750 = vst.msk [vmem:[#allocation3 + $0x20] sm:$0xff] %vm14150_vm13, %v4711_v5  ;;  %vm14151_vm3 = vcmp.ge.f32.partialorder %v12083_v52, 0.0  ;;  %vm14152_vm11 = vmmov %vm14148_vm0 }
 0x3ee   : > { %v4692_v29 = vmul.f32 0.2, %v12116_v43  ;;  %v4693_v32 = vmul.f32 0.2, %v12119_v56  ;;  %v4694_v51 = vmul.f32 0.2, %v12122_v35  ;;  %v4713_v49 = vsel %vm14151_vm3, %v12083_v52, %v4681_v10  ;;  %vm14153_vm1 = vmmov %vm14148_vm0 }
 0x3ef   : > { %4751 = vst.msk [vmem:[#allocation3 + $0x28] sm:$0xff] %vm14152_vm11, %v4712_v34  ;;  %v4695_v60 = vmul.f32 0.2, %v12125_v63  ;;  %v4696_v38 = vmul.f32 0.2, %v12128_v0  ;;  %v4714_v30 = vsel %vm4650_vm4, %v12086_v55, %v4682_v53  ;;  %v4715_v52 = vsel %vm4651_vm9, %v12089_v39, %v4683_v4  ;;  %vm14154_vm11 = vmmov %vm14148_vm0 }
 0x3f0   : > { %v4697_v24 = vmul.f32 0.2, %v12131_v23  ;;  %4752 = vst.msk [vmem:[#allocation3 + $0x30] sm:$0xff] %vm14153_vm1, %v4713_v49  ;;  %v4698_v40 = vmul.f32 0.2, %v12134_v26  ;;  %v4716_v19 = vsel %vm4652_vm15, %v12092_v6, %v4684_v17  ;;  %vm14155_vm4 = vmmov %vm14148_vm0  ;;  %vm14156_vm9 = vcmp.ge.f32.partialorder %v12095_v37, 0.0 }
 0x3f1   : > { %v4699_v12 = vmul.f32 0.2, %v12137_v58  ;;  %v4700_v25 = vmul.f32 0.2, %v12140_v21  ;;  %4753 = vst.msk [vmem:[#allocation3 + $0x38] sm:$0xff] %vm14154_vm11, %v4714_v30  ;;  %v4717_v4 = vsel %vm14156_vm9, %v12095_v37, %v4685_v2  ;;  %vm14157_vm3 = vmmov %vm14148_vm0  ;;  %vm14158_vm15 = vcmp.ge.f32.partialorder %v12098_v36, 0.0 }
 0x3f2   : > { %v4701_v22 = vmul.f32 0.2, %v12143_v15  ;;  %v4702_v16 = vmul.f32 0.2, %v12146_v8  ;;  %v4703_v55 = vmul.f32 0.2, %v12149_v48  ;;  %v4718_v6 = vsel %vm14158_vm15, %v12098_v36, %v4686_v27  ;;  %vm14160_vm1 = vmmov %vm14148_vm0 }
 0x3f3   : > { %4754 = vst.msk [vmem:[#allocation3 + $0x40] sm:$0xff] %vm14155_vm4, %v4715_v52  ;;  %v4704_v10 = vmul.f32 0.2, %v12152_v28  ;;  %v4705_v53 = vmul.f32 0.2, %v12155_v59  ;;  %vm14159_vm13 = vcmp.ge.f32.partialorder %v12101_v7, 0.0  ;;  %vm14165_vm15 = vmmov %vm14148_vm0 }
 0x3f4   : > { %v4706_v39 = vmul.f32 0.2, %v12158_v50  ;;  %4755 = vst.msk [vmem:[#allocation3 + $0x48] sm:$0xff] %vm14157_vm3, %v4716_v19  ;;  %v4708_v54 = vmul.f32 0.2, %v12161_v42  ;;  %v4719_v17 = vsel %vm14159_vm13, %v12101_v7, %v4687_v61  ;;  %vm14161_vm11 = vcmp.ge.f32.partialorder %v12104_v45, 0.0  ;;  %vm14166_vm13 = vmmov %vm14148_vm0 }
 0x3f5   : > { %v4709_v5 = vmul.f32 0.2, %v12178_v41  ;;  %4756 = vst.msk [vmem:[#allocation3 + $0x50] sm:$0xff] %vm14160_vm1, %v4717_v4  ;;  %v4720_v37 = vsel %vm14161_vm11, %v12104_v45, %v4688_v1  ;;  %vm14162_vm4 = vcmp.ge.f32.partialorder %v12107_v31, 0.0  ;;  %vm14163_vm9 = vcmp.ge.f32.partialorder %v12110_v18, 0.0 }
 0x3f6   : > { %v4721_v2 = vsel %vm14162_vm4, %v12107_v31, %v4689_v44  ;;  %v4722_v34 = vsel %vm14163_vm9, %v12110_v18, %v4690_v14  ;;  %vm14164_vm3 = vcmp.ge.f32.partialorder %v12113_v47, 0.0  ;;  %4757 = vst.msk [vmem:[#allocation3 + $0x58] sm:$0xff] %vm14165_vm15, %v4718_v6  ;;  %vm14167_vm1 = vcmp.ge.f32.partialorder %v12116_v43, 0.0  ;;  %vm14172_vm15 = vmmov %vm14148_vm0  ;;  %v4866_v27 = vld [vmem:[#allocation3 + $0x28] sm:$0xff] }
 0x3f7   : > { %v4723_v36 = vsel %vm14164_vm3, %v12113_v47, %v4691_v9  ;;  %4758 = vst.msk [vmem:[#allocation3 + $0x60] sm:$0xff] %vm14166_vm13, %v4719_v17  ;;  %v4724_v7 = vsel %vm14167_vm1, %v12116_v43, %v4692_v29  ;;  %vm14168_vm11 = vcmp.ge.f32.partialorder %v12119_v56, 0.0  ;;  %vm14169_vm4 = vcmp.ge.f32.partialorder %v12122_v35, 0.0  ;;  %vm14171_vm3 = vmmov %vm14148_vm0  ;;  %v4864_v47 = vld [vmem:[#allocation3 + $0x18] sm:$0xff]  ;;  %v4867_v61 = vld [vmem:[#allocation3 + $0x30] sm:$0xff] }
 0x3f8   : > { %v4725_v45 = vsel %vm14168_vm11, %v12119_v56, %v4693_v32  ;;  %v4726_v31 = vsel %vm14169_vm4, %v12122_v35, %v4694_v51  ;;  %vm14170_vm9 = vcmp.ge.f32.partialorder %v12125_v63, 0.0  ;;  %4759 = vst.msk [vmem:[#allocation3 + $0x68] sm:$0xff] %vm14171_vm3, %v4720_v37  ;;  %vm14173_vm13 = vmmov %vm14148_vm0  ;;  %vm14174_vm1 = vcmp.ge.f32.partialorder %v12128_v0, 0.0  ;;  %v12358_v44 = vld [vmem:[#allocation3 + $0x27] sm:$0xff]  ;;  %v12360_v14 = vld [vmem:[#allocation3 + $0x37] sm:$0xff] }
 0x3f9   : > { %v4727_v18 = vsel %vm14170_vm9, %v12125_v63, %v4695_v60  ;;  %4760 = vst.msk [vmem:[#allocation3 + $0x70] sm:$0xff] %vm14172_vm15, %v4721_v2  ;;  %v4728_v43 = vsel %vm14174_vm1, %v12128_v0, %v4696_v38  ;;  %vm14175_vm11 = vcmp.ge.f32.partialorder %v12131_v23, 0.0  ;;  %vm14176_vm4 = vcmp.ge.f32.partialorder %v12134_v26, 0.0  ;;  %vm14178_vm3 = vmmov %vm14148_vm0  ;;  %v4865_v0 = vld [vmem:[#allocation3 + $0x20] sm:$0xff]  ;;  %v4868_v9 = vld [vmem:[#allocation3 + $0x38] sm:$0xff] }
 0x3fa   : > { %4761 = vst.msk [vmem:[#allocation3 + $0x78] sm:$0xff] %vm14173_vm13, %v4722_v34  ;;  %v4729_v56 = vsel %vm14175_vm11, %v12131_v23, %v4697_v24  ;;  %v4730_v35 = vsel %vm14176_vm4, %v12134_v26, %v4698_v40  ;;  %vm14177_vm9 = vcmp.ge.f32.partialorder %v12137_v58, 0.0  ;;  %vm14179_vm15 = vmmov %vm14148_vm0  ;;  %vm14181_vm1 = vcmp.ge.f32.partialorder %v12140_v21, 0.0  ;;  %v4869_v29 = vld [vmem:[#allocation3 + $0x40] sm:$0xff]  ;;  %v12364_v32 = vld [vmem:[#allocation3 + $0x2f] sm:$0xff] }
 0x3fb   : > { %4762 = vst.msk [vmem:[#allocation3 + $0x80] sm:$0xff] %vm14148_vm0, %v4723_v36  ;;  %v4731_v63 = vsel %vm14177_vm9, %v12137_v58, %v4699_v12  ;;  %4764 = vst.msk [vmem:[#allocation3 + $0x90] sm:$0xff] %vm14148_vm0, %v4725_v45  ;;  %v4732_v23 = vsel %vm14181_vm1, %v12140_v21, %v4700_v25  ;;  %vm14182_vm11 = vcmp.ge.f32.partialorder %v12143_v15, 0.0  ;;  %vm14183_vm4 = vcmp.ge.f32.partialorder %v12146_v8, 0.0  ;;  %v12366_v51 = vld [vmem:[#allocation3 + $0x3f] sm:$0xff]  ;;  %v12368_v49 = vld [vmem:[#allocation3 + $0x47] sm:$0xff] }
 0x3fc   : > { %4763 = vst.msk [vmem:[#allocation3 + $0x88] sm:$0xff] %vm14178_vm3, %v4724_v7  ;;  %vm14180_vm13 = vmmov %vm14148_vm0  ;;  %v4733_v26 = vsel %vm14182_vm11, %v12143_v15, %v4701_v22  ;;  %v4734_v58 = vsel %vm14183_vm4, %v12146_v8, %v4702_v16  ;;  %vm14184_vm9 = vcmp.ge.f32.partialorder %v12149_v48, 0.0  ;;  %v4736_v21 = vsel %vm4672_vm12, %v12152_v28, %v4704_v10  ;;  %v4870_v30 = vld [vmem:[#allocation3 + $0x48] sm:$0xff]  ;;  %v4871_v19 = vld [vmem:[#allocation3 + $0x50] sm:$0xff] }
 0x3fd   : > { %4765 = vst.msk [vmem:[#allocation3 + $0x98] sm:$0xff] %vm14179_vm15, %v4726_v31  ;;  %v4735_v1 = vsel %vm14184_vm9, %v12149_v48, %v4703_v55  ;;  %vm14185_vm3 = vmmov %vm14148_vm0  ;;  %v4737_v15 = vsel %vm4673_vm2, %v12155_v59, %v4705_v53  ;;  %vm14188_vm1 = vcmp.ge.f32.partialorder %v12158_v50, 0.0  ;;  %vm14189_vm11 = vcmp.ge.f32.partialorder %v12161_v42, 0.0  ;;  %v12379_v10 = vld [vmem:[#allocation3 + $0x4f] sm:$0xff]  ;;  %v12381_v53 = vld [vmem:[#allocation3 + $0x57] sm:$0xff] }
 0x3fe   : > { %4766 = vst.msk [vmem:[#allocation3 + $0xa0] sm:$0xff] %vm14180_vm13, %v4727_v18  ;;  %vm14186_vm15 = vmmov %vm14148_vm0  ;;  %v4738_v8 = vsel %vm14188_vm1, %v12158_v50, %v4706_v39  ;;  %v4740_v48 = vsel %vm14189_vm11, %v12161_v42, %v4708_v54  ;;  %vm14193_vm12 = vcmp.ge.f32.partialorder %v12178_v41, 0.0  ;;  %v12347_v59 = vpack.c.bf16 %v4865_v0, %v4864_v47  ;;  %v12352_v42 = vld [vmem:[#allocation3 + $0x17] sm:$0xff]  ;;  %v12418_v36 = vld [vmem:[#allocation3 + $0x5f] sm:$0xff] }
 0x3ff   : > { %4767 = vst.msk [vmem:[#allocation3 + $0xa8] sm:$0xff] %vm14185_vm3, %v4728_v43  ;;  %vm14187_vm13 = vmmov %vm14148_vm0  ;;  %v4741_v28 = vsel %vm14193_vm12, %v12178_v41, %v4709_v5  ;;  %v12349_v50 = vpack.c.bf16 %v4867_v61, %v4866_v27  ;;  %v12356_v41 = vld [vmem:[#allocation3 + $0x1f] sm:$0xff]  ;;  %v5695_v22 = vsel %vm14033_vm14, %v12352_v42, 0.0  ;;  %v12393_v54 = vld [vmem:[%s13521_s7 + $0x8] sm:$0xf]  ;;  %v5699_v5 = vsel %vm10807_vm6, %v12360_v14, 0.0 }
 0x400   : > { %4768 = vst.msk [vmem:[#allocation3 + $0xb0] sm:$0xff] %vm14148_vm0, %v4729_v56  ;;  %vm14190_vm4 = vmmov %vm14148_vm0  ;;  %v12384_v39 = vpack.c.bf16 %v12356_v41, %v5695_v22  ;;  %v5701_v6 = vsel %vm10833_vm7, %v12368_v49, 0.0  ;;  %v12406_v17 = vpack.c.bf16 %v4869_v29, %v4868_v9  ;;  %v12412_v2 = vpack.c.bf16 %v12366_v51, %v5699_v5  ;;  %v12420_v7 = vld [vmem:[#allocation3 + $0x67] sm:$0xff]  ;;  %v12432_v18 = vld [vmem:[#allocation3 + $0x6f] sm:$0xff] }
 0x401   : > { %4769 = vst.msk [vmem:[#allocation3 + $0xb8] sm:$0xff] %vm14186_vm15, %v4730_v35  ;;  %vm14191_vm9 = vmmov %vm14148_vm0  ;;  %v12416_v34 = vpack.c.bf16 %v4871_v19, %v4870_v30  ;;  %v12423_v45 = vpack.c.bf16 %v12379_v10, %v5701_v6  ;;  %v5703_v31 = vsel %vm10841_vm8, %v12381_v53, 0.0  ;;  %v12434_v47 = vld [vmem:[#allocation3 + $0x77] sm:$0xff]  ;;  %v5705_v27 = vsel %vm10870_vm10, %v12420_v7, 0.0  ;;  %v4874_v9 = vld [vmem:[#allocation3 + $0x68] sm:$0xff] }
 0x402   : > { %4770 = vst.msk [vmem:[#allocation3 + $0xc0] sm:$0xff] %vm14187_vm13, %v4731_v63  ;;  %vm14192_vm3 = vmmov %vm14148_vm0  ;;  %v4879_v38 = vld [vmem:[#allocation3 + $0x90] sm:$0xff]  ;;  %v12436_v43 = vld [vmem:[#allocation3 + $0x7f] sm:$0xff]  ;;  %v12439_v56 = vpack.c.bf16 %v12418_v36, %v5703_v31  ;;  %v6649_v11 = vsel %vm10841_vm8, %v12420_v7, 0.0  ;;  %v4823_v3 = vsel %vm10870_vm10, %v12381_v53, 0.0 }
 0x403   : > { %4771 = vst.msk [vmem:[#allocation3 + $0xc8] sm:$0xff] %vm14190_vm4, %v4732_v23  ;;  %vm14194_vm2 = vmmov %vm14148_vm0  ;;  %v4878_v60 = vld [vmem:[#allocation3 + $0x88] sm:$0xff]  ;;  %v4875_v29 = vld [vmem:[#allocation3 + $0x70] sm:$0xff] }
 0x404   : > { %4772 = vst.msk [vmem:[#allocation3 + $0xd0] sm:$0xff] %vm14191_vm9, %v4733_v26  ;;  %vm14195_vm15 = vmmov %vm14148_vm0  ;;  %v4880_v24 = vld [vmem:[#allocation3 + $0x98] sm:$0xff]  ;;  %v12370_v40 = vpack.c.bf16 %v4879_v38, %v4878_v60  ;;  %v12443_v0 = vld [vmem:[#allocation3 + $0x87] sm:$0xff] }
 0x405   : > { %4773 = vst.msk [vmem:[#allocation3 + $0xd8] sm:$0xff] %vm14192_vm3, %v4734_v58  ;;  %vm14196_vm13 = vmmov %vm14148_vm0  ;;  %v4881_v12 = vld [vmem:[#allocation3 + $0xa0] sm:$0xff]  ;;  %vm14205_vm3 = vcmask 1043456   ;;  %v12451_v58 = vld [vmem:[#allocation3 + $0x8f] sm:$0xff] }
 0x406   : > { %4774 = vst.msk [vmem:[#allocation3 + $0xe0] sm:$0xff] %vm14148_vm0, %v4735_v1  ;;  %vm14197_vm1 = vmmov %vm14148_vm0  ;;  %v4882_v25 = vld [vmem:[#allocation3 + $0xa8] sm:$0xff]  ;;  %v12375_v16 = vpack.c.bf16 %v4881_v12, %v4880_v24  ;;  %v5174_v55 = vsel %vm14205_vm3, %v11816_v57, 0  ;;  %9015 = vmatprep.mubr.msk.bf16.mxu1 %vm14148_vm0, %v12370_v40  ;;  %v5697_v57 = vsel %vm10800_vm5, %v12358_v44, 0.0  ;;  %v12454_v1 = vpack.c.bf16 %v12432_v18, %v5705_v27  ;;  %v12463_v60 = vld [vmem:[#allocation3 + $0x9f] sm:$0xff] }
 0x407   : > { %4775 = vst.msk [vmem:[#allocation3 + $0xe8] sm:$0xff] %vm14194_vm2, %v4736_v21  ;;  %14198 = vst [vmem:[#allocation9_spill] sm:$0xff] %v12347_v59  ;;  %v4883_v52 = vld [vmem:[#allocation3 + $0xb0] sm:$0xff]  ;;  %v12409_v37 = vpack.c.bf16 %v12364_v32, %v5697_v57  ;;  %v4872_v21 = vld [vmem:[#allocation3 + $0x58] sm:$0xff]  ;;  %v12486_v57 = vpack.c.bf16 %v4875_v29, %v4874_v9 }
 0x408   : > { %4776 = vst.msk [vmem:[#allocation3 + $0xf0] sm:$0xff] %vm14195_vm15, %v4737_v15  ;;  %14199 = vst [vmem:[#allocation10_spill] sm:$0xff] %v12349_v50  ;;  %v12388_v4 = vpack.c.bf16 %v4883_v52, %v4882_v25  ;;  %v4884_v35 = vld [vmem:[#allocation3 + $0xb8] sm:$0xff]  ;;  %v4873_v15 = vld [vmem:[#allocation3 + $0x60] sm:$0xff] }
 0x409   : > { %4777 = vst.msk [vmem:[#allocation3 + $0xf8] sm:$0xff] %vm14196_vm13, %v4738_v8  ;;  %vm14200_vm11 = vmmov %vm14148_vm0  ;;  %v4885_v63 = vld [vmem:[#allocation3 + $0xc0] sm:$0xff]  ;;  %v12456_v8 = vld [vmem:[#allocation3 + $0x97] sm:$0xff]  ;;  %v12477_v52 = vpack.c.bf16 %v4873_v15, %v4872_v21 }
 0x40a   : > { %4779 = vst.msk [vmem:[#allocation3 + $0x108] sm:$0xff] %vm14197_vm1, %v4740_v48  ;;  %vm14201_vm4 = vmmov %vm14148_vm0  ;;  %v4886_v23 = vld [vmem:[#allocation3 + $0xc8] sm:$0xff]  ;;  %v12488_v5 = vld [vmem:[#allocation3 + $0xb7] sm:$0xff] }
 0x40b   : > { %4780 = vst.msk [vmem:[#allocation3 + $0x110] sm:$0xff] %vm14200_vm11, %v4741_v28  ;;  %9000 = vmatmul.mubr.msk.bf16.vlgmr.msra.gmra.mrb[32].mxu0 %vm14201_vm4, %v12347_v59  ;;  %vm14202_vm9 = vmmov %vm14148_vm0  ;;  %vm14219_vm11 = vnez %v13796_v46  ;;  %v4887_v26 = vld [vmem:[#allocation3 + $0xd0] sm:$0xff]  ;;  %v12461_v28 = vpack.c.bf16 %v4885_v63, %v4884_v35  ;;  %v14224_v38 = vld [vmem:[#allocation14_spill] sm:$0xff] }
 0x40c   : > { %9003 = vmatprep.mubr.msk.bf16.mxu0 %vm14202_vm9, %v12349_v50  ;;  %14203 = vst [vmem:[#allocation12_spill] sm:$0xff] %v12370_v40  ;;  %14204 = vst [vmem:[#allocation27_spill] sm:$0xff] %v12375_v16  ;;  %v5707_v61 = vsel %vm14219_vm11, %v12434_v47, 0.0  ;;  %vm14225_vm4 = vnez %v14224_v38  ;;  %v12468_v30 = vpack.c.bf16 %v4887_v26, %v4886_v23  ;;  %v12470_v12 = vld [vmem:[#allocation3 + $0xa7] sm:$0xff]  ;;  %v12479_v22 = vld [vmem:[#allocation3 + $0xaf] sm:$0xff] }
 0x40d   : > { %14206 = vst [vmem:[#allocation30_spill] sm:$0xff] %v12384_v39  ;;  %14207 = vst [vmem:[#allocation29_spill] sm:$0xff] %v12388_v4  ;;  %v12459_v48 = vpack.c.bf16 %v12436_v43, %v5707_v61  ;;  %v5709_v24 = vsel %vm14225_vm4, %v12443_v0, 0.0  ;;  %v4781_v31 = vld [vmem:[#allocation3 + $0x7] sm:$0xff]  ;;  %v12495_v35 = vld [vmem:[#allocation3 + $0xbf] sm:$0xff] }
 0x40e   : > { %vm14208_vm12 = vmmov %vm14148_vm0  ;;  %14209 = vst [vmem:[#allocation31_spill] sm:$0xff] %v12406_v17  ;;  %v12473_v25 = vpack.c.bf16 %v12451_v58, %v5709_v24  ;;  %v14238_v63 = vld [vmem:[#allocation16_spill] sm:$0xff]  ;;  %v4889_v23 = vld [vmem:[#allocation3 + $0xe0] sm:$0xff] }
 0x40f   : > { %9016 = vmatmul.mubr.msk.bf16.vlgmr.msra.gmra.mrb[0].mxu1 %vm14208_vm12, %v12375_v16  ;;  %14210 = vst [vmem:[#allocation51_spill] sm:$0xff] %v12409_v37  ;;  %14211 = vst [vmem:[#allocation49_spill] sm:$0xff] %v12412_v2  ;;  %v4888_v61 = vld [vmem:[#allocation3 + $0xd8] sm:$0xff]  ;;  %v12502_v26 = vld [vmem:[#allocation3 + $0xc7] sm:$0xff] }
 0x410   : > { %9032 = vmatpush3.bf16.msra.mxu1 %v5174_v55  ;;  %vm14212_vm2 = vmmov %vm14148_vm0  ;;  %14213 = vst [vmem:[#allocation54_spill] sm:$0xff] %v12416_v34  ;;  %v14231_v55 = vld [vmem:[#allocation15_spill] sm:$0xff]  ;;  %v4890_v15 = vld [vmem:[#allocation3 + $0xe8] sm:$0xff]  ;;  %v12517_v40 = vpack.c.bf16 %v4889_v23, %v4888_v61 }
 0x411   : > { %9019 = vmatprep.mubr.msk.bf16.mxu1 %vm14212_vm2, %v12388_v4  ;;  %14214 = vst [vmem:[#allocation53_spill] sm:$0xff] %v12423_v45  ;;  %vm14215_vm15 = vmmov %vm14148_vm0  ;;  %vm14239_vm2 = vnez %v14238_v63  ;;  %v4891_v9 = vld [vmem:[#allocation3 + $0xf0] sm:$0xff]  ;;  %v14244_v24 = vld [vmem:[#allocation17_spill] sm:$0xff] }
 0x412   : > { %vm14216_vm13 = vmmov %vm14205_vm3  ;;  %14217 = vst [vmem:[#allocation57_spill] sm:$0xff] %v12439_v56  ;;  %vm14232_vm3 = vnez %v14231_v55  ;;  %v5713_v27 = vsel %vm14239_vm2, %v12470_v12, 0.0  ;;  %v12507_v29 = vld [vmem:[#allocation3 + $0xcf] sm:$0xff]  ;;  %v12512_v4 = vld [vmem:[#allocation3 + $0xd7] sm:$0xff]  ;;  %v12524_v50 = vpack.c.bf16 %v4891_v9, %v4890_v15 }
 0x413   : > { %9004 = vmatmul.mubr.msk.bf16.gmra.mrb[36].mxu0 %vm14215_vm15, %v12406_v17  ;;  %9927 = vmatprep.subr.msk.bf16.mxu1 %vm14216_vm13, %v12393_v54  ;;  %vm14218_vm1 = vmmov %vm14148_vm0  ;;  %14220 = vst [vmem:[#allocation55_spill] sm:$0xff] %v12454_v1  ;;  %v5711_v19 = vsel %vm14232_vm3, %v12456_v8, 0.0  ;;  %v12505_v21 = vpack.c.bf16 %v12479_v22, %v5713_v27  ;;  %vm14245_vm13 = vnez %v14244_v24  ;;  %v4782_v27 = vld [vmem:[#allocation3 + $0xf] sm:$0xff]  ;;  %v4892_v59 = vld [vmem:[#allocation3 + $0xf8] sm:$0xff] }
 0x414   : > { %9007 = vmatprep.mubr.msk.bf16.mxu0 %vm14218_vm1, %v12416_v34  ;;  %14221 = vst [vmem:[#allocation11_spill] sm:$0xff] %v12459_v48  ;;  %14222 = vst [vmem:[#allocation13_spill] sm:$0xff] %v12461_v28  ;;  %v12491_v6 = vpack.c.bf16 %v12463_v60, %v5711_v19  ;;  %v5715_v19 = vsel %vm14245_vm13, %v12488_v5, 0.0  ;;  %v14250_v34 = vld [vmem:[#allocation18_spill] sm:$0xff]  ;;  %v12534_v23 = vld [vmem:[#allocation3 + $0x31] sm:$0xff] }
 0x415   : > { %14223 = vst [vmem:[#allocation23_spill] sm:$0xff] %v12463_v60  ;;  %14226 = vst [vmem:[#allocation62_spill] sm:$0xff] %v12468_v30  ;;  %v12515_v16 = vpack.c.bf16 %v12495_v35, %v5715_v19  ;;  %vm14251_vm1 = vnez %v14250_v34  ;;  %v12530_v19 = vld [vmem:[#allocation3 + $0xf7] sm:$0xff]  ;;  %v12532_v61 = vld [vmem:[#allocation3 + $0x21] sm:$0xff] }
 0x416   : > { %14227 = vst [vmem:[#allocation25_spill] sm:$0xff] %v12473_v25  ;;  %vm14228_vm9 = vmmov %vm14148_vm0  ;;  %v5717_v17 = vsel %vm14251_vm1, %v12502_v26, 0.0  ;;  %v12543_v9 = vld [vmem:[#allocation3 + $0xef] sm:$0xff]  ;;  %v12545_v25 = vld [vmem:[#allocation3 + $0xff] sm:$0xff] }
 0x417   : > { %9020 = vmatmul.mubr.msk.bf16.gmra.mrb[4].mxu1 %vm14228_vm9, %v12461_v28  ;;  %14229 = vst [vmem:[#allocation63_spill] sm:$0xff] %v12477_v52  ;;  %14230 = vst [vmem:[#allocation64_spill] sm:$0xff] %v12479_v22  ;;  %v4877_v28 = vld [vmem:[#allocation3 + $0x80] sm:$0xff]  ;;  %v12549_v48 = vld [vmem:[#allocation3 + $0x29] sm:$0xff] }
 0x418   : > { %9023 = vmatprep.mubr.msk.bf16.mxu1 %vm14148_vm0, %v12468_v30  ;;  %14233 = vst [vmem:[#allocation65_spill] sm:$0xff] %v12486_v57  ;;  %14234 = vst [vmem:[#allocation66_spill] sm:$0xff] %v12488_v5  ;;  %v4876_v30 = vld [vmem:[#allocation3 + $0x78] sm:$0xff]  ;;  %v12553_v56 = vld [vmem:[#allocation3 + $0x41] sm:$0xff] }
 0x419   : > { %14235 = vst [vmem:[#allocation67_spill] sm:$0xff] %v12491_v6  ;;  %vm14236_vm12 = vmmov %vm14148_vm0  ;;  %v12528_v6 = vld [vmem:[#allocation3 + $0xe7] sm:$0xff]  ;;  %v12541_v15 = vpack.c.bf16 %v4877_v28, %v4876_v30  ;;  %v12551_v1 = vld [vmem:[#allocation3 + $0x39] sm:$0xff] }
 0x41a   : > { %14237 = vst [vmem:[#allocation68_spill] sm:$0xff] %v12495_v35  ;;  %vm14240_vm15 = vmmov %vm14148_vm0  ;;  %v12564_v30 = vld [vmem:[#allocation3 + $0x49] sm:$0xff]  ;;  %v12568_v45 = vld [vmem:[#allocation3 + $0x61] sm:$0xff] }
 0x41b   : > { %9008 = vmatmul.mubr.msk.bf16.gmra.mrb[40].mxu0 %vm14236_vm12, %v12477_v52  ;;  %14241 = vst [vmem:[#allocation69_spill] sm:$0xff] %v12502_v26  ;;  %14242 = vst [vmem:[#allocation70_spill] sm:$0xff] %v12505_v21  ;;  %v12519_v52 = vld [vmem:[#allocation3 + $0xdf] sm:$0xff]  ;;  %v4813_v21 = vsel %vm14033_vm14, %v4781_v31, 0.0  ;;  %v12633_v26 = vld [vmem:[#allocation3 + $0xd1] sm:$0xff] }
 0x41c   : > { %9011 = vmatprep.mubr.msk.bf16.mxu0 %vm14240_vm15, %v12486_v57  ;;  %14243 = vst [vmem:[#allocation71_spill] sm:$0xff] %v12507_v29  ;;  %14246 = vst [vmem:[#allocation8_spill] sm:$0xff] %v12512_v4  ;;  %v4893_v57 = vld [vmem:[#allocation3 + $0x100] sm:$0xff]  ;;  %vm14267_vm15 = vcmask 1043456   ;;  %v4845_v37 = vpack.c.bf16 %v4782_v27, %v4813_v21  ;;  %v14386_v46 = vld [vmem:[#allocation32_spill] sm:$0xff] }
 0x41d   : > { %14247 = vst [vmem:[#allocation33_spill] sm:$0xff] %v12515_v16  ;;  %14248 = vst [vmem:[#allocation35_spill] sm:$0xff] %v12517_v40  ;;  %v12537_v16 = vpack.c.bf16 %v12507_v29, %v5717_v17  ;;  %v12547_v31 = vld [vmem:[#allocation3 + $0x19] sm:$0xff]  ;;  %v14264_v17 = vld [vmem:[#allocation19_spill] sm:$0xff]  ;;  %v12562_v28 = vsel %vm14267_vm15, %v12393_v54, 0 }
 0x41e   : > { %14249 = vst [vmem:[#allocation36_spill] sm:$0xff] %v12519_v52  ;;  %14252 = vst [vmem:[#allocation37_spill] sm:$0xff] %v12524_v50  ;;  %v12578_v39 = vld [vmem:[#allocation3 + $0x59] sm:$0xff]  ;;  %v12580_v54 = vld [vmem:[#allocation3 + $0x69] sm:$0xff] }
 0x41f   : > { %14253 = vst [vmem:[#allocation39_spill] sm:$0xff] %v12528_v6  ;;  %14254 = vst [vmem:[#allocation41_spill] sm:$0xff] %v12530_v19  ;;  %v12584_v34 = vld [vmem:[#allocation3 + $0x79] sm:$0xff]  ;;  %v12601_v29 = vld [vmem:[#allocation3 + $0x91] sm:$0xff] }
 0x420   : > { %14255 = vst [vmem:[#allocation42_spill] sm:$0xff] %v12532_v61  ;;  %14256 = vst [vmem:[#allocation43_spill] sm:$0xff] %v12534_v23  ;;  %v14278_v21 = vld [vmem:[#allocation21_spill] sm:$0xff]  ;;  %v14424_v38 = vld [vmem:[#allocation23_spill] sm:$0xff] }
 0x421   : > { %14257 = vst [vmem:[#allocation45_spill] sm:$0xff] %v12537_v16  ;;  %vm14258_vm9 = vmmov %vm14148_vm0  ;;  %vm14265_vm0 = vnez %v14264_v17  ;;  %v12582_v17 = vld [vmem:[#allocation3 + $0x71] sm:$0xff]  ;;  %vm14279_vm15 = vnez %v14278_v21  ;;  %v12603_v35 = vld [vmem:[#allocation3 + $0xa1] sm:$0xff] }
 0x422   : > { %9024 = vmatmul.mubr.msk.bf16.gmra.mrb[8].mxu1 %vm14258_vm9, %v12517_v40  ;;  %14259 = vst [vmem:[#allocation47_spill] sm:$0xff] %v12541_v15  ;;  %14260 = vst [vmem:[#allocation48_spill] sm:$0xff] %v12543_v9  ;;  %v5719_v16 = vsel %vm14265_vm0, %v12512_v4, 0.0  ;;  %v12566_v40 = vld [vmem:[#allocation3 + $0x51] sm:$0xff]  ;;  %v12586_v4 = vld [vmem:[#allocation3 + $0x81] sm:$0xff]  ;;  %v5723_v27 = vsel %vm14279_vm15, %v12530_v19, 0.0 }
 0x423   : > { %14261 = vst [vmem:[#allocation7_spill] sm:$0xff] %v12545_v25  ;;  %14262 = vst [vmem:[#allocation14_spill] sm:$0xff] %v12547_v31  ;;  %v12571_v2 = vpack.c.bf16 %v12519_v52, %v5719_v16  ;;  %9012 = vmatmul.mubr.msk.bf16.gmra.mrb[44].mxu0 %vm14258_vm9, %v12541_v15  ;;  %v14276_v16 = vld [vmem:[#allocation20_spill] sm:$0xff]  ;;  %v12594_v15 = vpack.c.bf16 %v4893_v57, %v4892_v59  ;;  %v12599_v52 = vld [vmem:[#allocation3 + $0x89] sm:$0xff] }
 0x424   : > { %14263 = vst [vmem:[#allocation15_spill] sm:$0xff] %v12553_v56  ;;  %vm14266_vm12 = vmmov %vm14258_vm9  ;;  %v12611_v21 = vld [vmem:[#allocation3 + $0x99] sm:$0xff]  ;;  %v12613_v59 = vld [vmem:[#allocation3 + $0xa9] sm:$0xff] }
 0x425   : > { %9027 = vmatprep.mubr.msk.bf16.mxu1 %vm14266_vm12, %v12524_v50  ;;  %14268 = vst [vmem:[#allocation16_spill] sm:$0xff] %v12562_v28  ;;  %14269 = vst [vmem:[#allocation72_spill] sm:$0xff] %v12566_v40  ;;  %v4815_v50 = vsel %vm10800_vm5, %v12352_v42, 0.0  ;;  %vm14277_vm12 = vnez %v14276_v16  ;;  %v4817_v42 = vsel %vm10807_vm6, %v12358_v44, 0.0  ;;  %v12609_v16 = vpack.c.bf16 %v12545_v25, %v5723_v27  ;;  %v12615_v57 = vld [vmem:[#allocation3 + $0xb1] sm:$0xff]  ;;  %v14288_v28 = vld [vmem:[#allocation26_spill] sm:$0xff] }
 0x426   : > { %14270 = vst [vmem:[#allocation73_spill] sm:$0xff] %v12568_v45  ;;  %14271 = vst [vmem:[#allocation74_spill] sm:$0xff] %v12571_v2  ;;  %v5721_v2 = vsel %vm14277_vm12, %v12528_v6, 0.0  ;;  %v14286_v19 = vld [vmem:[#allocation24_spill] sm:$0xff]  ;;  %vm14289_vm15 = vnez %v14288_v28  ;;  %v14428_v55 = vld [vmem:[#allocation69_spill] sm:$0xff] }
 0x427   : > { %14272 = vst [vmem:[#allocation75_spill] sm:$0xff] %v12578_v39  ;;  %14273 = vst [vmem:[#allocation76_spill] sm:$0xff] %v12580_v54  ;;  %v12606_v22 = vpack.c.bf16 %v12543_v9, %v5721_v2  ;;  %vm14287_vm9 = vnez %v14286_v19  ;;  %v6318_v24 = vsel %vm14289_vm15, %v12534_v23, 0.0  ;;  %v14290_v2 = vld [vmem:[#allocation28_spill] sm:$0xff]  ;;  %v12631_v9 = vld [vmem:[#allocation3 + $0xc1] sm:$0xff] }
 0x428   : > { %14274 = vst [vmem:[#allocation77_spill] sm:$0xff] %v12582_v17  ;;  %14275 = vst [vmem:[#allocation78_spill] sm:$0xff] %v12586_v4  ;;  %v6316_v6 = vsel %vm14287_vm9, %v12532_v61, 0.0  ;;  %vm14291_vm12 = vnez %v14290_v2  ;;  %v14292_v27 = vld [vmem:[#allocation32_spill] sm:$0xff]  ;;  %v12639_v28 = vpack.c.bf16 %v6318_v24, %v12549_v48 }
 0x429   : > { %14280 = vst [vmem:[#allocation79_spill] sm:$0xff] %v12594_v15  ;;  %14281 = vst [vmem:[#allocation80_spill] sm:$0xff] %v12601_v29  ;;  %vm14293_vm0 = vnez %v14292_v27  ;;  %v12629_v25 = vld [vmem:[#allocation3 + $0xb9] sm:$0xff]  ;;  %v12636_v61 = vpack.c.bf16 %v6316_v6, %v12547_v31  ;;  %v12647_v27 = vld [vmem:[#allocation3 + $0xc9] sm:$0xff] }
 0x42a   : > { %14282 = vst [vmem:[#allocation81_spill] sm:$0xff] %v12603_v35  ;;  %14283 = vst [vmem:[#allocation82_spill] sm:$0xff] %v12606_v22  ;;  %v6320_v22 = vsel %vm14291_vm12, %v12553_v56, 0.0  ;;  %v14300_v56 = vld [vmem:[#allocation34_spill] sm:$0xff]  ;;  %v14304_v24 = vld [vmem:[#allocation40_spill] sm:$0xff] }
 0x42b   : > { %14284 = vst [vmem:[#allocation83_spill] sm:$0xff] %v12609_v16  ;;  %14285 = vst [vmem:[#allocation84_spill] sm:$0xff] %v12611_v21  ;;  %v6322_v16 = vsel %vm14293_vm0, %v12566_v40, 0.0  ;;  %v12642_v19 = vpack.c.bf16 %v6320_v22, %v12551_v1  ;;  %v12649_v40 = vld [vmem:[#allocation3 + $0xd9] sm:$0xff]  ;;  %vm14301_vm0 = vnez %v14300_v56  ;;  %v14302_v6 = vld [vmem:[#allocation38_spill] sm:$0xff]  ;;  %vm14305_vm15 = vnez %v14304_v24 }
 0x42c   : > { %14294 = vst [vmem:[#allocation85_spill] sm:$0xff] %v12631_v9  ;;  %14295 = vst [vmem:[#allocation86_spill] sm:$0xff] %v12633_v26  ;;  %v12645_v2 = vpack.c.bf16 %v6322_v16, %v12564_v30  ;;  %v6324_v23 = vsel %vm14301_vm0, %v12568_v45, 0.0  ;;  %vm14303_vm12 = vnez %v14302_v6  ;;  %v6328_v22 = vsel %vm14305_vm15, %v12586_v4, 0.0  ;;  %v12667_v31 = vld [vmem:[#allocation3 + $0x101] sm:$0xff] }
 0x42d   : > { %14296 = vst [vmem:[#allocation87_spill] sm:$0xff] %v12636_v61  ;;  %14297 = vst [vmem:[#allocation88_spill] sm:$0xff] %v12639_v28  ;;  %v6326_v61 = vsel %vm14303_vm12, %v12582_v17, 0.0  ;;  %v12665_v28 = vld [vmem:[#allocation3 + $0xf1] sm:$0xff]  ;;  %v12670_v56 = vpack.c.bf16 %v6324_v23, %v12578_v39  ;;  %v12676_v17 = vpack.c.bf16 %v6328_v22, %v12584_v34  ;;  %v14313_v4 = vld [vmem:[#allocation46_spill] sm:$0xff] }
 0x42e   : > { %14298 = vst [vmem:[#allocation89_spill] sm:$0xff] %v12642_v19  ;;  %14299 = vst [vmem:[#allocation90_spill] sm:$0xff] %v12645_v2  ;;  %v14306_v19 = vld [vmem:[#allocation44_spill] sm:$0xff]  ;;  %v12663_v2 = vld [vmem:[#allocation3 + $0xe1] sm:$0xff]  ;;  %v12673_v6 = vpack.c.bf16 %v6326_v61, %v12580_v54  ;;  %vm14314_vm15 = vnez %v14313_v4 }
 0x42f   : > { %vm14307_vm9 = vnez %v14306_v19  ;;  %14308 = vst [vmem:[#allocation91_spill] sm:$0xff] %v12670_v56  ;;  %14310 = vst [vmem:[#allocation93_spill] sm:$0xff] %v12676_v17  ;;  %v12683_v19 = vld [vmem:[#allocation3 + $0xe9] sm:$0xff]  ;;  %v6332_v23 = vsel %vm14314_vm15, %v12603_v35, 0.0  ;;  %v14317_v22 = vld [vmem:[#allocation52_spill] sm:$0xff] }
 0x430   : > { %v6330_v16 = vsel %vm14307_vm9, %v12601_v29, 0.0  ;;  %14309 = vst [vmem:[#allocation92_spill] sm:$0xff] %v12673_v6  ;;  %vm14312_vm9 = vcmask 64512   ;;  %v12685_v29 = vld [vmem:[#allocation3 + $0xf9] sm:$0xff]  ;;  %v14315_v61 = vld [vmem:[#allocation50_spill] sm:$0xff]  ;;  %vm14318_vm0 = vnez %v14317_v22  ;;  %v12701_v56 = vpack.c.bf16 %v6332_v23, %v12611_v21 }
 0x431   : > { %v12679_v24 = vpack.c.bf16 %v6330_v16, %v12599_v52  ;;  %9028 = vmatmul.mubr.msk.bf16.gmra.mrb[12].mxu1 %vm14312_vm9, %v12594_v15  ;;  %vm14316_vm12 = vnez %v14315_v61  ;;  %v6336_v16 = vsel %vm14318_vm0, %v12631_v9, 0.0  ;;  %v4846_v22 = vpack.c.bf16 %v12356_v41, %v4815_v50  ;;  %v14325_v9 = vld [vmem:[#allocation58_spill] sm:$0xff] }
 0x432   : > { %v6334_v6 = vsel %vm14316_vm12, %v12615_v57, 0.0  ;;  %9033 = vmatprep.mubr.msk.bf16.mxu1 %vm14312_vm9, %v4845_v37  ;;  %14321 = vst [vmem:[#allocation95_spill] sm:$0xff] %v12701_v56  ;;  %v12707_v4 = vpack.c.bf16 %v6336_v16, %v12629_v25  ;;  %vm14326_vm0 = vnez %v14325_v9  ;;  %v14327_v37 = vld [vmem:[#allocation59_spill] sm:$0xff]  ;;  %v14329_v56 = vld [vmem:[#allocation60_spill] sm:$0xff]  ;;  %v4847_v16 = vpack.c.bf16 %v12364_v32, %v4817_v42 }
 0x433   : > { %14311 = vst [vmem:[#allocation94_spill] sm:$0xff] %v12679_v24  ;;  %v14319_v24 = vld [vmem:[#allocation56_spill] sm:$0xff]  ;;  %v12704_v15 = vpack.c.bf16 %v6334_v6, %v12613_v59  ;;  %vm14328_vm9 = vnez %v14327_v37  ;;  %v6641_v41 = vsel %vm14033_vm14, %v12358_v44, 0.0  ;;  %v6645_v42 = vsel %vm10807_vm6, %v12368_v49, 0.0 }
 0x434   : > { %vm14320_vm1 = vnez %v14319_v24  ;;  %14323 = vst [vmem:[#allocation97_spill] sm:$0xff] %v12707_v4  ;;  %v6340_v24 = vsel %vm14326_vm0, %v12663_v2, 0.0  ;;  %v6342_v23 = vsel %vm14328_vm9, %v12665_v28, 0.0  ;;  %v12751_v13 = vpack.c.bf16 %v12379_v10, %v6645_v42  ;;  %v12773_v42 = vld [vmem:[#allocation3 + $0x107] sm:$0xff] }
 0x435   : > { %v6338_v17 = vsel %vm14320_vm1, %v12633_v26, 0.0  ;;  %14322 = vst [vmem:[#allocation96_spill] sm:$0xff] %v12704_v15  ;;  %vm14330_vm1 = vnez %v14329_v56  ;;  %v12724_v4 = vpack.c.bf16 %v6340_v24, %v12649_v40  ;;  %v6647_v24 = vsel %vm10833_vm7, %v12381_v53, 0.0  ;;  %14339 = vst [vmem:[#allocation104_spill] sm:$0xff] %v12773_v42  ;;  %v14356_v15 = vld [vmem:[#allocation8_spill] sm:$0xff] }
 0x436   : > { %v12710_v61 = vpack.c.bf16 %v6338_v17, %v12647_v27  ;;  %v6344_v6 = vsel %vm14330_vm1, %v12667_v31, 0.0  ;;  %v12727_v17 = vpack.c.bf16 %v6342_v23, %v12683_v19  ;;  %v12745_v23 = vpack.c.bf16 %v12364_v32, %v6641_v41  ;;  %14336 = vst [vmem:[#allocation101_spill] sm:$0xff] %v12751_v13  ;;  %v12771_v41 = vld [vmem:[%s13521_s7 + $0xc] sm:$0xf] }
 0x437   : > { %14331 = vst [vmem:[#allocation58_spill] sm:$0xff] %v12724_v4  ;;  %v12730_v50 = vpack.c.bf16 %v6344_v6, %v12685_v29  ;;  %v12754_v33 = vpack.c.bf16 %v12418_v36, %v6647_v24  ;;  %v6651_v44 = vsel %vm10870_vm10, %v12434_v47, 0.0  ;;  %v6653_v32 = vsel %vm14219_vm11, %v12443_v0, 0.0  ;;  %14338 = vst [vmem:[#allocation103_spill] sm:$0xff] %v12771_v41 }
 0x438   : > { %14324 = vst [vmem:[#allocation98_spill] sm:$0xff] %v12710_v61  ;;  %14332 = vst [vmem:[#allocation59_spill] sm:$0xff] %v12727_v17  ;;  %v6643_v61 = vsel %vm10800_vm5, %v12360_v14, 0.0  ;;  %v12776_v24 = vpack.c.bf16 %v12432_v18, %v6649_v11  ;;  %v12782_v13 = vpack.c.bf16 %v12451_v58, %v6653_v32  ;;  %vm14344_vm5 = vcmask 64512   ;;  %v14354_v17 = vld [vmem:[#allocation71_spill] sm:$0xff] }
 0x439   : > { %14333 = vst [vmem:[#allocation60_spill] sm:$0xff] %v12730_v50  ;;  %14334 = vst [vmem:[#allocation99_spill] sm:$0xff] %v12745_v23  ;;  %v12748_v6 = vpack.c.bf16 %v12366_v51, %v6643_v61  ;;  %v6655_v61 = vsel %vm14225_vm4, %v12456_v8, 0.0  ;;  %9034 = vmatmul.mubr.msk.bf16.vlgmr.msra.gmra.mrb[16].mxu1 %vm14344_vm5, %v4846_v22  ;;  %v12788_v23 = vld [vmem:[#allocation3 + $0x10f] sm:$0xff]  ;;  %v6657_v50 = vsel %vm14232_vm3, %v12470_v12, 0.0  ;;  %v6659_v11 = vsel %vm14239_vm2, %v12488_v5, 0.0 }
 0x43a   : > { %14337 = vst [vmem:[#allocation102_spill] sm:$0xff] %v12754_v33  ;;  %14340 = vst [vmem:[#allocation105_spill] sm:$0xff] %v12776_v24  ;;  %v12779_v33 = vpack.c.bf16 %v12436_v43, %v6651_v44  ;;  %v14346_v44 = vld [vmem:[#allocation69_spill] sm:$0xff]  ;;  %vm14385_vm10 = vnez %v14384_v20 }
 0x43b   : > { %14335 = vst [vmem:[#allocation100_spill] sm:$0xff] %v12748_v6  ;;  %14342 = vst [vmem:[#allocation107_spill] sm:$0xff] %v12782_v13  ;;  %v12785_v6 = vpack.c.bf16 %v12463_v60, %v6655_v61  ;;  %v6661_v32 = vsel %vm14245_vm13, %v14346_v44, 0.0  ;;  %v14348_v13 = vld [vmem:[#allocation16_spill] sm:$0xff]  ;;  %v14357_v60 = vld [vmem:[#allocation18_spill] sm:$0xff] }
 0x43c   : > { %14341 = vst [vmem:[#allocation106_spill] sm:$0xff] %v12779_v33  ;;  %14345 = vst [vmem:[#allocation109_spill] sm:$0xff] %v12788_v23  ;;  %9066 = vmatpush3.bf16.msra.mxu1 %v14348_v13  ;;  %v14350_v61 = vld [vmem:[#allocation64_spill] sm:$0xff]  ;;  %v12808_v4 = vpack.c.bf16 %v14354_v17, %v6661_v32  ;;  %vm14358_vm14 = vnez %v14357_v60  ;;  %v14363_v33 = vld [vmem:[#allocation19_spill] sm:$0xff] }
 0x43d   : > { %14343 = vst [vmem:[#allocation108_spill] sm:$0xff] %v12785_v6  ;;  %vm14349_vm6 = vmmov %vm14344_vm5  ;;  %v12802_v22 = vpack.c.bf16 %v14350_v61, %v6657_v50  ;;  %v14352_v6 = vld [vmem:[#allocation68_spill] sm:$0xff]  ;;  %v6663_v5 = vsel %vm14358_vm14, %v14356_v15, 0.0  ;;  %vm14359_vm5 = vcmask 1043456   ;;  %v14368_v32 = vld [vmem:[#allocation21_spill] sm:$0xff]  ;;  %v4819_v15 = vsel %vm10833_vm7, %v12360_v14, 0.0 }
 0x43e   : > { %9037 = vmatprep.mubr.msk.bf16.mxu1 %vm14349_vm6, %v4847_v16  ;;  %v12805_v24 = vpack.c.bf16 %v14352_v6, %v6659_v11  ;;  %14355 = vst [vmem:[#allocation68_spill] sm:$0xff] %v12808_v4  ;;  %9928 = vmatprep.subr.msk.bf16.mxu1 %vm14359_vm5, %v12771_v41  ;;  %v14360_v44 = vld [vmem:[#allocation36_spill] sm:$0xff]  ;;  %v14362_v16 = vld [vmem:[#allocation39_spill] sm:$0xff]  ;;  %vm14364_vm6 = vnez %v14363_v33  ;;  %vm14369_vm2 = vnez %v14368_v32  ;;  %v4848_v32 = vpack.c.bf16 %v12366_v51, %v4819_v15 }
 0x43f   : > { %14351 = vst [vmem:[#allocation16_spill] sm:$0xff] %v12802_v22  ;;  %v12816_v13 = vpack.c.bf16 %v14360_v44, %v6663_v5  ;;  %v6665_v50 = vsel %vm14364_vm6, %v14362_v16, 0.0  ;;  %v14365_v22 = vld [vmem:[#allocation41_spill] sm:$0xff]  ;;  %v14366_v11 = vld [vmem:[#allocation20_spill] sm:$0xff]  ;;  %v6669_v4 = vsel %vm14369_vm2, %v12773_v42, 0.0  ;;  %v14372_v5 = vld [vmem:[#allocation7_spill] sm:$0xff] }
 0x440   : > { %14353 = vst [vmem:[#allocation64_spill] sm:$0xff] %v12805_v24  ;;  %vm14367_vm13 = vnez %v14366_v11  ;;  %v14370_v41 = vld [vmem:[#allocation48_spill] sm:$0xff]  ;;  %v12837_v44 = vpack.c.bf16 %v12788_v23, %v6669_v4  ;;  %v4825_v14 = vsel %vm14219_vm11, %v12420_v7, 0.0  ;;  %vm14378_vm5 = vcmask 64512   ;;  %v14380_v51 = vld [vmem:[#allocation15_spill] sm:$0xff]  ;;  %v14396_v23 = vld [vmem:[#allocation78_spill] sm:$0xff] }
 0x441   : > { %14361 = vst [vmem:[#allocation18_spill] sm:$0xff] %v12816_v13  ;;  %v6667_v24 = vsel %vm14367_vm13, %v14365_v22, 0.0  ;;  %v12831_v17 = vpack.c.bf16 %v14370_v41, %v6665_v50  ;;  %v4821_v22 = vsel %vm10841_vm8, %v12368_v49, 0.0  ;;  %v14376_v50 = vld [vmem:[#allocation24_spill] sm:$0xff]  ;;  %9038 = vmatmul.mubr.msk.bf16.gmra.mrb[20].mxu1 %vm14378_vm5, %v4848_v32  ;;  %v14381_v49 = vld [vmem:[#allocation26_spill] sm:$0xff]  ;;  %vm14387_vm11 = vnez %v14386_v46  ;;  %vm14388_vm2 = vmmov %vm14378_vm5 }
 0x442   : > { %v12834_v13 = vpack.c.bf16 %v14372_v5, %v6667_v24  ;;  %14374 = vst [vmem:[#allocation20_spill] sm:$0xff] %v12837_v44  ;;  %v4849_v42 = vpack.c.bf16 %v12379_v10, %v4821_v22  ;;  %v14375_v24 = vld [vmem:[#allocation43_spill] sm:$0xff]  ;;  %vm14377_vm7 = vnez %v14376_v50  ;;  %vm14382_vm8 = vnez %v14381_v49  ;;  %v14383_v15 = vld [vmem:[#allocation72_spill] sm:$0xff]  ;;  %v14393_v44 = vld [vmem:[#allocation34_spill] sm:$0xff] }
 0x443   : > { %14371 = vst [vmem:[#allocation39_spill] sm:$0xff] %v12831_v17  ;;  %v7262_v4 = vsel %vm14377_vm7, %v14375_v24, 0.0  ;;  %v7264_v10 = vsel %vm14382_vm8, %v14380_v51, 0.0  ;;  %v7266_v53 = vsel %vm14385_vm10, %v14383_v15, 0.0  ;;  %v7268_v7 = vsel %vm14387_vm11, %v12568_v45, 0.0  ;;  %v14397_v45 = vld [vmem:[#allocation38_spill] sm:$0xff] }
 0x444   : > { %14373 = vst [vmem:[#allocation19_spill] sm:$0xff] %v12834_v13  ;;  %v12855_v62 = vpack.c.bf16 %v7262_v4, %v12549_v48  ;;  %9041 = vmatprep.mubr.msk.bf16.mxu1 %vm14388_vm2, %v4849_v42  ;;  %v12868_v22 = vpack.c.bf16 %v7264_v10, %v12551_v1  ;;  %v12871_v32 = vpack.c.bf16 %v7266_v53, %v12564_v30  ;;  %v14399_v15 = vld [vmem:[#allocation80_spill] sm:$0xff] }
 0x445   : > { %v12874_v4 = vpack.c.bf16 %v7268_v7, %v12578_v39  ;;  %vm14394_vm5 = vnez %v14393_v44  ;;  %vm14398_vm11 = vnez %v14397_v45  ;;  %v14400_v10 = vld [vmem:[#allocation40_spill] sm:$0xff] }
 0x446   : > { %14379 = vst [vmem:[#allocation48_spill] sm:$0xff] %v12855_v62  ;;  %14389 = vst [vmem:[#allocation7_spill] sm:$0xff] %v12868_v22  ;;  %v14392_v62 = vld [vmem:[#allocation77_spill] sm:$0xff]  ;;  %v7272_v42 = vsel %vm14398_vm11, %v14396_v23, 0.0  ;;  %vm14401_vm2 = vnez %v14400_v10  ;;  %v14402_v53 = vld [vmem:[#allocation44_spill] sm:$0xff] }
 0x447   : > { %14390 = vst [vmem:[#allocation43_spill] sm:$0xff] %v12871_v32  ;;  %14391 = vst [vmem:[#allocation24_spill] sm:$0xff] %v12874_v4  ;;  %v7270_v13 = vsel %vm14394_vm5, %v14392_v62, 0.0  ;;  %v7274_v22 = vsel %vm14401_vm2, %v14399_v15, 0.0  ;;  %vm14403_vm10 = vnez %v14402_v53  ;;  %v12891_v4 = vld [vmem:[#allocation3 + $0x111] sm:$0xff]  ;;  %v12894_v32 = vpack.c.bf16 %v7272_v42, %v12584_v34  ;;  %v12905_v15 = vld [vmem:[#allocation3 + $0x109] sm:$0xff] }
 0x448   : > { %v12880_v17 = vpack.c.bf16 %v7270_v13, %v12580_v54  ;;  %v7276_v7 = vsel %vm14403_vm10, %v12603_v35, 0.0  ;;  %v12897_v13 = vpack.c.bf16 %v7274_v22, %v12599_v52  ;;  %v7278_v54 = vsel %vm14314_vm15, %v12615_v57, 0.0  ;;  %v14409_v35 = vld [vmem:[#allocation85_spill] sm:$0xff]  ;;  %v14451_v49 = vld [vmem:[#allocation72_spill] sm:$0xff] }
 0x449   : > { %14404 = vst [vmem:[#allocation26_spill] sm:$0xff] %v12894_v32  ;;  %v12908_v53 = vpack.c.bf16 %v7278_v54, %v12613_v59  ;;  %v7280_v42 = vsel %vm14316_vm12, %v14409_v35, 0.0  ;;  %v14411_v32 = vld [vmem:[#allocation52_spill] sm:$0xff]  ;;  %v4850_v35 = vpack.c.bf16 %v12418_v36, %v4823_v3  ;;  %v4827_v36 = vsel %vm14225_vm4, %v12434_v47, 0.0 }
 0x44a   : > { %14395 = vst [vmem:[#allocation15_spill] sm:$0xff] %v12880_v17  ;;  %14405 = vst [vmem:[#allocation28_spill] sm:$0xff] %v12897_v13  ;;  %v12900_v17 = vpack.c.bf16 %v7276_v7, %v12611_v21  ;;  %vm14412_vm10 = vnez %v14411_v32  ;;  %v14413_v7 = vld [vmem:[#allocation56_spill] sm:$0xff]  ;;  %v12920_v13 = vpack.c.bf16 %v7280_v42, %v12629_v25  ;;  %v7288_v42 = vsel %vm14328_vm9, %v12667_v31, 0.0 }
 0x44b   : > { %14408 = vst [vmem:[#allocation77_spill] sm:$0xff] %v12908_v53  ;;  %v7282_v22 = vsel %vm14412_vm10, %v12633_v26, 0.0  ;;  %vm14414_vm2 = vnez %v14413_v7  ;;  %v7286_v53 = vsel %vm14326_vm0, %v12665_v28, 0.0  ;;  %vm14417_vm0 = vcmask 64512   ;;  %v14457_v44 = vld [vmem:[#allocation76_spill] sm:$0xff] }
 0x44c   : > { %14406 = vst [vmem:[#allocation32_spill] sm:$0xff] %v12900_v17  ;;  %v7284_v17 = vsel %vm14414_vm2, %v12663_v2, 0.0  ;;  %v12923_v21 = vpack.c.bf16 %v7282_v22, %v12647_v27  ;;  %v12933_v26 = vpack.c.bf16 %v7286_v53, %v12683_v19  ;;  %v7290_v22 = vsel %vm14330_vm1, %v12891_v4, 0.0  ;;  %9042 = vmatmul.mubr.msk.bf16.gmra.mrb[24].mxu1 %vm14417_vm0, %v4850_v35  ;;  %vm14418_vm2 = vmmov %vm14417_vm0  ;;  %v14422_v53 = vld [vmem:[#allocation17_spill] sm:$0xff] }
 0x44d   : > { %v12926_v54 = vpack.c.bf16 %v7284_v17, %v12649_v40  ;;  %v4851_v17 = vpack.c.bf16 %v12432_v18, %v4825_v14  ;;  %v4829_v3 = vsel %vm14232_vm3, %v12443_v0, 0.0  ;;  %v4852_v18 = vpack.c.bf16 %v12436_v43, %v4827_v36  ;;  %vm14419_vm1 = vmmov %vm14417_vm0  ;;  %v14427_v43 = vld [vmem:[#allocation66_spill] sm:$0xff]  ;;  %v14432_v36 = vld [vmem:[#allocation21_spill] sm:$0xff] }
 0x44e   : > { %14415 = vst [vmem:[#allocation34_spill] sm:$0xff] %v12923_v21  ;;  %v12946_v21 = vpack.c.bf16 %v7290_v22, %v12905_v15  ;;  %v4853_v14 = vpack.c.bf16 %v12451_v58, %v4829_v3  ;;  %vm14420_vm9 = vmmov %vm14417_vm0  ;;  %vm14421_vm0 = vnez %v14238_v63  ;;  %v4835_v58 = vsel %vm14358_vm14, %v14427_v43, 0.0  ;;  %v14429_v22 = vld [vmem:[#allocation71_spill] sm:$0xff]  ;;  %v14434_v3 = vld [vmem:[#allocation36_spill] sm:$0xff] }
 0x44f   : > { %14416 = vst [vmem:[#allocation38_spill] sm:$0xff] %v12926_v54  ;;  %v12943_v54 = vpack.c.bf16 %v7288_v42, %v12685_v29  ;;  %9045 = vmatprep.mubr.msk.bf16.mxu1 %vm14418_vm2, %v4851_v17  ;;  %v4831_v35 = vsel %vm14421_vm0, %v12456_v8, 0.0  ;;  %vm14423_vm2 = vnez %v14422_v53  ;;  %vm14425_vm4 = vmmov %vm14419_vm1  ;;  %v4837_v8 = vsel %vm14364_vm6, %v14428_v55, 0.0  ;;  %v14444_v43 = vld [vmem:[#allocation14_spill] sm:$0xff]  ;;  %v14445_v55 = vld [vmem:[#allocation103_spill] sm:$0xff] }
 0x450   : > { %v4833_v47 = vsel %vm14423_vm2, %v12470_v12, 0.0  ;;  %v4854_v42 = vpack.c.bf16 %v14424_v38, %v4831_v35  ;;  %vm14426_vm3 = vmmov %vm14419_vm1  ;;  %v4856_v63 = vpack.c.bf16 %v14352_v6, %v4835_v58  ;;  %v4857_v12 = vpack.c.bf16 %v14429_v22, %v4837_v8  ;;  %v5338_v6 = vld [vmem:[#allocation3 + $0x11] sm:$0xff]  ;;  %v14438_v35 = vld [vmem:[#allocation22_spill] sm:$0xff] }
 0x451   : > { %v4855_v0 = vpack.c.bf16 %v14350_v61, %v4833_v47  ;;  %v14431_v61 = vld [vmem:[#allocation8_spill] sm:$0xff]  ;;  %vm14433_vm0 = vnez %v14432_v36  ;;  %vm14435_vm14 = vmmov %vm14419_vm1  ;;  %vm14439_vm2 = vnez %v14438_v35  ;;  %v5337_v47 = vld [vmem:[#allocation3 + $0x9] sm:$0xff]  ;;  %v5370_v11 = vsel %vm14377_vm7, %v5338_v6, 0.0 }
 0x452   : > { %v4839_v17 = vsel %vm14367_vm13, %v14431_v61, 0.0  ;;  %v4841_v60 = vsel %vm14433_vm0, %v14362_v16, 0.0  ;;  %vm14436_vm6 = vmmov %vm14419_vm1  ;;  %v5401_v16 = vpack.c.bf16 %v5370_v11, %v5337_v47  ;;  %v8259_v8 = vld [vmem:[%s13521_s7 + $0x10] sm:$0xf]  ;;  %vm14450_vm0 = vnez %v14386_v46  ;;  %v14456_v46 = vld [vmem:[#allocation75_spill] sm:$0xff] }
 0x453   : > { %v4859_v33 = vpack.c.bf16 %v14370_v41, %v4841_v60  ;;  %vm14440_vm13 = vmmov %vm14419_vm1  ;;  %v14442_v41 = vld [vmem:[#allocation42_spill] sm:$0xff]  ;;  %v14454_v22 = vld [vmem:[#allocation73_spill] sm:$0xff] }
 0x454   : > { %9046 = vmatmul.mubr.msk.bf16.gmra.mrb[28].mxu1 %vm14419_vm1, %v4852_v18  ;;  %v4858_v18 = vpack.c.bf16 %v14434_v3, %v4839_v17  ;;  %v14462_v60 = vld [vmem:[#allocation80_spill] sm:$0xff]  ;;  %v7609_v35 = vld [vmem:[%s13523_s9] sm:$0x3] }
 0x455   : > { %9049 = vmatprep.mubr.msk.bf16.mxu1 %vm14420_vm9, %v4853_v14  ;;  %vm14430_vm9 = vmmov %vm14419_vm1  ;;  %v14437_v14 = vld [vmem:[#allocation41_spill] sm:$0xff]  ;;  %v5386_v45 = vsel %vm14314_vm15, %v14462_v60, 0.0  ;;  %v14466_v6 = vld [vmem:[#allocation84_spill] sm:$0xff] }
 0x456   : > { %v4843_v53 = vsel %vm14439_vm2, %v14437_v14, 0.0  ;;  %v8293_v60 = vld [vmem:[%s13521_s7 + $0x18] sm:$0xf] }
 0x457   : > { %v4860_v38 = vpack.c.bf16 %v14372_v5, %v4843_v53  ;;  %v14471_v53 = vld [vmem:[#allocation86_spill] sm:$0xff] }
 0x45c   : > { %9050 = vmatmul.mubr.msk.bf16.gmra.mrb[0].mxu1 %vm14425_vm4, %v4854_v42  ;;  %vm14441_vm4 = vmmov %vm14419_vm1  ;;  %v5372_v42 = vsel %vm14382_vm8, %v14442_v41, 0.0  ;;  %v14499_v41 = vld [vmem:[#allocation67_spill] sm:$0xff] }
 0x45d   : > { %9053 = vmatprep.mubr.msk.bf16.mxu1 %vm14426_vm3, %v4855_v0  ;;  %vm14443_vm3 = vnez %v14384_v20  ;;  %v5402_v58 = vpack.c.bf16 %v5372_v42, %v14444_v43  ;;  %vm14447_vm7 = vmmov %vm14441_vm4  ;;  %v5378_v20 = vsel %vm14394_vm5, %v14451_v49, 0.0  ;;  %v14501_v42 = vld [vmem:[#allocation70_spill] sm:$0xff]  ;;  %v14505_v43 = vld [vmem:[#allocation45_spill] sm:$0xff] }
 0x45e   : > { %v5374_v0 = vsel %vm14443_vm3, %v14375_v24, 0.0  ;;  %v5376_v24 = vsel %vm14450_vm0, %v14380_v51, 0.0  ;;  %vm14458_vm5 = vmmov %vm14441_vm4  ;;  %vm14475_vm0 = vnez %v14327_v37  ;;  %v14493_v37 = vld [vmem:[#allocation55_spill] sm:$0xff] }
 0x45f   : > { %v5403_v5 = vpack.c.bf16 %v5374_v0, %v12549_v48  ;;  %v5404_v48 = vpack.c.bf16 %v5376_v24, %v12551_v1  ;;  %v14459_v1 = vld [vmem:[#allocation78_spill] sm:$0xff]  ;;  %v14503_v0 = vld [vmem:[#allocation33_spill] sm:$0xff]  ;;  %v14511_v49 = vld [vmem:[#allocation83_spill] sm:$0xff] }
 0x464   : > { %9054 = vmatmul.mubr.msk.bf16.gmra.mrb[4].mxu1 %vm14419_vm1, %v4856_v63  ;;  %vm14446_vm1 = vcmask 1043456   ;;  %v5405_v63 = vpack.c.bf16 %v5378_v20, %v12564_v30  ;;  %v14460_v30 = vld [vmem:[#allocation44_spill] sm:$0xff] }
 0x465   : > { %9057 = vmatprep.mubr.msk.bf16.mxu1 %vm14430_vm9, %v4857_v12  ;;  %v5794_v50 = vsel %vm14446_vm1, %v14445_v55, 0  ;;  %vm14448_vm9 = vmmov %vm14441_vm4  ;;  %v5380_v12 = vsel %vm14398_vm11, %v14454_v22, 0.0  ;;  %vm14461_vm3 = vnez %v14460_v30  ;;  %v14513_v20 = vld [vmem:[#allocation104_spill] sm:$0xff]  ;;  %v14514_v22 = vld [vmem:[#allocation109_spill] sm:$0xff] }
 0x466   : > { %vm14449_vm8 = vmmov %vm14446_vm1  ;;  %v5406_v61 = vpack.c.bf16 %v5380_v12, %v14456_v46  ;;  %v5384_v36 = vsel %vm14461_vm3, %v14459_v1, 0.0 }
 0x467   : > { %v5408_v3 = vpack.c.bf16 %v5384_v36, %v12584_v34  ;;  %vm14463_vm11 = vmmov %vm14441_vm4  ;;  %v14469_v34 = vld [vmem:[#allocation85_spill] sm:$0xff] }
 0x468   : > { %vm14464_vm1 = vmmov %vm14441_vm4 }
 0x469   : > { %vm14467_vm15 = vmmov %vm14464_vm1 }
 0x46a   : > { %vm14483_vm3 = vmmov %vm14464_vm1 }
 0x46c   : > { %9058 = vmatmul.mubr.msk.bf16.gmra.mrb[8].mxu1 %vm14435_vm14, %v4858_v18  ;;  %vm14452_vm14 = vmmov %vm14441_vm4 }
 0x46d   : > { %9061 = vmatprep.mubr.msk.bf16.mxu1 %vm14436_vm6, %v4859_v33  ;;  %vm14453_vm6 = vmmov %vm14441_vm4  ;;  %v5390_v33 = vsel %vm14412_vm10, %v12615_v57, 0.0 }
 0x46e   : > { %v5411_v23 = vpack.c.bf16 %v5390_v33, %v12613_v59  ;;  %vm14474_vm10 = vmmov %vm14464_vm1  ;;  %v5396_v59 = vsel %vm14475_vm0, %v12663_v2, 0.0  ;;  %v14482_v2 = vld [vmem:[#allocation30_spill] sm:$0xff] }
 0x46f   : > { %vm14498_vm0 = vmmov %vm14464_vm1 }
 0x474   : > { %9062 = vmatmul.mubr.msk.bf16.gmra.mrb[12].mxu1 %vm14440_vm13, %v4860_v38  ;;  %vm14455_vm13 = vnez %v14400_v10  ;;  %v14465_v10 = vld [vmem:[#allocation81_spill] sm:$0xff]  ;;  %v14495_v38 = vld [vmem:[#allocation11_spill] sm:$0xff] }
 0x475   : > { %9067 = vmatprep.mubr.msk.bf16.mxu1 %vm14441_vm4, %v5401_v16  ;;  %v5382_v51 = vsel %vm14455_vm13, %v14392_v62, 0.0  ;;  %v5409_v62 = vpack.c.bf16 %v5386_v45, %v12599_v52  ;;  %v5388_v18 = vsel %vm14316_vm12, %v14465_v10, 0.0  ;;  %vm14473_vm12 = vmmov %vm14464_vm1  ;;  %v14497_v16 = vld [vmem:[#allocation25_spill] sm:$0xff]  ;;  %v14519_v45 = vld [vmem:[#allocation10_spill] sm:$0xff] }
 0x476   : > { %v5407_v17 = vpack.c.bf16 %v5382_v51, %v14457_v44  ;;  %v5410_v14 = vpack.c.bf16 %v5388_v18, %v14466_v6  ;;  %vm14478_vm13 = vmmov %vm14464_vm1  ;;  %v14516_v44 = vld [vmem:[#allocation9_spill] sm:$0xff]  ;;  %v14524_v6 = vld [vmem:[#allocation54_spill] sm:$0xff] }
 0x47c   : > { %9068 = vmatmul.mubr.msk.bf16.vlgmr.msra.gmra.mrb[16].mxu1 %vm14447_vm7, %v5402_v58  ;;  %vm14468_vm7 = vmmov %vm14464_vm1  ;;  %v14507_v58 = vld [vmem:[#allocation74_spill] sm:$0xff] }
 0x47d   : > { %9100 = vmatpush3.bf16.msra.mxu1 %v5794_v50  ;;  %9071 = vmatprep.mubr.msk.bf16.mxu1 %vm14448_vm9, %v5403_v5  ;;  %vm14470_vm9 = vnez %v14413_v7  ;;  %v5414_v7 = vpack.c.bf16 %v5396_v59, %v12649_v40  ;;  %v8276_v40 = vld [vmem:[%s13521_s7 + $0x14] sm:$0xf]  ;;  %v14539_v59 = vld [vmem:[#allocation62_spill] sm:$0xff] }
 0x47e   : > { %9929 = vmatprep.subr.msk.bf16.mxu1 %vm14449_vm8, %v8259_v8  ;;  %v5392_v52 = vsel %vm14470_vm9, %v14469_v34, 0.0  ;;  %vm14472_vm8 = vnez %v14325_v9  ;;  %vm14490_vm9 = vmmov %vm14464_vm1  ;;  %v14527_v34 = vld [vmem:[#allocation65_spill] sm:$0xff] }
 0x47f   : > { %v5394_v39 = vsel %vm14472_vm8, %v14471_v53, 0.0  ;;  %v5412_v47 = vpack.c.bf16 %v5392_v52, %v12629_v25  ;;  %v14479_v25 = vld [vmem:[#allocation61_spill] sm:$0xff]  ;;  %vm14492_vm8 = vmmov %vm14464_vm1  ;;  %v14529_v52 = vld [vmem:[#allocation47_spill] sm:$0xff] }
 0x480   : > { %v5413_v57 = vpack.c.bf16 %v5394_v39, %v12647_v27  ;;  %v14531_v53 = vld [vmem:[#allocation12_spill] sm:$0xff]  ;;  %v14533_v39 = vld [vmem:[#allocation27_spill] sm:$0xff] }
 0x484   : > { %9072 = vmatmul.mubr.msk.bf16.gmra.mrb[20].mxu1 %vm14452_vm14, %v5404_v48  ;;  %vm14476_vm14 = vnez %v14329_v56  ;;  %v5725_v48 = vsel %vm14439_vm2, %v14513_v20, 0.0  ;;  %v14577_v20 = vld [vmem:[#allocation60_spill] sm:$0xff] }
 0x485   : > { %9075 = vmatprep.mubr.msk.bf16.mxu1 %vm14453_vm6, %v5405_v63  ;;  %v5398_v32 = vsel %vm14476_vm14, %v12665_v28, 0.0  ;;  %vm14477_vm6 = vmmov %vm14464_vm1  ;;  %v14486_v28 = vld [vmem:[#allocation49_spill] sm:$0xff]  ;;  %v5742_v12 = vpack.c.bf16 %v14514_v22, %v5725_v48 }
 0x486   : > { %v5415_v9 = vpack.c.bf16 %v5398_v32, %v12683_v19  ;;  %v14485_v19 = vld [vmem:[#allocation51_spill] sm:$0xff]  ;;  %vm14500_vm14 = vmmov %vm14498_vm0 }
 0x487   : > { %v14541_v32 = vld [vmem:[#allocation35_spill] sm:$0xff] }
 0x48c   : > { %9076 = vmatmul.mubr.msk.bf16.gmra.mrb[24].mxu1 %vm14458_vm5, %v5406_v61  ;;  %vm14480_vm5 = vnez %v14479_v25  ;;  %v9986_v25 = vld [vmem:[%s10216_s18 + $0x28] sm:$0xff] }
 0x48d   : > { %9079 = vmatprep.mubr.msk.bf16.mxu1 %vm14441_vm4, %v5407_v17  ;;  %v5400_v27 = vsel %vm14480_vm5, %v12667_v31, 0.0  ;;  %vm14481_vm4 = vmmov %vm14464_vm1  ;;  %v14491_v31 = vld [vmem:[#allocation57_spill] sm:$0xff]  ;;  %v6346_v48 = vsel %vm14480_vm5, %v12891_v4, 0.0 }
 0x48e   : > { %v5416_v11 = vpack.c.bf16 %v5400_v27, %v12685_v29  ;;  %v14489_v29 = vld [vmem:[#allocation53_spill] sm:$0xff]  ;;  %v6019_v27 = vld [vmem:[#allocation3 + $0x108] sm:$0xff]  ;;  %v6362_v22 = vpack.c.bf16 %v6346_v48, %v12905_v15 }
 0x48f   : > { %v14588_v15 = vld [vmem:[#allocation102_spill] sm:$0xff]  ;;  %v14590_v4 = vld [vmem:[#allocation105_spill] sm:$0xff] }
 0x490   : > { %v6947_v48 = vld [vmem:[#allocation3 + $0x88] sm:$0xff] }
 0x494   : > { %9080 = vmatmul.mubr.msk.bf16.gmra.mrb[28].mxu1 %vm14463_vm11, %v5408_v3  ;;  %vm14484_vm11 = vcmask 1043456  }
 0x495   : > { %9083 = vmatprep.mubr.msk.bf16.mxu1 %vm14464_vm1, %v5409_v62  ;;  %v6088_v56 = vsel %vm14484_vm11, %v8259_v8, 0  ;;  %v14509_v8 = vld [vmem:[#allocation82_spill] sm:$0xff]  ;;  %v14521_v62 = vld [vmem:[#allocation31_spill] sm:$0xff] }
 0x49c   : > { %9084 = vmatmul.mubr.msk.bf16.gmra.mrb[0].mxu1 %vm14467_vm15, %v5410_v14  ;;  %vm14487_vm15 = vmmov %vm14464_vm1 }
 0x49d   : > { %9087 = vmatprep.mubr.msk.bf16.mxu1 %vm14468_vm7, %v5411_v23  ;;  %vm14488_vm7 = vmmov %vm14484_vm11  ;;  %v14525_v23 = vld [vmem:[#allocation63_spill] sm:$0xff] }
 0x49e   : > { %vm14510_vm11 = vmmov %vm14498_vm0 }
 0x4a4   : > { %9088 = vmatmul.mubr.msk.bf16.gmra.mrb[4].mxu1 %vm14473_vm12, %v5412_v47  ;;  %vm14494_vm12 = vmmov %vm14464_vm1  ;;  %v14535_v47 = vld [vmem:[#allocation29_spill] sm:$0xff] }
 0x4a5   : > { %9091 = vmatprep.mubr.msk.bf16.mxu1 %vm14474_vm10, %v5413_v57  ;;  %vm14496_vm10 = vmmov %vm14464_vm1  ;;  %v14537_v57 = vld [vmem:[#allocation13_spill] sm:$0xff] }
 0x4ac   : > { %9092 = vmatmul.mubr.msk.bf16.gmra.mrb[8].mxu1 %vm14477_vm6, %v5414_v7  ;;  %vm14502_vm6 = vmmov %vm14498_vm0  ;;  %v14543_v7 = vld [vmem:[#allocation37_spill] sm:$0xff] }
 0x4ad   : > { %9095 = vmatprep.mubr.msk.bf16.mxu1 %vm14478_vm13, %v5415_v9  ;;  %vm14504_vm13 = vmmov %vm14498_vm0  ;;  %v14545_v9 = vld [vmem:[#allocation79_spill] sm:$0xff] }
 0x4b4   : > { %9096 = vmatmul.mubr.msk.bf16.gmra.mrb[12].mxu1 %vm14481_vm4, %v5416_v11  ;;  %vm14506_vm4 = vmmov %vm14498_vm0  ;;  %v6020_v11 = vld [vmem:[#allocation3 + $0x110] sm:$0xff] }
 0x4b5   : > { %9101 = vmatprep.mubr.msk.bf16.mxu1 %vm14483_vm3, %v14482_v2  ;;  %vm14508_vm3 = vmmov %vm14498_vm0  ;;  %v13186_v2 = vpack.c.bf16 %v6020_v11, %v6019_v27  ;;  %v6935_v27 = vld [vmem:[#allocation3 + $0x28] sm:$0xff]  ;;  %v6936_v11 = vld [vmem:[#allocation3 + $0x30] sm:$0xff] }
 0x4bc   : > { %9102 = vmatmul.mubr.msk.bf16.vlgmr.msra.gmra.mrb[16].mxu1 %vm14464_vm1, %v14485_v19  ;;  %vm14512_vm1 = vmmov %vm14498_vm0  ;;  %v8310_v19 = vld [vmem:[%s13521_s7 + $0x1c] sm:$0xf] }
 0x4bd   : > { %9134 = vmatpush3.bf16.msra.mxu1 %v6088_v56  ;;  %9105 = vmatprep.mubr.msk.bf16.mxu1 %vm14487_vm15, %v14486_v28  ;;  %vm14515_vm15 = vmmov %vm14498_vm0  ;;  %v14548_v56 = vld [vmem:[#allocation87_spill] sm:$0xff]  ;;  %v14551_v28 = vld [vmem:[#allocation88_spill] sm:$0xff] }
 0x4be   : > { %9930 = vmatprep.subr.msk.bf16.mxu1 %vm14488_vm7, %v8276_v40  ;;  %vm14517_vm7 = vmmov %vm14498_vm0 }
 0x4c4   : > { %9106 = vmatmul.mubr.msk.bf16.gmra.mrb[20].mxu1 %vm14490_vm9, %v14489_v29  ;;  %vm14518_vm9 = vcmask 1043456   ;;  %v14553_v29 = vld [vmem:[#allocation89_spill] sm:$0xff] }
 0x4c5   : > { %9109 = vmatprep.mubr.msk.bf16.mxu1 %vm14492_vm8, %v14491_v31  ;;  %v6414_v1 = vsel %vm14518_vm9, %v8276_v40, 0  ;;  %vm14520_vm8 = vmmov %vm14498_vm0  ;;  %v14556_v31 = vld [vmem:[#allocation90_spill] sm:$0xff] }
 0x4cc   : > { %9110 = vmatmul.mubr.msk.bf16.gmra.mrb[24].mxu1 %vm14494_vm12, %v14493_v37  ;;  %vm14522_vm12 = vmmov %vm14498_vm0  ;;  %v14558_v37 = vld [vmem:[#allocation91_spill] sm:$0xff] }
 0x4cd   : > { %9113 = vmatprep.mubr.msk.bf16.mxu1 %vm14496_vm10, %v14495_v38  ;;  %vm14523_vm10 = vmmov %vm14518_vm9  ;;  %v14560_v38 = vld [vmem:[#allocation92_spill] sm:$0xff] }
 0x4ce   : > { %vm14544_vm9 = vmmov %vm14498_vm0 }
 0x4d4   : > { %9114 = vmatmul.mubr.msk.bf16.gmra.mrb[28].mxu1 %vm14498_vm0, %v14497_v16  ;;  %v14562_v16 = vld [vmem:[#allocation93_spill] sm:$0xff] }
 0x4d5   : > { %9117 = vmatprep.mubr.msk.bf16.mxu1 %vm14500_vm14, %v14499_v41  ;;  %vm14526_vm14 = vmmov %vm14498_vm0  ;;  %v14563_v41 = vld [vmem:[#allocation94_spill] sm:$0xff] }
 0x4dc   : > { %9118 = vmatmul.mubr.msk.bf16.gmra.mrb[0].mxu1 %vm14502_vm6, %v14501_v42  ;;  %vm14528_vm6 = vmmov %vm14498_vm0  ;;  %v14565_v42 = vld [vmem:[#allocation95_spill] sm:$0xff] }
 0x4dd   : > { %9121 = vmatprep.mubr.msk.bf16.mxu1 %vm14504_vm13, %v14503_v0  ;;  %vm14530_vm13 = vmmov %vm14498_vm0  ;;  %v14567_v0 = vld [vmem:[#allocation96_spill] sm:$0xff] }
 0x4de   : > { %v13110_v55 = vpop.f32.mrb[32].mxu0 }
 0x4df   : > { %v13112_v50 = vpop.f32.mrb[33].mxu0 }
 0x4e0   : > { %v13114_v5 = vpop.f32.mrb[34].mxu0 }
 0x4e1   : > { %v13118_v24 = vpop.f32.mrb[35].mxu0 }
 0x4e4   : > { %9122 = vmatmul.mubr.msk.bf16.gmra.mrb[4].mxu1 %vm14506_vm4, %v14505_v43  ;;  %vm14532_vm4 = vmmov %vm14498_vm0  ;;  %v14569_v43 = vld [vmem:[#allocation97_spill] sm:$0xff] }
 0x4e5   : > { %9125 = vmatprep.mubr.msk.bf16.mxu1 %vm14508_vm3, %v14507_v58  ;;  %vm14534_vm3 = vmmov %vm14498_vm0  ;;  %v14571_v58 = vld [vmem:[#allocation98_spill] sm:$0xff] }
 0x4e6   : > { %v13125_v63 = vpop.f32.mrb[36].mxu0 }
 0x4e7   : > { %v13128_v51 = vpop.f32.mrb[37].mxu0 }
 0x4e8   : > { %v13130_v46 = vpop.f32.mrb[38].mxu0 }
 0x4e9   : > { %v13133_v61 = vpop.f32.mrb[39].mxu0 }
 0x4ec   : > { %9126 = vmatmul.mubr.msk.bf16.gmra.mrb[8].mxu1 %vm14510_vm11, %v14509_v8  ;;  %vm14536_vm11 = vmmov %vm14498_vm0  ;;  %v14573_v8 = vld [vmem:[#allocation58_spill] sm:$0xff] }
 0x4ed   : > { %9129 = vmatprep.mubr.msk.bf16.mxu1 %vm14512_vm1, %v14511_v49  ;;  %vm14538_vm1 = vmmov %vm14498_vm0  ;;  %v14575_v49 = vld [vmem:[#allocation59_spill] sm:$0xff] }
 0x4ee   : > { %v13137_v17 = vpop.f32.mrb[40].mxu0 }
 0x4ef   : > { %v13140_v30 = vpop.f32.mrb[41].mxu0 }
 0x4f0   : > { %v13142_v36 = vpop.f32.mrb[42].mxu0 }
 0x4f1   : > { %v13149_v3 = vpop.f32.mrb[43].mxu0 }
 0x4f4   : > { %9130 = vmatmul.mubr.msk.bf16.gmra.mrb[12].mxu1 %vm14515_vm15, %v5742_v12  ;;  %vm14540_vm15 = vmmov %vm14498_vm0  ;;  %v14580_v12 = vld [vmem:[#allocation99_spill] sm:$0xff] }
 0x4f5   : > { %9135 = vmatprep.mubr.msk.bf16.mxu1 %vm14517_vm7, %v14516_v44  ;;  %vm14542_vm7 = vmmov %vm14498_vm0 }
 0x4f6   : > { %v13154_v10 = vpop.f32.mrb[44].mxu0 }
 0x4f7   : > { %v13156_v18 = vpop.f32.mrb[45].mxu0 }
 0x4f8   : > { %v13158_v33 = vpop.f32.mrb[46].mxu0 }
 0x4f9   : > { %v13162_v14 = vpop.f32.mrb[47].mxu0 }
 0x4fc   : > { %9136 = vmatmul.mubr.msk.bf16.vlgmr.msra.gmra.mrb[16].mxu1 %vm14520_vm8, %v14519_v45  ;;  %vm14546_vm8 = vmmov %vm14498_vm0  ;;  %v14585_v45 = vld [vmem:[#allocation101_spill] sm:$0xff] }
 0x4fd   : > { %9168 = vmatpush3.bf16.msra.mxu1 %v6414_v1  ;;  %9139 = vmatprep.mubr.msk.bf16.mxu1 %vm14522_vm12, %v14521_v62  ;;  %vm14547_vm12 = vmmov %vm14498_vm0  ;;  %v8327_v1 = vld [vmem:[%s13521_s7 + $0x20] sm:$0xf]  ;;  %v14592_v62 = vld [vmem:[#allocation106_spill] sm:$0xff] }
 0x4fe   : > { %9931 = vmatprep.subr.msk.bf16.mxu1 %vm14523_vm10, %v8293_v60  ;;  %vm14549_vm10 = vmmov %vm14498_vm0 }
 0x504   : > { %9140 = vmatmul.mubr.msk.bf16.gmra.mrb[20].mxu1 %vm14498_vm0, %v14524_v6  ;;  %vm14550_vm0 = vcmask 1043456   ;;  %v14594_v6 = vld [vmem:[#allocation107_spill] sm:$0xff] }
 0x505   : > { %9143 = vmatprep.mubr.msk.bf16.mxu1 %vm14526_vm14, %v14525_v23  ;;  %v6740_v40 = vsel %vm14550_vm0, %v8293_v60, 0  ;;  %vm14552_vm14 = vmmov %vm14538_vm1  ;;  %v14583_v60 = vld [vmem:[#allocation100_spill] sm:$0xff] }
 0x506   : > { %v14596_v23 = vld [vmem:[#allocation108_spill] sm:$0xff] }
 0x50c   : > { %9144 = vmatmul.mubr.msk.bf16.gmra.mrb[24].mxu1 %vm14528_vm6, %v14527_v34  ;;  %vm14554_vm6 = vmmov %vm14538_vm1  ;;  %v14598_v34 = vld [vmem:[#allocation16_spill] sm:$0xff] }
 0x50d   : > { %9147 = vmatprep.mubr.msk.bf16.mxu1 %vm14530_vm13, %v14529_v52  ;;  %vm14555_vm13 = vmmov %vm14550_vm0  ;;  %v14600_v52 = vld [vmem:[#allocation64_spill] sm:$0xff] }
 0x50e   : > { %vm14576_vm0 = vmmov %vm14538_vm1 }
 0x514   : > { %9148 = vmatmul.mubr.msk.bf16.gmra.mrb[28].mxu1 %vm14532_vm4, %v14531_v53  ;;  %vm14557_vm4 = vmmov %vm14538_vm1  ;;  %v14601_v53 = vld [vmem:[#allocation68_spill] sm:$0xff] }
 0x515   : > { %9151 = vmatprep.mubr.msk.bf16.mxu1 %vm14534_vm3, %v14533_v39  ;;  %vm14559_vm3 = vmmov %vm14538_vm1  ;;  %v14603_v39 = vld [vmem:[#allocation18_spill] sm:$0xff] }
 0x51c   : > { %9152 = vmatmul.mubr.msk.bf16.gmra.mrb[0].mxu1 %vm14536_vm11, %v14535_v47  ;;  %vm14561_vm11 = vmmov %vm14538_vm1  ;;  %v14605_v47 = vld [vmem:[#allocation39_spill] sm:$0xff] }
 0x51d   : > { %9155 = vmatprep.mubr.msk.bf16.mxu1 %vm14538_vm1, %v14537_v57  ;;  %v14607_v57 = vld [vmem:[#allocation19_spill] sm:$0xff] }
 0x524   : > { %9156 = vmatmul.mubr.msk.bf16.gmra.mrb[4].mxu1 %vm14540_vm15, %v14539_v59  ;;  %vm14564_vm15 = vmmov %vm14538_vm1  ;;  %v6639_v59 = vld [vmem:[#allocation3 + $0x117] sm:$0xff] }
 0x525   : > { %9159 = vmatprep.mubr.msk.bf16.mxu1 %vm14542_vm7, %v14541_v32  ;;  %vm14566_vm7 = vmmov %vm14538_vm1  ;;  %v14609_v32 = vld [vmem:[#allocation20_spill] sm:$0xff] }
 0x52c   : > { %9160 = vmatmul.mubr.msk.bf16.gmra.mrb[8].mxu1 %vm14544_vm9, %v14543_v7  ;;  %vm14568_vm9 = vmmov %vm14538_vm1  ;;  %v6640_v7 = vld [vmem:[#allocation3 + $0x11f] sm:$0xff] }
 0x52d   : > { %9163 = vmatprep.mubr.msk.bf16.mxu1 %vm14546_vm8, %v14545_v9  ;;  %vm14570_vm8 = vmmov %vm14538_vm1  ;;  %v6671_v9 = vsel %vm14439_vm2, %v6639_v59, 0.0  ;;  %v6959_v59 = vld [vmem:[#allocation3 + $0xe8] sm:$0xff] }
 0x52e   : > { %vm14614_vm2 = vmmov %vm14576_vm0 }
 0x534   : > { %9164 = vmatmul.mubr.msk.bf16.gmra.mrb[12].mxu1 %vm14547_vm12, %v13186_v2  ;;  %vm14572_vm12 = vmmov %vm14538_vm1 }
 0x535   : > { %9169 = vmatprep.mubr.msk.bf16.mxu1 %vm14549_vm10, %v14548_v56  ;;  %vm14574_vm10 = vmmov %vm14538_vm1  ;;  %v6688_v56 = vpack.c.bf16 %v6640_v7, %v6671_v9 }
 0x53c   : > { %9170 = vmatmul.mubr.msk.bf16.vlgmr.msra.gmra.mrb[16].mxu1 %vm14552_vm14, %v14551_v28  ;;  %vm14578_vm14 = vmmov %vm14576_vm0  ;;  %v6938_v28 = vld [vmem:[#allocation3 + $0x40] sm:$0xff] }
 0x53d   : > { %9202 = vmatpush3.bf16.msra.mxu1 %v6740_v40  ;;  %9173 = vmatprep.mubr.msk.bf16.mxu1 %vm14554_vm6, %v14553_v29  ;;  %vm14579_vm6 = vmmov %vm14576_vm0  ;;  %v6967_v40 = vpack.c.bf16 %v6936_v11, %v6935_v27  ;;  %v6939_v29 = vld [vmem:[#allocation3 + $0x48] sm:$0xff]  ;;  %v6961_v27 = vld [vmem:[#allocation3 + $0xf8] sm:$0xff] }
 0x53e   : > { %9932 = vmatprep.subr.msk.bf16.mxu1 %vm14555_vm13, %v8310_v19  ;;  %vm14581_vm13 = vmmov %vm14576_vm0  ;;  %v6962_v11 = vld [vmem:[#allocation3 + $0x100] sm:$0xff] }
 0x544   : > { %9174 = vmatmul.mubr.msk.bf16.gmra.mrb[20].mxu1 %vm14557_vm4, %v14556_v31  ;;  %vm14582_vm4 = vcmask 1043456   ;;  %v6940_v31 = vld [vmem:[#allocation3 + $0x50] sm:$0xff] }
 0x545   : > { %9177 = vmatprep.mubr.msk.bf16.mxu1 %vm14559_vm3, %v14558_v37  ;;  %v7034_v44 = vsel %vm14582_vm4, %v8310_v19, 0  ;;  %vm14584_vm3 = vmmov %vm14576_vm0  ;;  %v6937_v19 = vld [vmem:[#allocation3 + $0x38] sm:$0xff] }
 0x546   : > { %v6968_v37 = vpack.c.bf16 %v6938_v28, %v6937_v19  ;;  %v6966_v19 = vld [vmem:[#allocation3 + $0x120] sm:$0xff] }
 0x54c   : > { %9178 = vmatmul.mubr.msk.bf16.gmra.mrb[24].mxu1 %vm14561_vm11, %v14560_v38  ;;  %vm14586_vm11 = vmmov %vm14576_vm0 }
 0x54d   : > { %9181 = vmatprep.mubr.msk.bf16.mxu1 %vm14538_vm1, %v14562_v16  ;;  %vm14587_vm1 = vmmov %vm14582_vm4  ;;  %v6969_v16 = vpack.c.bf16 %v6940_v31, %v6939_v29  ;;  %v14629_v29 = vld [vmem:[#allocation48_spill] sm:$0xff] }
 0x54e   : > { %vm14608_vm4 = vmmov %vm14576_vm0 }
 0x554   : > { %9182 = vmatmul.mubr.msk.bf16.gmra.mrb[28].mxu1 %vm14564_vm15, %v14563_v41  ;;  %vm14589_vm15 = vmmov %vm14576_vm0  ;;  %v6941_v41 = vld [vmem:[#allocation3 + $0x58] sm:$0xff] }
 0x555   : > { %9185 = vmatprep.mubr.msk.bf16.mxu1 %vm14566_vm7, %v14565_v42  ;;  %vm14591_vm7 = vmmov %vm14576_vm0  ;;  %v6942_v42 = vld [vmem:[#allocation3 + $0x60] sm:$0xff] }
 0x55c   : > { %9186 = vmatmul.mubr.msk.bf16.gmra.mrb[0].mxu1 %vm14568_vm9, %v14567_v0  ;;  %vm14593_vm9 = vmmov %vm14576_vm0  ;;  %v6943_v0 = vld [vmem:[#allocation3 + $0x68] sm:$0xff] }
 0x55d   : > { %9189 = vmatprep.mubr.msk.bf16.mxu1 %vm14570_vm8, %v14569_v43  ;;  %vm14595_vm8 = vmmov %vm14576_vm0  ;;  %v6944_v43 = vld [vmem:[#allocation3 + $0x70] sm:$0xff] }
 0x564   : > { %9190 = vmatmul.mubr.msk.bf16.gmra.mrb[4].mxu1 %vm14572_vm12, %v14571_v58  ;;  %vm14597_vm12 = vmmov %vm14576_vm0  ;;  %v6970_v58 = vpack.c.bf16 %v6942_v42, %v6941_v41  ;;  %v14638_v41 = vld [vmem:[#allocation26_spill] sm:$0xff]  ;;  %v14640_v42 = vld [vmem:[#allocation28_spill] sm:$0xff] }
 0x565   : > { %9193 = vmatprep.mubr.msk.bf16.mxu1 %vm14574_vm10, %v14573_v8  ;;  %vm14599_vm10 = vmmov %vm14576_vm0  ;;  %v6971_v8 = vpack.c.bf16 %v6944_v43, %v6943_v0  ;;  %v14644_v0 = vld [vmem:[#allocation77_spill] sm:$0xff]  ;;  %v14647_v43 = vld [vmem:[#allocation34_spill] sm:$0xff] }
 0x56c   : > { %9194 = vmatmul.mubr.msk.bf16.gmra.mrb[8].mxu1 %vm14576_vm0, %v14575_v49  ;;  %v6945_v49 = vld [vmem:[#allocation3 + $0x78] sm:$0xff] }
 0x56d   : > { %9197 = vmatprep.mubr.msk.bf16.mxu1 %vm14578_vm14, %v14577_v20  ;;  %vm14602_vm14 = vmmov %vm14576_vm0  ;;  %v6946_v20 = vld [vmem:[#allocation3 + $0x80] sm:$0xff] }
 0x574   : > { %9198 = vmatmul.mubr.msk.bf16.gmra.mrb[12].mxu1 %vm14579_vm6, %v6362_v22  ;;  %vm14604_vm6 = vmmov %vm14576_vm0  ;;  %v6948_v22 = vld [vmem:[#allocation3 + $0x90] sm:$0xff] }
 0x575   : > { %9203 = vmatprep.mubr.msk.bf16.mxu1 %vm14581_vm13, %v14580_v12  ;;  %vm14606_vm13 = vmmov %vm14576_vm0  ;;  %v6972_v12 = vpack.c.bf16 %v6946_v20, %v6945_v49 }
 0x57c   : > { %9204 = vmatmul.mubr.msk.bf16.vlgmr.msra.gmra.mrb[16].mxu1 %vm14584_vm3, %v14583_v60  ;;  %vm14610_vm3 = vmmov %vm14576_vm0  ;;  %v6950_v60 = vld [vmem:[#allocation3 + $0xa0] sm:$0xff] }
 0x57d   : > { %9236 = vmatpush3.bf16.msra.mxu1 %v7034_v44  ;;  %9207 = vmatprep.mubr.msk.bf16.mxu1 %vm14586_vm11, %v14585_v45  ;;  %vm14611_vm11 = vmmov %vm14576_vm0  ;;  %v6973_v44 = vpack.c.bf16 %v6948_v22, %v6947_v48  ;;  %v6951_v45 = vld [vmem:[#allocation3 + $0xa8] sm:$0xff]  ;;  %v9981_v48 = vld [vmem:[%s10216_s18] sm:$0xff] }
 0x57e   : > { %9933 = vmatprep.subr.msk.bf16.mxu1 %vm14587_vm1, %v8327_v1  ;;  %vm14612_vm1 = vmmov %vm14576_vm0  ;;  %v9982_v22 = vld [vmem:[%s10216_s18 + $0x8] sm:$0xff] }
 0x584   : > { %9208 = vmatmul.mubr.msk.bf16.gmra.mrb[20].mxu1 %vm14589_vm15, %v14588_v15  ;;  %vm14613_vm15 = vcmask 1043456   ;;  %v6952_v15 = vld [vmem:[#allocation3 + $0xb0] sm:$0xff] }
 0x585   : > { %9211 = vmatprep.mubr.msk.bf16.mxu1 %vm14591_vm7, %v14590_v4  ;;  %v7360_v38 = vsel %vm14613_vm15, %v8327_v1, 0  ;;  %vm14615_vm7 = vmmov %vm14576_vm0  ;;  %v6949_v1 = vld [vmem:[#allocation3 + $0x98] sm:$0xff] }
 0x586   : > { %v6974_v4 = vpack.c.bf16 %v6950_v60, %v6949_v1  ;;  %vm14627_vm15 = vmmov %vm14576_vm0  ;;  %v9987_v60 = vld [vmem:[%s10216_s18 + $0x30] sm:$0xff] }
 0x58c   : > { %9212 = vmatmul.mubr.msk.bf16.gmra.mrb[24].mxu1 %vm14593_vm9, %v14592_v62  ;;  %vm14616_vm9 = vcmask 1041408   ;;  %v6975_v62 = vpack.c.bf16 %v6952_v15, %v6951_v45  ;;  %v9988_v45 = vld [vmem:[%s10216_s18 + $0x38] sm:$0xff] }
 0x58d   : > { %9215 = vmatprep.mubr.msk.bf16.mxu1 %vm14595_vm8, %v14594_v6  ;;  %vm14617_vm8 = vmmov %vm14576_vm0  ;;  %v6953_v6 = vld [vmem:[#allocation3 + $0xb8] sm:$0xff]  ;;  %v7659_v31 = vsel %vm14616_vm9, %v7609_v35, 0  ;;  %v7596_v15 = vpack.c.bf16 %v9988_v45, %v9987_v60 }
 0x594   : > { %9216 = vmatmul.mubr.msk.bf16.gmra.mrb[28].mxu1 %vm14597_vm12, %v14596_v23  ;;  %vm14618_vm12 = vmmov %vm14576_vm0  ;;  %v6954_v23 = vld [vmem:[#allocation3 + $0xc0] sm:$0xff] }
 0x595   : > { %9219 = vmatprep.mubr.msk.bf16.mxu1 %vm14599_vm10, %v14598_v34  ;;  %vm14619_vm10 = vmmov %vm14576_vm0  ;;  %v6955_v34 = vld [vmem:[#allocation3 + $0xc8] sm:$0xff] }
 0x59c   : > { %9220 = vmatmul.mubr.msk.bf16.gmra.mrb[0].mxu1 %vm14576_vm0, %v14600_v52  ;;  %v6956_v52 = vld [vmem:[#allocation3 + $0xd0] sm:$0xff] }
 0x59d   : > { %9223 = vmatprep.mubr.msk.bf16.mxu1 %vm14602_vm14, %v14601_v53  ;;  %vm14620_vm14 = vmmov %vm14576_vm0  ;;  %v6976_v53 = vpack.c.bf16 %v6954_v23, %v6953_v6  ;;  %v9991_v23 = vld [vmem:[%s10216_s18 + $0x50] sm:$0xff] }
 0x5a4   : > { %9224 = vmatmul.mubr.msk.bf16.gmra.mrb[4].mxu1 %vm14604_vm6, %v14603_v39  ;;  %vm14621_vm6 = vmmov %vm14576_vm0  ;;  %v6977_v39 = vpack.c.bf16 %v6956_v52, %v6955_v34  ;;  %v9992_v34 = vld [vmem:[%s10216_s18 + $0x58] sm:$0xff] }
 0x5a5   : > { %9227 = vmatprep.mubr.msk.bf16.mxu1 %vm14606_vm13, %v14605_v47  ;;  %vm14622_vm13 = vmmov %vm14576_vm0  ;;  %v6957_v47 = vld [vmem:[#allocation3 + $0xd8] sm:$0xff]  ;;  %v7598_v52 = vpack.c.bf16 %v9992_v34, %v9991_v23 }
 0x5ac   : > { %9228 = vmatmul.mubr.msk.bf16.gmra.mrb[8].mxu1 %vm14608_vm4, %v14607_v57  ;;  %vm14623_vm4 = vmmov %vm14576_vm0  ;;  %v6958_v57 = vld [vmem:[#allocation3 + $0xe0] sm:$0xff] }
 0x5ad   : > { %9231 = vmatprep.mubr.msk.bf16.mxu1 %vm14610_vm3, %v14609_v32  ;;  %v6960_v32 = vld [vmem:[#allocation3 + $0xf0] sm:$0xff]  ;;  %v6978_v7 = vpack.c.bf16 %v6958_v57, %v6957_v47  ;;  %vm14624_vm3 = vmmov %vm14576_vm0  ;;  %v9995_v57 = vld [vmem:[%s10216_s18 + $0x70] sm:$0xff] }
 0x5ae   : > { %v6979_v9 = vpack.c.bf16 %v6960_v32, %v6959_v59  ;;  %v9996_v59 = vld [vmem:[%s10216_s18 + $0x78] sm:$0xff] }
 0x5af   : > { %v7600_v32 = vpack.c.bf16 %v9996_v59, %v9995_v57 }
 0x5b4   : > { %9232 = vmatmul.mubr.msk.bf16.gmra.mrb[12].mxu1 %vm14611_vm11, %v6688_v56  ;;  %vm14625_vm11 = vmmov %vm14576_vm0  ;;  %v6980_v56 = vpack.c.bf16 %v6962_v11, %v6961_v27  ;;  %v9999_v11 = vld [vmem:[%s10216_s18 + $0x90] sm:$0xff] }
 0x5b5   : > { %9237 = vmatprep.mubr.msk.bf16.mxu1 %vm14612_vm1, %v6967_v40  ;;  %vm14626_vm1 = vmmov %vm14576_vm0  ;;  %v6965_v40 = vld [vmem:[#allocation3 + $0x118] sm:$0xff] }
 0x5b6   : > { %v6982_v28 = vpack.c.bf16 %v6966_v19, %v6965_v40  ;;  %v10001_v19 = vld [vmem:[%s10216_s18 + $0xa0] sm:$0xff] }
 0x5bc   : > { %9238 = vmatmul.mubr.msk.bf16.vlgmr.msra.gmra.mrb[16].mxu1 %vm14614_vm2, %v6968_v37  ;;  %vm14628_vm2 = vmmov %vm14576_vm0  ;;  %v14631_v37 = vld [vmem:[#allocation7_spill] sm:$0xff] }
 0x5bd   : > { %9270 = vmatpush3.bf16.msra.mxu1 %v7360_v38  ;;  %9241 = vmatprep.mubr.msk.bf16.mxu1 %vm14615_vm7, %v6969_v16  ;;  %vm14630_vm7 = vmmov %vm14576_vm0  ;;  %v14633_v38 = vld [vmem:[#allocation43_spill] sm:$0xff]  ;;  %v14635_v16 = vld [vmem:[#allocation24_spill] sm:$0xff] }
 0x5be   : > { %9934 = vmatprep.subr.msk.bf16.mxu1 %vm14616_vm9, %v7609_v35  ;;  %v14642_v35 = vld [vmem:[#allocation32_spill] sm:$0xff]  ;;  %vm14654_vm9 = vmmov %vm14576_vm0 }
 0x5c4   : > { %9242 = vmatmul.mubr.msk.bf16.gmra.mrb[20].mxu1 %vm14617_vm8, %v6970_v58  ;;  %vm14632_vm8 = vmmov %vm14576_vm0  ;;  %v14649_v58 = vld [vmem:[#allocation38_spill] sm:$0xff] }
 0x5c5   : > { %9245 = vmatprep.mubr.msk.bf16.mxu1 %vm14618_vm12, %v6971_v8  ;;  %vm14634_vm12 = vmmov %vm14576_vm0  ;;  %v7260_v8 = vld [vmem:[#allocation3 + $0x121] sm:$0xff] }
 0x5c6   : > { %v7292_v49 = vsel %vm14480_vm5, %v7260_v8, 0.0 }
 0x5cc   : > { %9246 = vmatmul.mubr.msk.bf16.gmra.mrb[24].mxu1 %vm14619_vm10, %v6972_v12  ;;  %vm14636_vm10 = vmmov %vm14576_vm0  ;;  %v9984_v12 = vld [vmem:[%s10216_s18 + $0x18] sm:$0xff] }
 0x5cd   : > { %9249 = vmatprep.mubr.msk.bf16.mxu1 %vm14576_vm0, %v6973_v44  ;;  %v9985_v44 = vld [vmem:[%s10216_s18 + $0x20] sm:$0xff] }
 0x5ce   : > { %v7595_v1 = vpack.c.bf16 %v9986_v25, %v9985_v44 }
 0x5d4   : > { %9250 = vmatmul.mubr.msk.bf16.gmra.mrb[28].mxu1 %vm14620_vm14, %v6974_v4  ;;  %vm14639_vm14 = vmmov %vm14576_vm0  ;;  %v9989_v4 = vld [vmem:[%s10216_s18 + $0x40] sm:$0xff] }
 0x5d5   : > { %9253 = vmatprep.mubr.msk.bf16.mxu1 %vm14621_vm6, %v6975_v62  ;;  %vm14641_vm6 = vmmov %vm14576_vm0  ;;  %v9990_v62 = vld [vmem:[%s10216_s18 + $0x48] sm:$0xff] }
 0x5d6   : > { %v7597_v6 = vpack.c.bf16 %v9990_v62, %v9989_v4 }
 0x5dc   : > { %9254 = vmatmul.mubr.msk.bf16.gmra.mrb[0].mxu1 %vm14622_vm13, %v6976_v53  ;;  %vm14643_vm13 = vmmov %vm14576_vm0  ;;  %v9993_v53 = vld [vmem:[%s10216_s18 + $0x60] sm:$0xff] }
 0x5dd   : > { %9257 = vmatprep.mubr.msk.bf16.mxu1 %vm14623_vm4, %v6977_v39  ;;  %vm14645_vm4 = vmmov %vm14576_vm0  ;;  %v9994_v39 = vld [vmem:[%s10216_s18 + $0x68] sm:$0xff] }
 0x5de   : > { %v7599_v47 = vpack.c.bf16 %v9994_v39, %v9993_v53 }
 0x5e4   : > { %9258 = vmatmul.mubr.msk.bf16.gmra.mrb[4].mxu1 %vm14624_vm3, %v6978_v7  ;;  %vm14646_vm3 = vmmov %vm14576_vm0  ;;  %v9997_v7 = vld [vmem:[%s10216_s18 + $0x80] sm:$0xff] }
 0x5e5   : > { %9261 = vmatprep.mubr.msk.bf16.mxu1 %vm14625_vm11, %v6979_v9  ;;  %vm14648_vm11 = vmmov %vm14576_vm0  ;;  %v9998_v9 = vld [vmem:[%s10216_s18 + $0x88] sm:$0xff] }
 0x5e6   : > { %v7601_v27 = vpack.c.bf16 %v9998_v9, %v9997_v7 }
 0x5ec   : > { %9262 = vmatmul.mubr.msk.bf16.gmra.mrb[8].mxu1 %vm14626_vm1, %v6980_v56  ;;  %vm14650_vm1 = vmmov %vm14576_vm0  ;;  %v10000_v56 = vld [vmem:[%s10216_s18 + $0x98] sm:$0xff] }
 0x5ed   : > { %9265 = vmatprep.mubr.msk.bf16.mxu1 %vm14627_vm15, %v13186_v2  ;;  %v14637_v2 = vld [vmem:[#allocation15_spill] sm:$0xff]  ;;  %vm14651_vm15 = vmmov %vm14576_vm0  ;;  %v7602_v40 = vpack.c.bf16 %v10000_v56, %v9999_v11 }
 0x5f4   : > { %9266 = vmatmul.mubr.msk.bf16.gmra.mrb[12].mxu1 %vm14628_vm2, %v6982_v28  ;;  %vm14652_vm2 = vmmov %vm14576_vm0  ;;  %v10002_v28 = vld [vmem:[%s10216_s18 + $0xa8] sm:$0xff] }
 0x5f5   : > { %9271 = vmatprep.mubr.msk.bf16.mxu1 %vm14630_vm7, %v14629_v29  ;;  %vm14653_vm7 = vmmov %vm14576_vm0  ;;  %v7603_v29 = vpack.c.bf16 %v10002_v28, %v10001_v19 }
 0x5fc   : > { %9272 = vmatmul.mubr.msk.bf16.vlgmr.msra.gmra.mrb[16].mxu1 %vm14632_vm8, %v14631_v37  ;;  %vm14655_vm8 = vcmask 31744   ;;  %v10004_v37 = vld [vmem:[%s10216_s18 + $0xb8] sm:$0xff] }
 0x5fd   : > { %9304 = vmatpush3.bf16.msra.mxu1 %v7659_v31  ;;  %9275 = vmatprep.mubr.msk.bf16.mxu1 %vm14634_vm12, %v14633_v38  ;;  %vm14656_vm5 = vmmov %vm14655_vm8  ;;  %v10003_v31 = vld [vmem:[%s10216_s18 + $0xb0] sm:$0xff] }
 0x5fe   : > { %vm14657_vm12 = vmmov %vm14656_vm5  ;;  %v7604_v38 = vpack.c.bf16 %v10004_v37, %v10003_v31 }
 0x604   : > { %9276 = vmatmul.mubr.msk.bf16.gmra.mrb[20].mxu1 %vm14636_vm10, %v14635_v16  ;;  %vm14658_vm10 = vmmov %vm14656_vm5  ;;  %v10005_v16 = vld [vmem:[%s10216_s18 + $0xc0] sm:$0xff] }
 0x605   : > { %9279 = vmatprep.mubr.msk.bf16.mxu1 %vm14576_vm0, %v14637_v2  ;;  %vm14659_vm0 = vmmov %vm14656_vm5  ;;  %v10006_v2 = vld [vmem:[%s10216_s18 + $0xc8] sm:$0xff] }
 0x60c   : > { %9280 = vmatmul.mubr.msk.bf16.gmra.mrb[24].mxu1 %vm14639_vm14, %v14638_v41  ;;  %vm14660_vm14 = vmmov %vm14659_vm0  ;;  %v7605_v41 = vpack.c.bf16 %v10006_v2, %v10005_v16 }
 0x60d   : > { %9283 = vmatprep.mubr.msk.bf16.mxu1 %vm14641_vm6, %v14640_v42  ;;  %vm14661_vm6 = vmmov %vm14659_vm0  ;;  %v10007_v42 = vld [vmem:[%s10216_s18 + $0xd0] sm:$0xff] }
 0x614   : > { %9284 = vmatmul.mubr.msk.bf16.gmra.mrb[28].mxu1 %vm14643_vm13, %v14642_v35  ;;  %vm14662_vm13 = vmmov %vm14659_vm0  ;;  %v10008_v35 = vld [vmem:[%s10216_s18 + $0xd8] sm:$0xff] }
 0x615   : > { %9287 = vmatprep.mubr.msk.bf16.mxu1 %vm14645_vm4, %v14644_v0  ;;  %vm14663_vm4 = vmmov %vm14659_vm0  ;;  %v7606_v0 = vpack.c.bf16 %v10008_v35, %v10007_v42 }
 0x61c   : > { %9288 = vmatmul.mubr.msk.bf16.gmra.mrb[0].mxu1 %vm14646_vm3, %v12920_v13  ;;  %v7259_v13 = vld [vmem:[#allocation3 + $0x119] sm:$0xff]  ;;  %vm14664_vm3 = vmmov %vm14659_vm0 }
 0x61d   : > { %9291 = vmatprep.mubr.msk.bf16.mxu1 %vm14648_vm11, %v14647_v43  ;;  %v7308_v20 = vpack.c.bf16 %v7292_v49, %v7259_v13  ;;  %vm14665_vm11 = vmmov %vm14659_vm0  ;;  %v10009_v43 = vld [vmem:[%s10216_s18 + $0xe0] sm:$0xff]  ;;  %v10011_v13 = vld [vmem:[%s10216_s18 + $0xf0] sm:$0xff] }
 0x61e   : > { %v10012_v49 = vld [vmem:[%s10216_s18 + $0xf8] sm:$0xff] }
 0x624   : > { %9292 = vmatmul.mubr.msk.bf16.gmra.mrb[4].mxu1 %vm14650_vm1, %v14649_v58  ;;  %vm14666_vm1 = vmmov %vm14659_vm0  ;;  %v10010_v58 = vld [vmem:[%s10216_s18 + $0xe8] sm:$0xff] }
 0x625   : > { %9295 = vmatprep.mubr.msk.bf16.mxu1 %vm14651_vm15, %v12933_v26  ;;  %v7593_v26 = vpack.c.bf16 %v9982_v22, %v9981_v48  ;;  %vm14667_vm15 = vmmov %vm14659_vm0  ;;  %v7607_v8 = vpack.c.bf16 %v10010_v58, %v10009_v43  ;;  %v13375_v48 = vld [vmem:[%s13522_s8] ss:$0 sm:$0xff] }
 0x626   : > { %v9339_v22 = vadd.f32 %v13110_v55, %v13375_v48  ;;  %v9345_v25 = vadd.f32 %v13375_v48, %v13118_v24  ;;  %v9347_v24 = vadd.f32 %v13125_v63, %v13375_v48  ;;  %v9351_v34 = vadd.f32 %v13130_v46, %v13375_v48 }
 0x627   : > { %v9353_v39 = vadd.f32 %v13375_v48, %v13133_v61  ;;  %v9355_v46 = vadd.f32 %v13137_v17, %v13375_v48  ;;  %v9357_v11 = vadd.f32 %v13375_v48, %v13140_v30  ;;  %v9359_v56 = vadd.f32 %v13142_v36, %v13375_v48 }
 0x628   : > { %v9361_v28 = vadd.f32 %v13375_v48, %v13149_v3  ;;  %v9363_v36 = vadd.f32 %v13154_v10, %v13375_v48  ;;  %v9365_v42 = vadd.f32 %v13375_v48, %v13156_v18  ;;  %v9367_v35 = vadd.f32 %v13158_v33, %v13375_v48 }
 0x629   : > { %v9369_v58 = vadd.f32 %v13375_v48, %v13162_v14 }
 0x62c   : > { %9296 = vmatmul.mubr.msk.bf16.gmra.mrb[8].mxu1 %vm14652_vm2, %v12943_v54  ;;  %v9983_v54 = vld [vmem:[%s10216_s18 + $0x10] sm:$0xff]  ;;  %vm14668_vm2 = vmmov %vm14659_vm0  ;;  %s13388_s18 = scalar_lea.vmem [#allocation4], %s8034_s27  ;;  %s10019_s27 = scalar_lea.vmem %s10018_s25, 8192 }
 0x62d   : > { %9299 = vmatprep.mubr.msk.bf16.mxu1 %vm14653_vm7, %v12946_v21  ;;  %v7594_v21 = vpack.c.bf16 %v9984_v12, %v9983_v54  ;;  %vm14669_vm7 = vmmov %vm14659_vm0  ;;  %v9343_v12 = vadd.f32 %v13114_v5, %v13375_v48  ;;  %s7932_s28 = sshll.u32 %s13388_s18, 4  ;;  %s13466_s28 = int_to_ptr.vmem [resolvable:$true] %s7932_s28 }
 0x62e   : > { %s10013_s20 = scalar_lea.vmem %s13466_s28, 4096  ;;  %p10020_p0 = scmp.lt.s32.totalorder %s13466_s28, %s10018_s25 }
 0x62f   : > { %p10014_p11 = scmp.ne.s32.totalorder %s13466_s28, %s10013_s20  ;;  %p10021_p1 = scmp.lt.s32.totalorder %s10019_s27, %s10013_s20 }
 0x631   : > { %p10015_p12 = pnand %p10014_p11, %p10174_p5  ;;  %p10022_p2 = por %p10021_p1, %p10020_p0 }
 0x633   : > { %p10016_p13 = pneg %p10015_p12 }
 0x634   : > { %9300 = vmatmul.mubr.msk.bf16.gmra.mrb[12].mxu1 %vm14654_vm9, %v7308_v20  ;;  %v7608_v20 = vpack.c.bf16 %v10012_v49, %v10011_v13  ;;  %vm14670_vm9 = vmmov %vm14659_vm0 }
 0x635   : > { %9305 = vmatprep.mubr.msk.bf16.mxu1 %vm14655_vm8, %v7593_v26  ;;  %v9341_v26 = vadd.f32 %v13375_v48, %v13112_v50  ;;  %p10023_p3 = pnand %p10022_p2, %p10016_p13 }
 0x63c   : > { %9306 = vmatmul.mubr.msk.bf16.vlgmr.msra.gmra.mrb[16].mxu1 %vm14656_vm5, %v7594_v21 }
 0x63d   : > { %9309 = vmatprep.mubr.msk.bf16.mxu1 %vm14657_vm12, %v7595_v1 }
 0x644   : > { %9310 = vmatmul.mubr.msk.bf16.gmra.mrb[20].mxu1 %vm14658_vm10, %v7596_v15 }
 0x645   : > { %9313 = vmatprep.mubr.msk.bf16.mxu1 %vm14659_vm0, %v7597_v6  ;;  %v9349_v6 = vadd.f32 %v13375_v48, %v13128_v51 }
 0x64c   : > { %9314 = vmatmul.mubr.msk.bf16.gmra.mrb[24].mxu1 %vm14660_vm14, %v7598_v52 }
 0x64d   : > { %9317 = vmatprep.mubr.msk.bf16.mxu1 %vm14661_vm6, %v7599_v47 }
 0x654   : > { %9318 = vmatmul.mubr.msk.bf16.gmra.mrb[28].mxu1 %vm14662_vm13, %v7600_v32 }
 0x655   : > { %9321 = vmatprep.mubr.msk.bf16.mxu1 %vm14663_vm4, %v7601_v27 }
 0x65c   : > { %9322 = vmatmul.mubr.msk.bf16.gmra.mrb[0].mxu1 %vm14664_vm3, %v7602_v40 }
 0x65d   : > { %9325 = vmatprep.mubr.msk.bf16.mxu1 %vm14665_vm11, %v7603_v29 }
 0x664   : > { %9326 = vmatmul.mubr.msk.bf16.gmra.mrb[4].mxu1 %vm14666_vm1, %v7604_v38 }
 0x665   : > { %9329 = vmatprep.mubr.msk.bf16.mxu1 %vm14667_vm15, %v7605_v41 }
 0x66c   : > { %9330 = vmatmul.mubr.msk.bf16.gmra.mrb[8].mxu1 %vm14668_vm2, %v7606_v0 }
 0x66d   : > { %9333 = vmatprep.mubr.msk.bf16.mxu1 %vm14669_vm7, %v7607_v8 }
 0x674   : > { %9334 = vmatmul.mubr.msk.bf16.gmra.mrb[12].mxu1 %vm14670_vm9, %v7608_v20 }
 0x70f   : > { %v9307_v54 = vpop.f32.mrb[16].mxu1 }
 0x710   : > { %v9340_v21 = vadd.f32 %v9339_v22, %v9307_v54  ;;  %v7695_v44 = vpop.f32.mrb[17].mxu1 }
 0x711   : > { %v9342_v1 = vadd.f32 %v9341_v26, %v7695_v44  ;;  %v9308_v60 = vpop.f32.mrb[18].mxu1 }
 0x712   : > { %v7856_v45 = vmul.f32 0.70710677, %v9340_v21  ;;  %v9344_v15 = vadd.f32 %v9343_v12, %v9308_v60  ;;  %v7698_v4 = vpop.f32.mrb[19].mxu1 }
 0x713   : > { %v7854_v55 = vmul.f32 0.70710677, %v9342_v1  ;;  %v9346_v62 = vadd.f32 %v9345_v25, %v7698_v4 }
 0x714   : > { %7888 = vst [vmem:[%s13388_s18 + $0x10] sm:$0xff] %v7856_v45  ;;  %v7857_v50 = vmul.f32 0.70710677, %v9344_v15 }
 0x715   : > { %7886 = vst [vmem:[%s13388_s18] sm:$0xff] %v7854_v55  ;;  %v7855_v5 = vmul.f32 0.70710677, %v9346_v62 }
 0x716   : > { %7889 = vst [vmem:[%s13388_s18 + $0x18] sm:$0xff] %v7857_v50 }
 0x717   : > { %7887 = vst [vmem:[%s13388_s18 + $0x8] sm:$0xff] %v7855_v5  ;;  %v9311_v23 = vpop.f32.mrb[20].mxu1 }
 0x718   : > { %v9348_v52 = vadd.f32 %v9347_v24, %v9311_v23  ;;  %v7711_v53 = vpop.f32.mrb[21].mxu1 }
 0x719   : > { %v9350_v47 = vadd.f32 %v9349_v6, %v7711_v53  ;;  %v9312_v63 = vpop.f32.mrb[22].mxu1 }
 0x71a   : > { %v7860_v57 = vmul.f32 0.70710677, %v9348_v52  ;;  %v9352_v59 = vadd.f32 %v9351_v34, %v9312_v63  ;;  %v7714_v32 = vpop.f32.mrb[23].mxu1 }
 0x71b   : > { %v7858_v7 = vmul.f32 0.70710677, %v9350_v47  ;;  %v9354_v51 = vadd.f32 %v9353_v39, %v7714_v32 }
 0x71c   : > { %7892 = vst [vmem:[%s13388_s18 + $0x30] sm:$0xff] %v7860_v57  ;;  %v7861_v9 = vmul.f32 0.70710677, %v9352_v59 }
 0x71d   : > { %7890 = vst [vmem:[%s13388_s18 + $0x20] sm:$0xff] %v7858_v7  ;;  %v7859_v27 = vmul.f32 0.70710677, %v9354_v51 }
 0x71e   : > { %7893 = vst [vmem:[%s13388_s18 + $0x38] sm:$0xff] %v7861_v9 }
 0x71f   : > { %7891 = vst [vmem:[%s13388_s18 + $0x28] sm:$0xff] %v7859_v27  ;;  %v9315_v61 = vpop.f32.mrb[24].mxu1 }
 0x720   : > { %v9356_v40 = vadd.f32 %v9355_v46, %v9315_v61  ;;  %v7727_v19 = vpop.f32.mrb[25].mxu1 }
 0x721   : > { %v9358_v29 = vadd.f32 %v9357_v11, %v7727_v19  ;;  %v9316_v17 = vpop.f32.mrb[26].mxu1 }
 0x722   : > { %v7864_v31 = vmul.f32 0.70710677, %v9356_v40  ;;  %v9360_v37 = vadd.f32 %v9359_v56, %v9316_v17  ;;  %v7730_v38 = vpop.f32.mrb[27].mxu1 }
 0x723   : > { %v7862_v16 = vmul.f32 0.70710677, %v9358_v29  ;;  %v9362_v30 = vadd.f32 %v9361_v28, %v7730_v38 }
 0x724   : > { %7896 = vst [vmem:[%s13388_s18 + $0x50] sm:$0xff] %v7864_v31  ;;  %v7865_v2 = vmul.f32 0.70710677, %v9360_v37 }
 0x725   : > { %7894 = vst [vmem:[%s13388_s18 + $0x40] sm:$0xff] %v7862_v16  ;;  %v7863_v41 = vmul.f32 0.70710677, %v9362_v30 }
 0x726   : > { %7897 = vst [vmem:[%s13388_s18 + $0x58] sm:$0xff] %v7865_v2 }
 0x727   : > { %7895 = vst [vmem:[%s13388_s18 + $0x48] sm:$0xff] %v7863_v41  ;;  %v9319_v3 = vpop.f32.mrb[28].mxu1 }
 0x728   : > { %v9364_v0 = vadd.f32 %v9363_v36, %v9319_v3  ;;  %v7743_v43 = vpop.f32.mrb[29].mxu1 }
 0x729   : > { %v9366_v8 = vadd.f32 %v9365_v42, %v7743_v43  ;;  %v9320_v10 = vpop.f32.mrb[30].mxu1 }
 0x72a   : > { %v7868_v13 = vmul.f32 0.70710677, %v9364_v0  ;;  %v9368_v49 = vadd.f32 %v9367_v35, %v9320_v10  ;;  %v7746_v20 = vpop.f32.mrb[31].mxu1 }
 0x72b   : > { %v7866_v22 = vmul.f32 0.70710677, %v9366_v8  ;;  %v9370_v18 = vadd.f32 %v9369_v58, %v7746_v20 }
 0x72c   : > { %7900 = vst [vmem:[%s13388_s18 + $0x70] sm:$0xff] %v7868_v13  ;;  %v7869_v26 = vmul.f32 0.70710677, %v9368_v49 }
 0x72d   : > { %7898 = vst [vmem:[%s13388_s18 + $0x60] sm:$0xff] %v7866_v22  ;;  %v7867_v54 = vmul.f32 0.70710677, %v9370_v18 }
 0x72e   : > { %7901 = vst [vmem:[%s13388_s18 + $0x78] sm:$0xff] %v7869_v26 }
 0x72f   : > { %7899 = vst [vmem:[%s13388_s18 + $0x68] sm:$0xff] %v7867_v54  ;;  %v9323_v33 = vpop.f32.mrb[0].mxu1 }
 0x730   : > { %v9371_v14 = vadd.f32 %v9323_v33, %v13375_v48  ;;  %v7759_v12 = vpop.f32.mrb[1].mxu1 }
 0x731   : > { %v9372_v21 = vadd.f32 %v13375_v48, %v7759_v12  ;;  %v9324_v44 = vpop.f32.mrb[2].mxu1 }
 0x732   : > { %v7872_v25 = vmul.f32 0.70710677, %v9371_v14  ;;  %v9373_v1 = vadd.f32 %v9324_v44, %v13375_v48  ;;  %v7762_v60 = vpop.f32.mrb[3].mxu1 }
 0x733   : > { %v7870_v45 = vmul.f32 0.70710677, %v9372_v21  ;;  %v9374_v15 = vadd.f32 %v13375_v48, %v7762_v60 }
 0x734   : > { %7904 = vst [vmem:[%s13388_s18 + $0x90] sm:$0xff] %v7872_v25  ;;  %v7873_v4 = vmul.f32 0.70710677, %v9373_v1 }
 0x735   : > { %7902 = vst [vmem:[%s13388_s18 + $0x80] sm:$0xff] %v7870_v45  ;;  %v7871_v55 = vmul.f32 0.70710677, %v9374_v15 }
 0x736   : > { %7905 = vst [vmem:[%s13388_s18 + $0x98] sm:$0xff] %v7873_v4 }
 0x737   : > { %7903 = vst [vmem:[%s13388_s18 + $0x88] sm:$0xff] %v7871_v55  ;;  %v9327_v62 = vpop.f32.mrb[4].mxu1 }
 0x738   : > { %v9375_v50 = vadd.f32 %v9327_v62, %v13375_v48  ;;  %v7775_v5 = vpop.f32.mrb[5].mxu1 }
 0x739   : > { %v9376_v24 = vadd.f32 %v13375_v48, %v7775_v5  ;;  %v9328_v6 = vpop.f32.mrb[6].mxu1 }
 0x73a   : > { %v7876_v23 = vmul.f32 0.70710677, %v9375_v50  ;;  %v9377_v34 = vadd.f32 %v9328_v6, %v13375_v48  ;;  %v7778_v52 = vpop.f32.mrb[7].mxu1 }
 0x73b   : > { %v7874_v53 = vmul.f32 0.70710677, %v9376_v24  ;;  %v9378_v39 = vadd.f32 %v13375_v48, %v7778_v52 }
 0x73c   : > { %7908 = vst [vmem:[%s13388_s18 + $0xb0] sm:$0xff] %v7876_v23  ;;  %v7877_v47 = vmul.f32 0.70710677, %v9377_v34 }
 0x73d   : > { %7906 = vst [vmem:[%s13388_s18 + $0xa0] sm:$0xff] %v7874_v53  ;;  %v7875_v63 = vmul.f32 0.70710677, %v9378_v39 }
 0x73e   : > { %7909 = vst [vmem:[%s13388_s18 + $0xb8] sm:$0xff] %v7877_v47 }
 0x73f   : > { %7907 = vst [vmem:[%s13388_s18 + $0xa8] sm:$0xff] %v7875_v63  ;;  %v9331_v57 = vpop.f32.mrb[8].mxu1 }
 0x740   : > { %v9379_v59 = vadd.f32 %v9331_v57, %v13375_v48  ;;  %v7791_v32 = vpop.f32.mrb[9].mxu1 }
 0x741   : > { %v9380_v7 = vadd.f32 %v13375_v48, %v7791_v32  ;;  %v9332_v51 = vpop.f32.mrb[10].mxu1 }
 0x742   : > { %v7880_v9 = vmul.f32 0.70710677, %v9379_v59  ;;  %v9381_v27 = vadd.f32 %v9332_v51, %v13375_v48  ;;  %v7794_v46 = vpop.f32.mrb[11].mxu1 }
 0x743   : > { %v7878_v11 = vmul.f32 0.70710677, %v9380_v7  ;;  %v9382_v61 = vadd.f32 %v13375_v48, %v7794_v46 }
 0x744   : > { %7912 = vst [vmem:[%s13388_s18 + $0xd0] sm:$0xff] %v7880_v9  ;;  %v7881_v56 = vmul.f32 0.70710677, %v9381_v27 }
 0x745   : > { %7910 = vst [vmem:[%s13388_s18 + $0xc0] sm:$0xff] %v7878_v11  ;;  %v7879_v40 = vmul.f32 0.70710677, %v9382_v61 }
 0x746   : > { %7913 = vst [vmem:[%s13388_s18 + $0xd8] sm:$0xff] %v7881_v56 }
 0x747   : > { %7911 = vst [vmem:[%s13388_s18 + $0xc8] sm:$0xff] %v7879_v40  ;;  %v9335_v19 = vpop.f32.mrb[12].mxu1 }
 0x748   : > { %v9383_v28 = vadd.f32 %v9335_v19, %v13375_v48  ;;  %v7807_v29 = vpop.f32.mrb[13].mxu1 }
 0x749   : > { %v9384_v17 = vadd.f32 %v13375_v48, %v7807_v29  ;;  %v9336_v31 = vpop.f32.mrb[14].mxu1 }
 0x74a   : > { %v7884_v37 = vmul.f32 0.70710677, %v9383_v28  ;;  %v9385_v38 = vadd.f32 %v9336_v31, %v13375_v48  ;;  %v7810_v16 = vpop.f32.mrb[15].mxu1 }
 0x74b   : > { %v7882_v30 = vmul.f32 0.70710677, %v9384_v17  ;;  %v9386_v2 = vadd.f32 %v13375_v48, %v7810_v16 }
 0x74c   : > { %7916 = vst [vmem:[%s13388_s18 + $0xf0] sm:$0xff] %v7884_v37  ;;  %v7885_v41 = vmul.f32 0.70710677, %v9385_v38 }
 0x74d   : > { %7914 = vst [vmem:[%s13388_s18 + $0xe0] sm:$0xff] %v7882_v30  ;;  %v7883_v36 = vmul.f32 0.70710677, %v9386_v2 }
 0x74e   : > { %7917 = vst [vmem:[%s13388_s18 + $0xf8] sm:$0xff] %v7885_v41 }
 0x74f   : > { %7915 = vst [vmem:[%s13388_s18 + $0xe8] sm:$0xff] %v7883_v36 }
 0x750   : > { %10026 = shalt.err (!%p10023_p3)
}
 0x751   : > { %s10027_s26 = scalar_lea.hbm %s13464_s12, 4096  ;;  %s10031_s30 = scalar_lea.hbm %s13524_s10, 8192 }
 0x752   : > { %p10028_p4 = scmp.ne.s32.totalorder %s13464_s12, %s10027_s26  ;;  %p10032_p9 = scmp.lt.u32.totalorder %s13464_s12, %s13524_s10 }
 0x753   : > { %p10033_p10 = scmp.lt.u32.totalorder %s10031_s30, %s10027_s26  ;;  %p10035_p12 = scmp.lt.u32.totalorder %s10027_s26, %s13464_s12 }
 0x754   : > { %p10029_p7 = pnand %p10028_p4, %p10174_p5 }
 0x755   : > { %p10034_p11 = por %p10033_p10, %p10032_p9 }
 0x756   : > { %p10030_p8 = pneg %p10029_p7 }
 0x757   : > { %p10036_p13 = por %p10035_p12, %p10034_p11 }
 0x759   : > { %p10037_p0 = pnand %p10036_p13, %p10030_p8 }
 0x75b   : > { %10040 = shalt.err (!%p10037_p0)
}
 0x75c   : > { %s10079_s20 = smov 128   ;;  %s10080_s25 = smov 8  }
 0x75d   : > { %9935 = dma.vmem_to_hbm [thread:$0]  (%p10174_p5), %s13466_s28, 4096, %s13464_s12, %s13473_s17, %s10079_s20, %s10079_s20, %s10080_s25  }
 0x75e PF: > { %p9941_p1 = scmp.ge.s32.totalorder %s10075_s16, 2  ;;  %s7947_s27 = sand.u32 1, %s10063_s13  }
 0x75f   : > { %s7948_s26 = scalar_lea.sflag [#allocation5], %s7947_s27 }
 0x760   : > { %p9938_p2 = pnand %p9941_p1, %p10178_p6 }
 0x762   : > { %10058 = dma.done.wait (!%p9938_p2), %s7948_s26, 4096  }
 0x763   : > { %10060 = vsyncadd (!%p9938_p2), %s7948_s26, 4294963200  ;;  %p20_p3 = scmp.ge.s32.totalorder %s10161_s19, 4   ;;  %s14671_s13 = smov %s10067_s14 }
 0x764   : > { %s14672_s14 = smov %s10071_s15  ;;  %s14673_s15 = smov %s10172_s22 }
 0x765   : > { %s14674_s16 = smov %s10161_s19  ;;  %22 = sbr.rel (!%p20_p3) target bundleno = 3 (0x3), region = 123 }
 0x76c   :  { %7953 = vsyncpa [#allocation5], 1 }
 0x76d   :  { %7955 = vsyncpa [#allocation5 + $0x1], 1 }

</bundles_post_ra>
